<compile_context>
chip_gen: v5e
topology: v5e:2x2
jax: 0.10.0
libtpu: 0.0.40
codegen_flags: <defaults>
</compile_context>

<pallas_src>
import functools
import math

import jax
import jax.numpy as jnp
from jax.experimental import pallas as pl
from jax.experimental.pallas import tpu as pltpu


# ---------------------------------------------------------------------------
# Helpers
# ---------------------------------------------------------------------------

def _round_up(x, m):
    return (x + m - 1) // m * m


def _pick_row_tile(H, Wp, target_rows):
    """Largest divisor TH of H with TH*Wp roughly <= target_rows."""
    th = max(1, min(H, target_rows // max(Wp, 1)))
    while H % th != 0:
        th -= 1
    return th


# ---------------------------------------------------------------------------
# Conv3x3(pad=1) + bias + ReLU in the persistent padded layout
# ---------------------------------------------------------------------------

def _conv3x3_kernel(xm_ref, ht_ref, hb_ref, w_ref, b_ref, o_ref, xw_ref,
                    *, TH, Wp, W):
    """One (TH rows x Wp cols) tile of 3x3 conv + bias + ReLU.

    Padded layout: rows are image rows, cols [0, W) real, cols [W, Wp) zero.
    The right zero columns act as right halo and (wrapped) left halo; the
    top/bottom row halos are zeroed here on the first/last row tile.

    xm_ref : (TH*Wp, Cin)  bf16  rows [r*TH, r*TH+TH) of this image
    ht_ref : (Wp, Cin)     bf16  row r*TH-1 (clamped; zeroed when r == 0)
    hb_ref : (Wp, Cin)     bf16  row r*TH+TH (clamped; zeroed when r == last)
    w_ref  : (9, Cin, COt) bf16
    b_ref  : (1, COt)      f32
    o_ref  : (TH, Wp, COt) bf16
    xw_ref : VMEM scratch  >= (TH+3)*Wp + 1 rows x Cin, bf16
    """
    M = TH * Wp
    cin = xm_ref.shape[-1]
    cot = o_ref.shape[-1]
    r = pl.program_id(2)
    nr = pl.num_programs(2)

    # Assemble the working window with ALIGNED copies only:
    #   rows [Wp-1, Wp)     : zero (single element read by the top-left tap)
    #   rows [Wp, 2Wp)      : top halo row   (image row r*TH - 1)
    #   rows [2Wp, 2Wp+M)   : main rows      (image rows [r*TH, r*TH+TH))
    #   rows [2Wp+M, 3Wp+M) : bottom halo row (image row r*TH + TH)
    xw_ref[Wp - 1:Wp, :] = jnp.zeros((1, cin), xw_ref.dtype)
    xw_ref[Wp:2 * Wp, :] = ht_ref[...]
    xw_ref[2 * Wp:2 * Wp + M, :] = xm_ref[...]
    xw_ref[2 * Wp + M:3 * Wp + M, :] = hb_ref[...]

    @pl.when(r == 0)
    def _():  # image row -1 is zero padding
        xw_ref[Wp:2 * Wp, :] = jnp.zeros((Wp, cin), xw_ref.dtype)

    @pl.when(r == nr - 1)
    def _():  # image row H is zero padding
        xw_ref[2 * Wp + M:3 * Wp + M, :] = jnp.zeros((Wp, cin), xw_ref.dtype)

    # 3x3 conv = 9 shifted matmuls, f32 MXU accumulation, bias folded into the
    # accumulator init (saves a full (M, COt) add pass).
    acc = jnp.broadcast_to(b_ref[...], (M, cot))
    for dy in range(3):
        for dx in range(3):
            off = (dy + 1) * Wp + dx - 1
            acc = acc + jnp.dot(xw_ref[off:off + M, :], w_ref[dy * 3 + dx],
                                preferred_element_type=jnp.float32)

    y = jnp.maximum(acc, 0.0).astype(o_ref.dtype).reshape(TH, Wp, cot)
    o_ref[...] = y
    # Keep the padded-layout invariant: alignment columns stay exactly zero
    # (they carry wrap-around garbage from the shifted matmuls otherwise).
    o_ref[:, W:, :] = jnp.zeros((TH, Wp - W, cot), o_ref.dtype)


def conv3x3_relu(x4, w, b, *, W, cout_tile=512, target_rows=2048,
                 vmem_limit=48 * 1024 * 1024):
    """x4: (N, H, Wp, Cin) bf16 padded layout; w: (3,3,Cin,Cout) f32;
    b: (Cout,) f32 -> (N, H, Wp, Cout) bf16 padded layout."""
    N, H, Wp, Cin = x4.shape
    Cout = w.shape[-1]
    COt = Cout if Cout <= cout_tile else cout_tile
    assert Cout % COt == 0
    n_co = Cout // COt

    TH = _pick_row_tile(H, Wp, target_rows)
    n_r = H // TH
    M = TH * Wp

    xf = x4.reshape(N, H * Wp, Cin)            # free, contiguous reshape
    wf = w.reshape(9, Cin, Cout).astype(jnp.bfloat16)
    bf = b.reshape(1, Cout).astype(jnp.float32)

    kernel = functools.partial(_conv3x3_kernel, TH=TH, Wp=Wp, W=W)

    out = pl.pallas_call(
        kernel,
        out_shape=jax.ShapeDtypeStruct((N, H, Wp, Cout), jnp.bfloat16),
        grid=(n_co, N, n_r),
        in_specs=[
            # main TH-row block of the flattened padded input
            pl.BlockSpec((None, M, Cin), lambda co, n, r: (n, r, 0)),
            # top / bottom single-row halos of the SAME array (no HBM copies);
            # clamped at the image edges and zeroed in-kernel there.
            pl.BlockSpec((None, Wp, Cin),
                         lambda co, n, r: (n, jnp.maximum(r * TH - 1, 0), 0)),
            pl.BlockSpec((None, Wp, Cin),
                         lambda co, n, r: (n, jnp.minimum(r * TH + TH, H - 1), 0)),
            # weights / bias: indexed only by the outermost Cout tile ->
            # VMEM-resident across the whole image; single-buffered.
            pl.BlockSpec((9, Cin, COt), lambda co, n, r: (0, 0, co),
                         pipeline_mode=pl.Buffered(1)),
            pl.BlockSpec((1, COt), lambda co, n, r: (0, co),
                         pipeline_mode=pl.Buffered(1)),
        ],
        out_specs=pl.BlockSpec((None, TH, Wp, COt),
                               lambda co, n, r: (n, r, 0, co)),
        scratch_shapes=[
            pltpu.VMEM((_round_up((TH + 3) * Wp + 2, 16), Cin), jnp.bfloat16)],
        compiler_params=pltpu.CompilerParams(
            dimension_semantics=("parallel", "parallel", "parallel"),
            vmem_limit_bytes=vmem_limit,
        ),
    )(xf, xf, xf, wf, bf)
    return out


# ---------------------------------------------------------------------------
# MaxPool2d(2, 2) in the persistent padded layout
# ---------------------------------------------------------------------------

def _maxpool_kernel(x_ref, o_ref, *, Wh, C):
    """x_ref: (TR, 2, Wh, 2*C) -> o_ref: (TR, Wp2, C), cols [Wh, Wp2) zeroed."""
    v = x_ref[...]
    r0 = jnp.maximum(v[:, 0, :, :C], v[:, 0, :, C:])
    r1 = jnp.maximum(v[:, 1, :, :C], v[:, 1, :, C:])
    o_ref[:, :Wh, :] = jnp.maximum(r0, r1)
    if o_ref.shape[1] > Wh:  # static: re-establish the zero-column invariant
        o_ref[:, Wh:, :] = jnp.zeros(
            (o_ref.shape[0], o_ref.shape[1] - Wh, C), o_ref.dtype)


def maxpool2x2(x4, *, W):
    """x4: (N, H, Wp, C) padded layout -> (N, H//2, Wp2, C) padded layout."""
    N, H, Wp, C = x4.shape
    assert H % 2 == 0 and W % 2 == 0, "MaxPool2d(2,2) expects even H/W here"
    # TODO(synk): PyTorch MaxPool2d(2,2) floors odd spatial sizes silently.
    Ho, Wh = H // 2, Wp // 2
    Wp2 = max(_round_up(W // 2 + 1, 16), 16)
    NR = N * Ho

    x5 = x4.reshape(NR, 2, Wh, 2 * C)          # free, contiguity-preserving

    per_row_bytes = 4 * Wp * C + 2 * Wp2 * C   # bf16 in + out per pooled row
    tr = max(1, min(NR, (6 << 20) // max(per_row_bytes, 1)))
    while NR % tr != 0:
        tr -= 1

    out = pl.pallas_call(
        functools.partial(_maxpool_kernel, Wh=Wh, C=C),
        out_shape=jax.ShapeDtypeStruct((NR, Wp2, C), x4.dtype),
        grid=(NR // tr,),
        in_specs=[pl.BlockSpec((tr, 2, Wh, 2 * C), lambda i: (i, 0, 0, 0))],
        out_specs=pl.BlockSpec((tr, Wp2, C), lambda i: (i, 0, 0)),
        compiler_params=pltpu.CompilerParams(
            dimension_semantics=("parallel",),
            vmem_limit_bytes=48 * 1024 * 1024,
        ),
    )(x5)
    return out.reshape(N, Ho, Wp2, C)


# ---------------------------------------------------------------------------
# VGG19 slice1 (features[0:30]) configuration, params, forward
# ---------------------------------------------------------------------------

VGG19_SLICE1_CFG = [
    (3, 64), (64, 64), "M",
    (64, 128), (128, 128), "M",
    (128, 256), (256, 256), (256, 256), (256, 256), "M",
    (256, 512), (512, 512), (512, 512), (512, 512), "M",
    (512, 512),   # conv5_1 (features[28]) followed by ReLU (features[29])
]


def init_vgg19_slice1_params(key):
    params = []
    for item in VGG19_SLICE1_CFG:
        if item == "M":
            continue
        cin, cout = item
        key, wk = jax.random.split(key)
        std = math.sqrt(2.0 / (9 * cin))   # He init, deterministic
        w = jax.random.normal(wk, (3, 3, cin, cout), dtype=jnp.float32) * std
        b = jnp.zeros((cout,), dtype=jnp.float32)
        params.append((w, b))
    return params


def vgg19_relu5_1(x_nchw, params, rgb_range=1.0):
    """Vgg19.forward: sub_mean -> features[0:30] (relu5_1). NCHW in, NCHW out."""
    N, _, H, W = x_nchw.shape
    x = jnp.transpose(x_nchw, (0, 2, 3, 1)).astype(jnp.float32)   # NCHW -> NHWC

    # MeanShift folded into plain JAX (fuses with the transpose + pack).
    vgg_mean = jnp.array([0.485, 0.456, 0.406], dtype=jnp.float32)
    vgg_std = jnp.array([0.229, 0.224, 0.225], dtype=jnp.float32) * rgb_range
    h = (x - rgb_range * vgg_mean) / vgg_std

    # Pack ONCE into the persistent padded layout (N, H, Wp, C); every layer
    # below consumes and produces this layout (no per-layer relayouts).
    Wp = max(_round_up(W + 1, 16), 16)
    h = jnp.pad(h.astype(jnp.bfloat16), ((0, 0), (0, 0), (0, Wp - W), (0, 0)))

    cur_w = W
    pi = 0
    for item in VGG19_SLICE1_CFG:
        if item == "M":
            h = maxpool2x2(h, W=cur_w)
            cur_w //= 2
        else:
            w, b = params[pi]
            pi += 1
            h = conv3x3_relu(h, w, b, W=cur_w)

    # Unpack once: drop alignment columns, back to NCHW f32 like PyTorch.
    h = h[:, :, :cur_w, :].astype(jnp.float32)
    return jnp.transpose(h, (0, 3, 1, 2))


if __name__ == "__main__":
    key = jax.random.PRNGKey(0)
    pkey, xkey = jax.random.split(key)

    # --- self-check: Pallas conv vs. plain-JAX conv (single & multi row tile) ---
    ck = jax.random.PRNGKey(2)
    xk, wk = jax.random.split(ck)
    Ht, Wt, Ci, Co = 16, 16, 8, 16
    Wpt = max(_round_up(Wt + 1, 16), 16)
    xi = jax.random.normal(xk, (1, Ht, Wt, Ci), dtype=jnp.float32)
    wi = jax.random.normal(wk, (3, 3, Ci, Co), dtype=jnp.float32) * 0.1
    bi = jnp.linspace(-0.5, 0.5, Co, dtype=jnp.float32)
    x4 = jnp.pad(xi.astype(jnp.bfloat16), ((0, 0), (0, 0), (0, Wpt - Wt), (0, 0)))
    ref_in = x4[:, :, :Wt, :].astype(jnp.float32)
    ref_w = wi.astype(jnp.bfloat16).astype(jnp.float32)
    ref = jax.lax.conv_general_dilated(
        ref_in, ref_w, (1, 1), "SAME",
        dimension_numbers=("NHWC", "HWIO", "NHWC"),
        precision=jax.lax.Precision.HIGHEST)
    ref = jnp.maximum(ref + bi, 0.0)
    for tgt in (Ht * Wpt, 4 * Wpt):
        got = conv3x3_relu(x4, wi, bi, W=Wt, target_rows=tgt)
        got = got[:, :, :Wt, :].astype(jnp.float32)
        assert bool(jnp.allclose(got, ref, atol=5e-2, rtol=5e-2)), \
            f"conv3x3 self-check failed (target_rows={tgt})"

    # --- full Vgg19 slice1 forward, small NCHW input like PyTorch ---
    params = init_vgg19_slice1_params(pkey)
    x = jax.random.uniform(xkey, (2, 3, 16, 16), dtype=jnp.float32)

    fwd = jax.jit(vgg19_relu5_1)
    out = jax.block_until_ready(fwd(x, params))

    assert out.shape == (2, 512, 1, 1), out.shape
    assert out.dtype == jnp.float32
    assert bool(jnp.all(jnp.isfinite(out))) and bool(jnp.all(out >= 0.0))
    print("KERNEL_OK")
</pallas_src>

<mosaic_0001>
module attributes {stable_mosaic.version = 11 : i64} {
  func.func @_conv3x3_kernel(%arg0: i32, %arg1: i32, %arg2: i32, %arg3: memref<1x512x8xbf16, #tpu.memory_space<vmem>>, %arg4: memref<1x32x8xbf16, #tpu.memory_space<vmem>>, %arg5: memref<1x32x8xbf16, #tpu.memory_space<vmem>>, %arg6: memref<9x8x16xbf16, #tpu.memory_space<vmem>>, %arg7: memref<1x16xf32, #tpu.memory_space<vmem>>, %arg8: memref<1x16x32x16xbf16, #tpu.memory_space<vmem>>, %arg9: memref<624x8xbf16, #tpu.memory_space<vmem>>) attributes {dimension_semantics = [#tpu.dimension_semantics<parallel>, #tpu.dimension_semantics<parallel>, #tpu.dimension_semantics<parallel>], iteration_bounds = array<i64: 1, 1, 1>, scalar_prefetch = 0 : i64, scratch_operands = 1 : i64, tpu.core_type = #tpu.core_type<tc>, window_params = [{transform_indices = @transform_0, window_bounds = array<i64: 1, 512, 8>}, {transform_indices = @transform_1, window_bounds = array<i64: 1, 32, 8>}, {transform_indices = @transform_2, window_bounds = array<i64: 1, 32, 8>}, {pipeline_mode = #tpu.pipeline_mode<synchronous>, transform_indices = @transform_3, window_bounds = array<i64: 9, 8, 16>}, {pipeline_mode = #tpu.pipeline_mode<synchronous>, transform_indices = @transform_4, window_bounds = array<i64: 1, 16>}, {transform_indices = @transform_5, window_bounds = array<i64: 1, 16, 32, 16>}]} {
    %cst = arith.constant 0.000000e+00 : bf16
    %0 = vector.broadcast %cst : bf16 to vector<1x8xbf16>
    %c31 = arith.constant 31 : index
    %c0 = arith.constant 0 : index
    %1 = vector.load %arg9[%c31, %c0] : memref<624x8xbf16, #tpu.memory_space<vmem>>, vector<1x8xbf16>
    tpu.vector_store %arg9[%c31, %c0], %0 {strides = array<i32>} : memref<624x8xbf16, #tpu.memory_space<vmem>>, vector<1x8xbf16>,
    %c0_0 = arith.constant 0 : index
    %c0_1 = arith.constant 0 : index
    %c0_2 = arith.constant 0 : index
    %2 = vector.load %arg4[%c0_0, %c0_1, %c0_2] : memref<1x32x8xbf16, #tpu.memory_space<vmem>>, vector<1x32x8xbf16>
    %3 = vector.shape_cast %2 : vector<1x32x8xbf16> to vector<32x8xbf16>
    %c32 = arith.constant 32 : index
    %c0_3 = arith.constant 0 : index
    %4 = vector.load %arg9[%c32, %c0_3] : memref<624x8xbf16, #tpu.memory_space<vmem>>, vector<32x8xbf16>
    tpu.vector_store %arg9[%c32, %c0_3], %3 {strides = array<i32>} : memref<624x8xbf16, #tpu.memory_space<vmem>>, vector<32x8xbf16>,
    %c0_4 = arith.constant 0 : index
    %c0_5 = arith.constant 0 : index
    %c0_6 = arith.constant 0 : index
    %5 = vector.load %arg3[%c0_4, %c0_5, %c0_6] : memref<1x512x8xbf16, #tpu.memory_space<vmem>>, vector<1x512x8xbf16>
    %6 = vector.shape_cast %5 : vector<1x512x8xbf16> to vector<512x8xbf16>
    %c64 = arith.constant 64 : index
    %c0_7 = arith.constant 0 : index
    %7 = vector.load %arg9[%c64, %c0_7] : memref<624x8xbf16, #tpu.memory_space<vmem>>, vector<512x8xbf16>
    tpu.vector_store %arg9[%c64, %c0_7], %6 {strides = array<i32>} : memref<624x8xbf16, #tpu.memory_space<vmem>>, vector<512x8xbf16>,
    %c0_8 = arith.constant 0 : index
    %c0_9 = arith.constant 0 : index
    %c0_10 = arith.constant 0 : index
    %8 = vector.load %arg5[%c0_8, %c0_9, %c0_10] : memref<1x32x8xbf16, #tpu.memory_space<vmem>>, vector<1x32x8xbf16>
    %9 = vector.shape_cast %8 : vector<1x32x8xbf16> to vector<32x8xbf16>
    %c576 = arith.constant 576 : index
    %c0_11 = arith.constant 0 : index
    %10 = vector.load %arg9[%c576, %c0_11] : memref<624x8xbf16, #tpu.memory_space<vmem>>, vector<32x8xbf16>
    tpu.vector_store %arg9[%c576, %c0_11], %9 {strides = array<i32>} : memref<624x8xbf16, #tpu.memory_space<vmem>>, vector<32x8xbf16>,
    %c0_i32 = arith.constant 0 : i32
    %11 = arith.cmpi eq, %arg2, %c0_i32 : i32
    %12 = arith.extui %11 : i1 to i32
    %c0_i32_12 = arith.constant 0 : i32
    %13 = arith.cmpi ne, %12, %c0_i32_12 : i32
    scf.if %13 {
      %cst_66 = arith.constant 0.000000e+00 : bf16
      %76 = vector.broadcast %cst_66 : bf16 to vector<32x8xbf16>
      %c32_67 = arith.constant 32 : index
      %c0_68 = arith.constant 0 : index
      %77 = vector.load %arg9[%c32_67, %c0_68] : memref<624x8xbf16, #tpu.memory_space<vmem>>, vector<32x8xbf16>
      tpu.vector_store %arg9[%c32_67, %c0_68], %76 {strides = array<i32>} : memref<624x8xbf16, #tpu.memory_space<vmem>>, vector<32x8xbf16>,
    } else {
    }
    %c0_i32_13 = arith.constant 0 : i32
    %14 = arith.cmpi eq, %arg2, %c0_i32_13 : i32
    %15 = arith.extui %14 : i1 to i32
    %c0_i32_14 = arith.constant 0 : i32
    %16 = arith.cmpi ne, %15, %c0_i32_14 : i32
    scf.if %16 {
      %cst_66 = arith.constant 0.000000e+00 : bf16
      %76 = vector.broadcast %cst_66 : bf16 to vector<32x8xbf16>
      %c576_67 = arith.constant 576 : index
      %c0_68 = arith.constant 0 : index
      %77 = vector.load %arg9[%c576_67, %c0_68] : memref<624x8xbf16, #tpu.memory_space<vmem>>, vector<32x8xbf16>
      tpu.vector_store %arg9[%c576_67, %c0_68], %76 {strides = array<i32>} : memref<624x8xbf16, #tpu.memory_space<vmem>>, vector<32x8xbf16>,
    } else {
    }
    %c0_15 = arith.constant 0 : index
    %c0_16 = arith.constant 0 : index
    %17 = vector.load %arg7[%c0_15, %c0_16] : memref<1x16xf32, #tpu.memory_space<vmem>>, vector<1x16xf32>
    %18 = vector.shape_cast %17 : vector<1x16xf32> to vector<1x16xf32>
    %19 = vector.broadcast %18 : vector<1x16xf32> to vector<512x16xf32>
    %c31_17 = arith.constant 31 : index
    %c0_18 = arith.constant 0 : index
    %20 = vector.load %arg9[%c31_17, %c0_18] : memref<624x8xbf16, #tpu.memory_space<vmem>>, vector<512x8xbf16>
    %c0_19 = arith.constant 0 : index
    %c0_20 = arith.constant 0 : index
    %c0_21 = arith.constant 0 : index
    %21 = vector.load %arg6[%c0_19, %c0_20, %c0_21] : memref<9x8x16xbf16, #tpu.memory_space<vmem>>, vector<1x8x16xbf16>
    %22 = vector.shape_cast %21 : vector<1x8x16xbf16> to vector<8x16xbf16>
    %cst_22 = arith.constant dense<0.000000e+00> : vector<512x16xf32>
    %23 = tpu.matmul %20, %22, %cst_22 {dimension_numbers = #tpu.dot_dimension_numbers<[1], [0], [0], [1], [0, 0, 1, 1], [], []>} : vector<512x8xbf16>, vector<8x16xbf16>, vector<512x16xf32> -> vector<512x16xf32>
    %24 = arith.addf %19, %23 : vector<512x16xf32>
    %c32_23 = arith.constant 32 : index
    %c0_24 = arith.constant 0 : index
    %25 = vector.load %arg9[%c32_23, %c0_24] : memref<624x8xbf16, #tpu.memory_space<vmem>>, vector<512x8xbf16>
    %c1 = arith.constant 1 : index
    %c0_25 = arith.constant 0 : index
    %c0_26 = arith.constant 0 : index
    %26 = vector.load %arg6[%c1, %c0_25, %c0_26] : memref<9x8x16xbf16, #tpu.memory_space<vmem>>, vector<1x8x16xbf16>
    %27 = vector.shape_cast %26 : vector<1x8x16xbf16> to vector<8x16xbf16>
    %cst_27 = arith.constant dense<0.000000e+00> : vector<512x16xf32>
    %28 = tpu.matmul %25, %27, %cst_27 {dimension_numbers = #tpu.dot_dimension_numbers<[1], [0], [0], [1], [0, 0, 1, 1], [], []>} : vector<512x8xbf16>, vector<8x16xbf16>, vector<512x16xf32> -> vector<512x16xf32>
    %29 = arith.addf %24, %28 : vector<512x16xf32>
    %c33 = arith.constant 33 : index
    %c0_28 = arith.constant 0 : index
    %30 = vector.load %arg9[%c33, %c0_28] : memref<624x8xbf16, #tpu.memory_space<vmem>>, vector<512x8xbf16>
    %c2 = arith.constant 2 : index
    %c0_29 = arith.constant 0 : index
    %c0_30 = arith.constant 0 : index
    %31 = vector.load %arg6[%c2, %c0_29, %c0_30] : memref<9x8x16xbf16, #tpu.memory_space<vmem>>, vector<1x8x16xbf16>
    %32 = vector.shape_cast %31 : vector<1x8x16xbf16> to vector<8x16xbf16>
    %cst_31 = arith.constant dense<0.000000e+00> : vector<512x16xf32>
    %33 = tpu.matmul %30, %32, %cst_31 {dimension_numbers = #tpu.dot_dimension_numbers<[1], [0], [0], [1], [0, 0, 1, 1], [], []>} : vector<512x8xbf16>, vector<8x16xbf16>, vector<512x16xf32> -> vector<512x16xf32>
    %34 = arith.addf %29, %33 : vector<512x16xf32>
    %c63 = arith.constant 63 : index
    %c0_32 = arith.constant 0 : index
    %35 = vector.load %arg9[%c63, %c0_32] : memref<624x8xbf16, #tpu.memory_space<vmem>>, vector<512x8xbf16>
    %c3 = arith.constant 3 : index
    %c0_33 = arith.constant 0 : index
    %c0_34 = arith.constant 0 : index
    %36 = vector.load %arg6[%c3, %c0_33, %c0_34] : memref<9x8x16xbf16, #tpu.memory_space<vmem>>, vector<1x8x16xbf16>
    %37 = vector.shape_cast %36 : vector<1x8x16xbf16> to vector<8x16xbf16>
    %cst_35 = arith.constant dense<0.000000e+00> : vector<512x16xf32>
    %38 = tpu.matmul %35, %37, %cst_35 {dimension_numbers = #tpu.dot_dimension_numbers<[1], [0], [0], [1], [0, 0, 1, 1], [], []>} : vector<512x8xbf16>, vector<8x16xbf16>, vector<512x16xf32> -> vector<512x16xf32>
    %39 = arith.addf %34, %38 : vector<512x16xf32>
    %c64_36 = arith.constant 64 : index
    %c0_37 = arith.constant 0 : index
    %40 = vector.load %arg9[%c64_36, %c0_37] : memref<624x8xbf16, #tpu.memory_space<vmem>>, vector<512x8xbf16>
    %c4 = arith.constant 4 : index
    %c0_38 = arith.constant 0 : index
    %c0_39 = arith.constant 0 : index
    %41 = vector.load %arg6[%c4, %c0_38, %c0_39] : memref<9x8x16xbf16, #tpu.memory_space<vmem>>, vector<1x8x16xbf16>
    %42 = vector.shape_cast %41 : vector<1x8x16xbf16> to vector<8x16xbf16>
    %cst_40 = arith.constant dense<0.000000e+00> : vector<512x16xf32>
    %43 = tpu.matmul %40, %42, %cst_40 {dimension_numbers = #tpu.dot_dimension_numbers<[1], [0], [0], [1], [0, 0, 1, 1], [], []>} : vector<512x8xbf16>, vector<8x16xbf16>, vector<512x16xf32> -> vector<512x16xf32>
    %44 = arith.addf %39, %43 : vector<512x16xf32>
    %c65 = arith.constant 65 : index
    %c0_41 = arith.constant 0 : index
    %45 = vector.load %arg9[%c65, %c0_41] : memref<624x8xbf16, #tpu.memory_space<vmem>>, vector<512x8xbf16>
    %c5 = arith.constant 5 : index
    %c0_42 = arith.constant 0 : index
    %c0_43 = arith.constant 0 : index
    %46 = vector.load %arg6[%c5, %c0_42, %c0_43] : memref<9x8x16xbf16, #tpu.memory_space<vmem>>, vector<1x8x16xbf16>
    %47 = vector.shape_cast %46 : vector<1x8x16xbf16> to vector<8x16xbf16>
    %cst_44 = arith.constant dense<0.000000e+00> : vector<512x16xf32>
    %48 = tpu.matmul %45, %47, %cst_44 {dimension_numbers = #tpu.dot_dimension_numbers<[1], [0], [0], [1], [0, 0, 1, 1], [], []>} : vector<512x8xbf16>, vector<8x16xbf16>, vector<512x16xf32> -> vector<512x16xf32>
    %49 = arith.addf %44, %48 : vector<512x16xf32>
    %c95 = arith.constant 95 : index
    %c0_45 = arith.constant 0 : index
    %50 = vector.load %arg9[%c95, %c0_45] : memref<624x8xbf16, #tpu.memory_space<vmem>>, vector<512x8xbf16>
    %c6 = arith.constant 6 : index
    %c0_46 = arith.constant 0 : index
    %c0_47 = arith.constant 0 : index
    %51 = vector.load %arg6[%c6, %c0_46, %c0_47] : memref<9x8x16xbf16, #tpu.memory_space<vmem>>, vector<1x8x16xbf16>
    %52 = vector.shape_cast %51 : vector<1x8x16xbf16> to vector<8x16xbf16>
    %cst_48 = arith.constant dense<0.000000e+00> : vector<512x16xf32>
    %53 = tpu.matmul %50, %52, %cst_48 {dimension_numbers = #tpu.dot_dimension_numbers<[1], [0], [0], [1], [0, 0, 1, 1], [], []>} : vector<512x8xbf16>, vector<8x16xbf16>, vector<512x16xf32> -> vector<512x16xf32>
    %54 = arith.addf %49, %53 : vector<512x16xf32>
    %c96 = arith.constant 96 : index
    %c0_49 = arith.constant 0 : index
    %55 = vector.load %arg9[%c96, %c0_49] : memref<624x8xbf16, #tpu.memory_space<vmem>>, vector<512x8xbf16>
    %c7 = arith.constant 7 : index
    %c0_50 = arith.constant 0 : index
    %c0_51 = arith.constant 0 : index
    %56 = vector.load %arg6[%c7, %c0_50, %c0_51] : memref<9x8x16xbf16, #tpu.memory_space<vmem>>, vector<1x8x16xbf16>
    %57 = vector.shape_cast %56 : vector<1x8x16xbf16> to vector<8x16xbf16>
    %cst_52 = arith.constant dense<0.000000e+00> : vector<512x16xf32>
    %58 = tpu.matmul %55, %57, %cst_52 {dimension_numbers = #tpu.dot_dimension_numbers<[1], [0], [0], [1], [0, 0, 1, 1], [], []>} : vector<512x8xbf16>, vector<8x16xbf16>, vector<512x16xf32> -> vector<512x16xf32>
    %59 = arith.addf %54, %58 : vector<512x16xf32>
    %c97 = arith.constant 97 : index
    %c0_53 = arith.constant 0 : index
    %60 = vector.load %arg9[%c97, %c0_53] : memref<624x8xbf16, #tpu.memory_space<vmem>>, vector<512x8xbf16>
    %c8 = arith.constant 8 : index
    %c0_54 = arith.constant 0 : index
    %c0_55 = arith.constant 0 : index
    %61 = vector.load %arg6[%c8, %c0_54, %c0_55] : memref<9x8x16xbf16, #tpu.memory_space<vmem>>, vector<1x8x16xbf16>
    %62 = vector.shape_cast %61 : vector<1x8x16xbf16> to vector<8x16xbf16>
    %cst_56 = arith.constant dense<0.000000e+00> : vector<512x16xf32>
    %63 = tpu.matmul %60, %62, %cst_56 {dimension_numbers = #tpu.dot_dimension_numbers<[1], [0], [0], [1], [0, 0, 1, 1], [], []>} : vector<512x8xbf16>, vector<8x16xbf16>, vector<512x16xf32> -> vector<512x16xf32>
    %64 = arith.addf %59, %63 : vector<512x16xf32>
    %cst_57 = arith.constant 0.000000e+00 : f32
    %65 = vector.broadcast %cst_57 : f32 to vector<512x16xf32>
    %66 = arith.maximumf %64, %65 : vector<512x16xf32>
    %67 = arith.truncf %66 : vector<512x16xf32> to vector<512x16xbf16>
    %68 = vector.shape_cast %67 : vector<512x16xbf16> to vector<16x32x16xbf16>
    %c0_58 = arith.constant 0 : index
    %c0_59 = arith.constant 0 : index
    %c0_60 = arith.constant 0 : index
    %c0_61 = arith.constant 0 : index
    %69 = vector.load %arg8[%c0_58, %c0_59, %c0_60, %c0_61] : memref<1x16x32x16xbf16, #tpu.memory_space<vmem>>, vector<1x16x32x16xbf16>
    %70 = vector.shape_cast %69 : vector<1x16x32x16xbf16> to vector<16x32x16xbf16>
    %71 = vector.shape_cast %68 : vector<16x32x16xbf16> to vector<1x16x32x16xbf16>
    tpu.vector_store %arg8[%c0_58, %c0_59, %c0_60, %c0_61], %71 {strides = array<i32>} : memref<1x16x32x16xbf16, #tpu.memory_space<vmem>>, vector<1x16x32x16xbf16>,
    %cst_62 = arith.constant 0.000000e+00 : bf16
    %72 = vector.broadcast %cst_62 : bf16 to vector<16x16x16xbf16>
    %c0_63 = arith.constant 0 : index
    %c0_64 = arith.constant 0 : index
    %c16 = arith.constant 16 : index
    %c0_65 = arith.constant 0 : index
    %73 = vector.load %arg8[%c0_63, %c0_64, %c16, %c0_65] : memref<1x16x32x16xbf16, #tpu.memory_space<vmem>>, vector<1x16x16x16xbf16>
    %74 = vector.shape_cast %73 : vector<1x16x16x16xbf16> to vector<16x16x16xbf16>
    %75 = vector.shape_cast %72 : vector<16x16x16xbf16> to vector<1x16x16x16xbf16>
    tpu.vector_store %arg8[%c0_63, %c0_64, %c16, %c0_65], %75 {strides = array<i32>} : memref<1x16x32x16xbf16, #tpu.memory_space<vmem>>, vector<1x16x16x16xbf16>,
    return
  }
  func.func @transform_0(%arg0: i32, %arg1: i32, %arg2: i32) -> (i32, i32, i32) {
    %c0_i32 = arith.constant 0 : i32
    %c0_i32_0 = arith.constant 0 : i32
    return %arg1, %arg2, %c0_i32 : i32, i32, i32
  }
  func.func @transform_1(%arg0: i32, %arg1: i32, %arg2: i32) -> (i32, i32, i32) {
    %c16_i32 = arith.constant 16 : i32
    %0 = arith.muli %arg2, %c16_i32 : i32
    %c1_i32 = arith.constant 1 : i32
    %1 = arith.subi %0, %c1_i32 : i32
    %c0_i32 = arith.constant 0 : i32
    %2 = arith.maxsi %1, %c0_i32 : i32
    %c0_i32_0 = arith.constant 0 : i32
    %c0_i32_1 = arith.constant 0 : i32
    return %arg1, %2, %c0_i32_0 : i32, i32, i32
  }
  func.func @transform_2(%arg0: i32, %arg1: i32, %arg2: i32) -> (i32, i32, i32) {
    %c16_i32 = arith.constant 16 : i32
    %0 = arith.muli %arg2, %c16_i32 : i32
    %c16_i32_0 = arith.constant 16 : i32
    %1 = arith.addi %0, %c16_i32_0 : i32
    %c15_i32 = arith.constant 15 : i32
    %2 = arith.minsi %1, %c15_i32 : i32
    %c0_i32 = arith.constant 0 : i32
    %c0_i32_1 = arith.constant 0 : i32
    return %arg1, %2, %c0_i32 : i32, i32, i32
  }
  func.func @transform_3(%arg0: i32, %arg1: i32, %arg2: i32) -> (i32, i32, i32) {
    %c0_i32 = arith.constant 0 : i32
    %c0_i32_0 = arith.constant 0 : i32
    %c0_i32_1 = arith.constant 0 : i32
    return %c0_i32, %c0_i32_0, %arg0 : i32, i32, i32
  }
  func.func @transform_4(%arg0: i32, %arg1: i32, %arg2: i32) -> (i32, i32) {
    %c0_i32 = arith.constant 0 : i32
    %c0_i32_0 = arith.constant 0 : i32
    return %c0_i32, %arg0 : i32, i32
  }
  func.func @transform_5(%arg0: i32, %arg1: i32, %arg2: i32) -> (i32, i32, i32, i32) {
    %c0_i32 = arith.constant 0 : i32
    %c0_i32_0 = arith.constant 0 : i32
    return %arg1, %arg2, %c0_i32, %arg0 : i32, i32, i32, i32
  }
}

</mosaic_0001>

<bundles_post_ra>
// kernel: tpu_custom_call.1
= control target key start
LH: loop header
LB: loop body
LE: loop exit
PB: predicated region body
PF: predicated region fallthrough
CT: control target
= control target key end

     0   :  { %vm885_vm0 = vcmask 1043456   ;;  %vm105_vm1 = vcmask 60416   ;;  %vm95_vm2 = vcmask 60419   ;;  %vm96_vm3 = vsmask.f32 7950  ;;  %s10630_s3 = inlined_call_operand.vmem [shape: bf16[9,8,16], index: 3, kind: input, shape index: {}]   ;;  %s10631_s0 = inlined_call_operand.vmem [shape: bf16[1,512,8], index: 0, kind: input, shape index: {}]   ;;  %s10632_s1 = inlined_call_operand.vmem [shape: bf16[1,512,8], index: 1, kind: input, shape index: {}]   ;;  %s10633_s4 = inlined_call_operand.vmem [shape: f32[1,16], index: 4, kind: input, shape index: {}]   ;;  %s10634_s5 = inlined_call_operand.vmem [shape: bf16[1,16,32,16], index: 5, kind: output, shape index: {}]   ;;  %s10635_s2 = inlined_call_operand.vmem [shape: bf16[1,512,8], index: 2, kind: input, shape index: {}]  }
   0x1   :  { %v327_v0 = vld [vmem:[%s10630_s3] sm:$0xf]  ;;  %v121_v1 = vld [vmem:[%s10631_s0 + $0x2c] sm:$0xf]  ;;  %v122_v2 = vld [vmem:[%s10631_s0 + $0x30] sm:$0xf] }
   0x2   :  { %v887_v3 = vsel %vm885_vm0, %v327_v0, 0  ;;  %v123_v4 = vld [vmem:[%s10631_s0 + $0x34] sm:$0xf]  ;;  %v124_v5 = vld [vmem:[%s10631_s0 + $0x38] sm:$0xf]  ;;  %vm8654_vm4 = vmand %vm95_vm2, %vm96_vm3  ;;  %vm788_vm6 = vcmask 64512  }
   0x3   :  { %8381 = vmatpush.bf16.msra.mxu1 %v887_v3  ;;  %8382 = vmatpush.bf16.msra.mxu2 %v887_v3  ;;  %185 = vst.msk [vmem:[#allocation2 + $0x4c] sm:$0xf] %vm105_vm1, %v121_v1  ;;  %v137_v6 = vld [vmem:[%s10631_s0 + $0x6c] sm:$0xf]  ;;  %v138_v7 = vld [vmem:[%s10631_s0 + $0x70] sm:$0xf] }
   0x4   :  { %8383 = vmatpush.bf16.msra.mxu3 %v887_v3  ;;  %896 = vmatpush.bf16.msra.mxu0 %v887_v3  ;;  %186 = vst.msk [vmem:[#allocation2 + $0x50] sm:$0xf] %vm105_vm1, %v122_v2  ;;  %v139_v8 = vld [vmem:[%s10631_s0 + $0x74] sm:$0xf]  ;;  %v140_v9 = vld [vmem:[%s10631_s0 + $0x78] sm:$0xf] }
   0x5   :  { %187 = vst.msk [vmem:[#allocation2 + $0x54] sm:$0xf] %vm105_vm1, %v123_v4  ;;  %v6713_v10 = vld [vmem:[%s10630_s3 + $0x8] sm:$0xf]  ;;  %v153_v11 = vld [vmem:[%s10631_s0 + $0xac] sm:$0xf] }
   0x6   :  { %188 = vst.msk [vmem:[#allocation2 + $0x58] sm:$0xf] %vm105_vm1, %v124_v5  ;;  %v2076_v12 = vsel %vm885_vm0, %v6713_v10, 0  ;;  %v154_v13 = vld [vmem:[%s10631_s0 + $0xb0] sm:$0xf]  ;;  %v10636_v50 = vmov 0  }
   0x7   :  { %201 = vst.msk [vmem:[#allocation2 + $0x8c] sm:$0xf] %vm105_vm1, %v137_v6  ;;  %2085 = vmatpush.bf16.msrb.mxu2 %v2076_v12  ;;  %v98_v15 = vld [vmem:[#allocation2 + $0xc] sm:$0x8]  ;;  %v155_v16 = vld [vmem:[%s10631_s0 + $0xb4] sm:$0xf] }
   0x8   :  { %202 = vst.msk [vmem:[#allocation2 + $0x90] sm:$0xf] %vm105_vm1, %v138_v7  ;;  %v156_v17 = vld [vmem:[%s10631_s0 + $0xb8] sm:$0xf]  ;;  %v6874_v19 = vld [vmem:[%s10630_s3 + $0xc] sm:$0xf] }
   0x9   :  { %203 = vst.msk [vmem:[#allocation2 + $0x94] sm:$0xf] %vm105_vm1, %v139_v8  ;;  %v99_v20 = vsel %vm8654_vm4, 0, %v98_v15  ;;  %v101_v21 = vld [vmem:[%s10632_s1] sm:$0xf]  ;;  %v2934_v22 = vsel %vm885_vm0, %v6874_v19, 0 }
   0xa   :  { %204 = vst.msk [vmem:[#allocation2 + $0x98] sm:$0xf] %vm105_vm1, %v140_v9  ;;  %v6680_v23 = vld [vmem:[%s10630_s3 + $0x4] sm:$0xf]  ;;  %2943 = vmatpush.bf16.msrb.mxu3 %v2934_v22  ;;  %v6907_v29 = vld [vmem:[%s10630_s3 + $0x10] sm:$0xf] }
   0xb   :  { %v8401_v18 = vld [vmem:[#allocation2 + $0x4c] sm:$0xff]   ;;  %217 = vst.msk [vmem:[#allocation2 + $0xcc] sm:$0xf] %vm105_vm1, %v153_v11  ;;  %v1253_v27 = vsel %vm885_vm0, %v6680_v23, 0  ;;  %v102_v28 = vld [vmem:[%s10632_s1 + $0x4] sm:$0xf] }
   0xc   :  { %218 = vst.msk [vmem:[#allocation2 + $0xd0] sm:$0xf] %vm105_vm1, %v154_v13  ;;  %v564_v25 = vshrl.u32 %v8401_v18, 16  ;;  %v567_v26 = vshll.u32 %v8401_v18, 16  ;;  %1262 = vmatpush.bf16.msrb.mxu1 %v1253_v27  ;;  %v103_v35 = vld [vmem:[%s10632_s1 + $0x8] sm:$0xf] }
   0xd   :  { %v8403_v24 = vld [vmem:[#allocation2 + $0x54] sm:$0xff]   ;;  %219 = vst.msk [vmem:[#allocation2 + $0xd4] sm:$0xf] %vm105_vm1, %v155_v16  ;;  %v3300_v36 = vsel %vm885_vm0, %v6907_v29, 0  ;;  %vm491_vm5 = vsmask.f32 4352 }
   0xe   :  { %220 = vst.msk [vmem:[#allocation2 + $0xd8] sm:$0xf] %vm105_vm1, %v156_v17  ;;  %v566_v30 = vrot.slane %v564_v25, 3  ;;  %v569_v31 = vrot.slane %v567_v26, 4  ;;  %v573_v32 = vshrl.u32 %v8403_v24, 16  ;;  %v576_v33 = vshll.u32 %v8403_v24, 16  ;;  %3309 = vmatpush.bf16.msrb.mxu0 %v3300_v36 }
   0xf   :  { %v8417_v34 = vld [vmem:[#allocation2 + $0x8c] sm:$0xff]   ;;  %100 = vst [vmem:[#allocation2 + $0xc] sm:$0x8] %v99_v20  ;;  %v125_v48 = vld [vmem:[%s10631_s0 + $0x3c] sm:$0xf]  ;;  %vm6531_vm8 = vcmask 125952  }
  0x10   :  { %v8692_v37 = vor.u32 %v569_v31, %v566_v30  ;;  %v575_v38 = vrot.slane %v573_v32, 3  ;;  %v578_v39 = vrot.slane %v576_v33, 4  ;;  %v636_v41 = vshrl.u32 %v8417_v34, 16  ;;  %106 = vst.msk [vmem:[#allocation2 + $0x10] sm:$0xf] %vm105_vm1, %v101_v21 }
  0x11   :  { %v8419_v40 = vld [vmem:[#allocation2 + $0x94] sm:$0xff]   ;;  %v639_v42 = vshll.u32 %v8417_v34, 16  ;;  %107 = vst.msk [vmem:[#allocation2 + $0x14] sm:$0xf] %vm105_vm1, %v102_v28  ;;  %v126_v51 = vld [vmem:[%s10631_s0 + $0x40] sm:$0xf] }
  0x12   :  { %v8696_v43 = vor.u32 %v578_v39, %v575_v38  ;;  %v638_v44 = vrot.slane %v636_v41, 3  ;;  %v645_v45 = vshrl.u32 %v8419_v40, 16  ;;  %v648_v46 = vshll.u32 %v8419_v40, 16  ;;  %108 = vst.msk [vmem:[#allocation2 + $0x18] sm:$0xf] %vm105_vm1, %v103_v35 }
  0x13   :  { %v8433_v47 = vld [vmem:[#allocation2 + $0xcc] sm:$0xff]   ;;  %v641_v49 = vrot.slane %v639_v42, 4  ;;  %250 = vst.msk [vmem:[#allocation2 + $0x10] sm:$0xf] %vm105_vm1, %v10636_v50  ;;  %v141_v59 = vld [vmem:[%s10631_s0 + $0x7c] sm:$0xf] }
  0x14   :  { %v580_v52 = vsel %vm491_vm5, %v8692_v37, %v8696_v43  ;;  %v647_v53 = vrot.slane %v645_v45, 3  ;;  %v650_v54 = vrot.slane %v648_v46, 4  ;;  %v708_v56 = vshrl.u32 %v8433_v47, 16  ;;  %251 = vst.msk [vmem:[#allocation2 + $0x14] sm:$0xf] %vm105_vm1, %v10636_v50 }
  0x15   :  { %v8435_v55 = vld [vmem:[#allocation2 + $0xd4] sm:$0xff]   ;;  %6656 = vmatmul.msk.bf16.vlgmr.msra.gmra.mxu1 %vm788_vm6, %v580_v52  ;;  %v8713_v57 = vor.u32 %v641_v49, %v638_v44  ;;  %v711_v58 = vshll.u32 %v8433_v47, 16  ;;  %252 = vst.msk [vmem:[#allocation2 + $0x18] sm:$0xf] %vm105_vm1, %v10636_v50  ;;  %v142_v0 = vld [vmem:[%s10631_s0 + $0x80] sm:$0xf] }
  0x16   :  { %v8720_v60 = vor.u32 %v650_v54, %v647_v53  ;;  %v710_v61 = vrot.slane %v708_v56, 3  ;;  %v717_v62 = vshrl.u32 %v8435_v55, 16  ;;  %v720_v63 = vshll.u32 %v8435_v55, 16  ;;  %189 = vst.msk [vmem:[#allocation2 + $0x5c] sm:$0xf] %vm105_vm1, %v125_v48 }
  0x17   :  { %v713_v1 = vrot.slane %v711_v58, 4  ;;  %v157_v2 = vld [vmem:[%s10631_s0 + $0xbc] sm:$0xf]  ;;  %v7906_v6 = vld [vmem:[#allocation2 + $0xc] sm:$0x8] }
  0x18   :  { %v652_v3 = vsel %vm491_vm5, %v8713_v57, %v8720_v60  ;;  %v719_v4 = vrot.slane %v717_v62, 3  ;;  %v722_v5 = vrot.slane %v720_v63, 4  ;;  %190 = vst.msk [vmem:[#allocation2 + $0x60] sm:$0xf] %vm105_vm1, %v126_v51  ;;  %v158_v8 = vld [vmem:[%s10631_s0 + $0xc0] sm:$0xf] }
  0x19   :  { %6664 = vmatmul.msk.bf16.vlgmr.msra.gmra.mxu2 %vm788_vm6, %v652_v3  ;;  %v8734_v7 = vor.u32 %v713_v1, %v710_v61  ;;  %205 = vst.msk [vmem:[#allocation2 + $0x9c] sm:$0xf] %vm105_vm1, %v141_v59  ;;  %v104_v11 = vld [vmem:[%s10632_s1 + $0xc] sm:$0xf]  ;;  %v110_v13 = vld [vmem:[%s10631_s0] sm:$0xf] }
  0x1a   :  { %v8740_v9 = vor.u32 %v722_v5, %v719_v4  ;;  %v8385_v10 = vld [vmem:[#allocation2 + $0xc] sm:$0xf0]   ;;  %206 = vst.msk [vmem:[#allocation2 + $0xa0] sm:$0xf] %vm105_vm1, %v142_v0  ;;  %v127_v16 = vld [vmem:[%s10631_s0 + $0x44] sm:$0xf] }
  0x1b   :  { %v7907_v12 = vor.u32 %v8385_v10, %v7906_v6  ;;  %221 = vst.msk [vmem:[#allocation2 + $0xdc] sm:$0xf] %vm105_vm1, %v157_v2  ;;  %v128_v19 = vld [vmem:[%s10631_s0 + $0x48] sm:$0xf]  ;;  %v143_v22 = vld [vmem:[%s10631_s0 + $0x84] sm:$0xf] }
  0x1c   :  { %v724_v14 = vsel %vm491_vm5, %v8734_v7, %v8740_v9  ;;  %v8387_v15 = vld [vmem:[#allocation2 + $0x14] sm:$0xff]   ;;  %222 = vst.msk [vmem:[#allocation2 + $0xe0] sm:$0xf] %vm105_vm1, %v158_v8  ;;  %v144_v26 = vld [vmem:[%s10631_s0 + $0x88] sm:$0xf] }
  0x1d   :  { %6672 = vmatmul.msk.bf16.vlgmr.msra.gmra.mxu3 %vm788_vm6, %v724_v14  ;;  %v493_v17 = vshrl.u32 %v7907_v12, 16  ;;  %v496_v18 = vshll.u32 %v7907_v12, 16  ;;  %109 = vst.msk [vmem:[#allocation2 + $0x1c] sm:$0xf] %vm105_vm1, %v104_v11  ;;  %v501_v20 = vshrl.u32 %v8387_v15, 16  ;;  %v504_v21 = vshll.u32 %v8387_v15, 16 }
  0x1e   :  { %174 = vst.msk [vmem:[#allocation2 + $0x20] sm:$0xf] %vm105_vm1, %v110_v13  ;;  %v159_v29 = vld [vmem:[%s10631_s0 + $0xc4] sm:$0xf]  ;;  %v160_v35 = vld [vmem:[%s10631_s0 + $0xc8] sm:$0xf] }
  0x1f   :  { %v495_v23 = vrot.slane %v493_v17, 3  ;;  %v498_v24 = vrot.slane %v496_v18, 4  ;;  %v8405_v25 = vld [vmem:[#allocation2 + $0x5c] sm:$0xff]   ;;  %253 = vst.msk [vmem:[#allocation2 + $0x1c] sm:$0xf] %vm105_vm1, %v10636_v50  ;;  %v503_v27 = vrot.slane %v501_v20, 3 }
  0x20   :  { %v506_v28 = vrot.slane %v504_v21, 4  ;;  %191 = vst.msk [vmem:[#allocation2 + $0x64] sm:$0xf] %vm105_vm1, %v127_v16  ;;  %v582_v31 = vshrl.u32 %v8405_v25, 16  ;;  %v585_v32 = vshll.u32 %v8405_v25, 16 }
  0x21   :  { %v499_v30 = vor.u32 %v498_v24, %v495_v23  ;;  %v8421_v33 = vld [vmem:[#allocation2 + $0x9c] sm:$0xff]   ;;  %192 = vst.msk [vmem:[#allocation2 + $0x68] sm:$0xf] %vm105_vm1, %v128_v19  ;;  %v111_v36 = vld [vmem:[%s10631_s0 + $0x4] sm:$0xf] }
  0x22   :  { %v8776_v34 = vor.u32 %v506_v28, %v503_v27  ;;  %207 = vst.msk [vmem:[#allocation2 + $0xa4] sm:$0xf] %vm105_vm1, %v143_v22  ;;  %v584_v38 = vrot.slane %v582_v31, 3  ;;  %v587_v39 = vrot.slane %v585_v32, 4  ;;  %v654_v40 = vshrl.u32 %v8421_v33, 16 }
  0x23   :  { %v657_v41 = vshll.u32 %v8421_v33, 16  ;;  %v8437_v42 = vld [vmem:[#allocation2 + $0xdc] sm:$0xff]   ;;  %208 = vst.msk [vmem:[#allocation2 + $0xa8] sm:$0xf] %vm105_vm1, %v144_v26  ;;  %v112_v45 = vld [vmem:[%s10631_s0 + $0x8] sm:$0xf] }
  0x24   :  { %v508_v44 = vsel %vm491_vm5, %v499_v30, %v8776_v34  ;;  %v129_v46 = vld [vmem:[%s10631_s0 + $0x4c] sm:$0xf]  ;;  %v8795_v47 = vor.u32 %v587_v39, %v584_v38  ;;  %v656_v48 = vrot.slane %v654_v40, 3  ;;  %v726_v51 = vshrl.u32 %v8437_v42, 16  ;;  %223 = vst.msk [vmem:[#allocation2 + $0xe4] sm:$0xf] %vm105_vm1, %v159_v29 }
  0x25   :  { %6648 = vmatmul.msk.bf16.vlgmr.msra.gmra.mxu0 %vm788_vm6, %v508_v44  ;;  %v659_v49 = vrot.slane %v657_v41, 4  ;;  %v130_v52 = vld [vmem:[%s10631_s0 + $0x50] sm:$0xf]  ;;  %v729_v53 = vshll.u32 %v8437_v42, 16  ;;  %224 = vst.msk [vmem:[#allocation2 + $0xe8] sm:$0xf] %vm105_vm1, %v160_v35 }
  0x26   :  { %v8389_v54 = vld [vmem:[#allocation2 + $0x1c] sm:$0xff]   ;;  %v145_v55 = vld [vmem:[%s10631_s0 + $0x8c] sm:$0xf]  ;;  %v589_v56 = vsel %vm491_vm5, %v8696_v43, %v8795_v47  ;;  %v728_v59 = vrot.slane %v726_v51, 3  ;;  %175 = vst.msk [vmem:[#allocation2 + $0x24] sm:$0xf] %vm105_vm1, %v111_v36 }
  0x27   :  { %v8808_v58 = vor.u32 %v659_v49, %v656_v48  ;;  %v146_v61 = vld [vmem:[%s10631_s0 + $0x90] sm:$0xf]  ;;  %6657 = vmatmul.msk.bf16.gmra.mxu1 %vm788_vm6, %v589_v56  ;;  %v731_v62 = vrot.slane %v729_v53, 4  ;;  %v510_v63 = vshrl.u32 %v8389_v54, 16  ;;  %v513_v0 = vshll.u32 %v8389_v54, 16 }
  0x28   :  { %v8407_v1 = vld [vmem:[#allocation2 + $0x64] sm:$0xff]   ;;  %176 = vst.msk [vmem:[#allocation2 + $0x28] sm:$0xf] %vm105_vm1, %v112_v45  ;;  %v161_v2 = vld [vmem:[%s10631_s0 + $0xcc] sm:$0xf] }
  0x29   :  { %v661_v43 = vsel %vm491_vm5, %v8720_v60, %v8808_v58  ;;  %193 = vst.msk [vmem:[#allocation2 + $0x6c] sm:$0xf] %vm105_vm1, %v129_v46  ;;  %v162_v3 = vld [vmem:[%s10631_s0 + $0xd0] sm:$0xf]  ;;  %v732_v4 = vor.u32 %v731_v62, %v728_v59  ;;  %v512_v5 = vrot.slane %v510_v63, 3  ;;  %v515_v6 = vrot.slane %v513_v0, 4 }
  0x2a   :  { %6665 = vmatmul.msk.bf16.gmra.mxu2 %vm788_vm6, %v661_v43  ;;  %v591_v8 = vshrl.u32 %v8407_v1, 16  ;;  %194 = vst.msk [vmem:[#allocation2 + $0x70] sm:$0xf] %vm105_vm1, %v130_v52  ;;  %v113_v60 = vld [vmem:[%s10631_s0 + $0xc] sm:$0xf]  ;;  %v594_v10 = vshll.u32 %v8407_v1, 16 }
  0x2b   :  { %v8423_v11 = vld [vmem:[#allocation2 + $0xa4] sm:$0xff]   ;;  %209 = vst.msk [vmem:[#allocation2 + $0xac] sm:$0xf] %vm105_vm1, %v145_v55  ;;  %v733_v12 = vsel %vm491_vm5, %v8740_v9, %v732_v4  ;;  %v114_v14 = vld [vmem:[%s10631_s0 + $0x10] sm:$0xf]  ;;  %v516_v19 = vor.u32 %v515_v6, %v512_v5 }
  0x2c   :  { %v593_v13 = vrot.slane %v591_v8, 3  ;;  %210 = vst.msk [vmem:[#allocation2 + $0xb0] sm:$0xf] %vm105_vm1, %v146_v61  ;;  %v596_v15 = vrot.slane %v594_v10, 4  ;;  %v663_v16 = vshrl.u32 %v8423_v11, 16  ;;  %v666_v17 = vshll.u32 %v8423_v11, 16 }
  0x2d   :  { %6673 = vmatmul.msk.bf16.gmra.mxu3 %vm788_vm6, %v733_v12  ;;  %v8439_v18 = vld [vmem:[#allocation2 + $0xe4] sm:$0xff]   ;;  %225 = vst.msk [vmem:[#allocation2 + $0xec] sm:$0xf] %vm105_vm1, %v161_v2  ;;  %v517_v25 = vsel %vm491_vm5, %v8776_v34, %v516_v19  ;;  %v131_v28 = vld [vmem:[%s10631_s0 + $0x54] sm:$0xf] }
  0x2e   :  { %226 = vst.msk [vmem:[#allocation2 + $0xf0] sm:$0xf] %vm105_vm1, %v162_v3  ;;  %v665_v20 = vrot.slane %v663_v16, 3  ;;  %v668_v9 = vrot.slane %v666_v17, 4  ;;  %v735_v21 = vshrl.u32 %v8439_v18, 16  ;;  %v738_v22 = vshll.u32 %v8439_v18, 16 }
  0x2f   :  { %177 = vst.msk [vmem:[#allocation2 + $0x2c] sm:$0xf] %vm105_vm1, %v113_v60  ;;  %v8391_v23 = vld [vmem:[#allocation2 + $0x24] sm:$0xff]   ;;  %v597_v24 = vor.u32 %v596_v15, %v593_v13  ;;  %v132_v29 = vld [vmem:[%s10631_s0 + $0x58] sm:$0xf] }
  0x30   :  { %178 = vst.msk [vmem:[#allocation2 + $0x30] sm:$0xf] %vm105_vm1, %v114_v14  ;;  %v737_v26 = vrot.slane %v735_v21, 3  ;;  %v740_v27 = vrot.slane %v738_v22, 4  ;;  %v669_v30 = vor.u32 %v668_v9, %v665_v20  ;;  %v519_v31 = vshrl.u32 %v8391_v23, 16 }
  0x31   :  { %195 = vst.msk [vmem:[#allocation2 + $0x74] sm:$0xf] %vm105_vm1, %v131_v28  ;;  %v147_v32 = vld [vmem:[%s10631_s0 + $0x94] sm:$0xf]  ;;  %v598_v33 = vsel %vm491_vm5, %v8795_v47, %v597_v24  ;;  %v522_v34 = vshll.u32 %v8391_v23, 16  ;;  %v8409_v35 = vld [vmem:[#allocation2 + $0x6c] sm:$0xff]  }
  0x32   :  { %196 = vst.msk [vmem:[#allocation2 + $0x78] sm:$0xf] %vm105_vm1, %v132_v29  ;;  %v8859_v36 = vor.u32 %v740_v27, %v737_v26  ;;  %v148_v38 = vld [vmem:[%s10631_s0 + $0x98] sm:$0xf]  ;;  %v163_v39 = vld [vmem:[%s10631_s0 + $0xd4] sm:$0xf]  ;;  %v670_v40 = vsel %vm491_vm5, %v8808_v58, %v669_v30 }
  0x33   :  { %211 = vst.msk [vmem:[#allocation2 + $0xb4] sm:$0xf] %vm105_vm1, %v147_v32  ;;  %v8425_v41 = vld [vmem:[#allocation2 + $0xac] sm:$0xff]   ;;  %v521_v42 = vrot.slane %v519_v31, 3  ;;  %v164_v44 = vld [vmem:[%s10631_s0 + $0xd8] sm:$0xf] }
  0x34   :  { %212 = vst.msk [vmem:[#allocation2 + $0xb8] sm:$0xf] %vm105_vm1, %v148_v38  ;;  %v600_v45 = vshrl.u32 %v8409_v35, 16  ;;  %v603_v46 = vshll.u32 %v8409_v35, 16  ;;  %v115_v47 = vld [vmem:[%s10631_s0 + $0x14] sm:$0xf]  ;;  %v742_v48 = vsel %vm491_vm5, %v732_v4, %v8859_v36 }
  0x35   :  { %6649 = vmatmul.msk.bf16.gmra.mxu0 %vm788_vm6, %v517_v25  ;;  %227 = vst.msk [vmem:[#allocation2 + $0xf4] sm:$0xf] %vm105_vm1, %v163_v39  ;;  %v524_v49 = vrot.slane %v522_v34, 4  ;;  %v8441_v51 = vld [vmem:[#allocation2 + $0xec] sm:$0xff]   ;;  %v116_v52 = vld [vmem:[%s10631_s0 + $0x18] sm:$0xf] }
  0x36   :  { %228 = vst.msk [vmem:[#allocation2 + $0xf8] sm:$0xf] %vm105_vm1, %v164_v44  ;;  %v672_v53 = vshrl.u32 %v8425_v41, 16  ;;  %v675_v54 = vshll.u32 %v8425_v41, 16  ;;  %v602_v55 = vrot.slane %v600_v45, 3  ;;  %v605_v56 = vrot.slane %v603_v46, 4 }
  0x37   :  { %6658 = vmatmul.msk.bf16.gmra.mxu1 %vm788_vm6, %v598_v33  ;;  %179 = vst.msk [vmem:[#allocation2 + $0x34] sm:$0xf] %vm105_vm1, %v115_v47  ;;  %v525_v58 = vor.u32 %v524_v49, %v521_v42  ;;  %v744_v59 = vshrl.u32 %v8441_v51, 16  ;;  %v747_v61 = vshll.u32 %v8441_v51, 16  ;;  %v8393_v3 = vld [vmem:[#allocation2 + $0x2c] sm:$0xff]  }
  0x38   :  { %180 = vst.msk [vmem:[#allocation2 + $0x38] sm:$0xf] %vm105_vm1, %v116_v52  ;;  %v674_v62 = vrot.slane %v672_v53, 3  ;;  %v677_v63 = vrot.slane %v675_v54, 4  ;;  %v606_v0 = vor.u32 %v605_v56, %v602_v55  ;;  %v133_v5 = vld [vmem:[%s10631_s0 + $0x5c] sm:$0xf] }
  0x39   :  { %v526_v1 = vsel %vm491_vm5, %v516_v19, %v525_v58  ;;  %v746_v43 = vrot.slane %v744_v59, 3  ;;  %v749_v2 = vrot.slane %v747_v61, 4  ;;  %v134_v6 = vld [vmem:[%s10631_s0 + $0x60] sm:$0xf]  ;;  %v149_v8 = vld [vmem:[%s10631_s0 + $0x9c] sm:$0xf] }
  0x3a   :  { %6666 = vmatmul.msk.bf16.gmra.mxu2 %vm788_vm6, %v670_v40  ;;  %v8890_v4 = vor.u32 %v677_v63, %v674_v62  ;;  %197 = vst.msk [vmem:[#allocation2 + $0x7c] sm:$0xf] %vm105_vm1, %v133_v5  ;;  %v607_v60 = vsel %vm491_vm5, %v597_v24, %v606_v0  ;;  %v8411_v10 = vld [vmem:[#allocation2 + $0x74] sm:$0xff]   ;;  %v150_v11 = vld [vmem:[%s10631_s0 + $0xa0] sm:$0xf]  ;;  %v528_v13 = vshrl.u32 %v8393_v3, 16 }
  0x3b   :  { %198 = vst.msk [vmem:[#allocation2 + $0x80] sm:$0xf] %vm105_vm1, %v134_v6  ;;  %v8908_v12 = vor.u32 %v749_v2, %v746_v43  ;;  %v531_v14 = vshll.u32 %v8393_v3, 16  ;;  %v165_v15 = vld [vmem:[%s10631_s0 + $0xdc] sm:$0xf]  ;;  %v8427_v17 = vld [vmem:[#allocation2 + $0xb4] sm:$0xff]  }
  0x3c   :  { %213 = vst.msk [vmem:[#allocation2 + $0xbc] sm:$0xf] %vm105_vm1, %v149_v8  ;;  %v679_v16 = vsel %vm491_vm5, %v669_v30, %v8890_v4  ;;  %v166_v18 = vld [vmem:[%s10631_s0 + $0xe0] sm:$0xf]  ;;  %v117_v19 = vld [vmem:[%s10631_s0 + $0x1c] sm:$0xf] }
  0x3d   :  { %6674 = vmatmul.msk.bf16.gmra.mxu3 %vm788_vm6, %v742_v48  ;;  %214 = vst.msk [vmem:[#allocation2 + $0xc0] sm:$0xf] %vm105_vm1, %v150_v11  ;;  %v118_v20 = vld [vmem:[%s10631_s0 + $0x20] sm:$0xf]  ;;  %v609_v9 = vshrl.u32 %v8411_v10, 16  ;;  %v612_v21 = vshll.u32 %v8411_v10, 16  ;;  %v751_v22 = vsel %vm491_vm5, %v8859_v36, %v8908_v12 }
  0x3e   :  { %229 = vst.msk [vmem:[#allocation2 + $0xfc] sm:$0xf] %vm105_vm1, %v165_v15  ;;  %v530_v23 = vrot.slane %v528_v13, 3  ;;  %v533_v24 = vrot.slane %v531_v14, 4  ;;  %v8443_v25 = vld [vmem:[#allocation2 + $0xf4] sm:$0xff]   ;;  %v681_v26 = vshrl.u32 %v8427_v17, 16 }
  0x3f   :  { %230 = vst.msk [vmem:[#allocation2 + $0x100] sm:$0xf] %vm105_vm1, %v166_v18  ;;  %v684_v27 = vshll.u32 %v8427_v17, 16  ;;  %v611_v28 = vrot.slane %v609_v9, 3  ;;  %v614_v29 = vrot.slane %v612_v21, 4  ;;  %v753_v31 = vshrl.u32 %v8443_v25, 16 }
  0x40   :  { %181 = vst.msk [vmem:[#allocation2 + $0x3c] sm:$0xf] %vm105_vm1, %v117_v19  ;;  %v534_v30 = vor.u32 %v533_v24, %v530_v23  ;;  %v756_v32 = vshll.u32 %v8443_v25, 16  ;;  %v683_v33 = vrot.slane %v681_v26, 3  ;;  %v8395_v40 = vld [vmem:[#allocation2 + $0x34] sm:$0xff]  }
  0x41   :  { %182 = vst.msk [vmem:[#allocation2 + $0x40] sm:$0xf] %vm105_vm1, %v118_v20  ;;  %v686_v34 = vrot.slane %v684_v27, 4  ;;  %v615_v35 = vor.u32 %v614_v29, %v611_v28  ;;  %v755_v38 = vrot.slane %v753_v31, 3  ;;  %v135_v41 = vld [vmem:[%s10631_s0 + $0x64] sm:$0xf] }
  0x42   :  { %v535_v36 = vsel %vm491_vm5, %v525_v58, %v534_v30  ;;  %v758_v39 = vrot.slane %v756_v32, 4  ;;  %v136_v44 = vld [vmem:[%s10631_s0 + $0x68] sm:$0xf]  ;;  %199 = vst.msk [vmem:[#allocation2 + $0x84] sm:$0xf] %vm105_vm1, %v135_v41  ;;  %v8413_v47 = vld [vmem:[#allocation2 + $0x7c] sm:$0xff]  }
  0x43   :  { %v687_v42 = vor.u32 %v686_v34, %v683_v33  ;;  %200 = vst.msk [vmem:[#allocation2 + $0x88] sm:$0xf] %vm105_vm1, %v136_v44  ;;  %v151_v45 = vld [vmem:[%s10631_s0 + $0xa4] sm:$0xf]  ;;  %v616_v46 = vsel %vm491_vm5, %v606_v0, %v615_v35  ;;  %v152_v48 = vld [vmem:[%s10631_s0 + $0xa8] sm:$0xf] }
  0x44   :  { %215 = vst.msk [vmem:[#allocation2 + $0xc4] sm:$0xf] %vm105_vm1, %v151_v45  ;;  %v759_v49 = vor.u32 %v758_v39, %v755_v38  ;;  %v537_v51 = vshrl.u32 %v8395_v40, 16  ;;  %v540_v52 = vshll.u32 %v8395_v40, 16  ;;  %v167_v53 = vld [vmem:[%s10631_s0 + $0xe4] sm:$0xf] }
  0x45   :  { %6650 = vmatmul.msk.bf16.gmra.mxu0 %vm788_vm6, %v526_v1  ;;  %216 = vst.msk [vmem:[#allocation2 + $0xc8] sm:$0xf] %vm105_vm1, %v152_v48  ;;  %v688_v54 = vsel %vm491_vm5, %v8890_v4, %v687_v42  ;;  %v8429_v55 = vld [vmem:[#allocation2 + $0xbc] sm:$0xff]   ;;  %v168_v56 = vld [vmem:[%s10631_s0 + $0xe8] sm:$0xf]  ;;  %v618_v61 = vshrl.u32 %v8413_v47, 16 }
  0x46   :  { %231 = vst.msk [vmem:[#allocation2 + $0x104] sm:$0xf] %vm105_vm1, %v167_v53  ;;  %v119_v58 = vld [vmem:[%s10631_s0 + $0x24] sm:$0xf]  ;;  %v120_v59 = vld [vmem:[%s10631_s0 + $0x28] sm:$0xf]  ;;  %v760_v63 = vsel %vm491_vm5, %v8908_v12, %v759_v49 }
  0x47   :  { %6659 = vmatmul.msk.bf16.gmra.mxu1 %vm788_vm6, %v607_v60  ;;  %232 = vst.msk [vmem:[#allocation2 + $0x108] sm:$0xf] %vm105_vm1, %v168_v56  ;;  %v621_v62 = vshll.u32 %v8413_v47, 16  ;;  %v539_v0 = vrot.slane %v537_v51, 3  ;;  %v542_v1 = vrot.slane %v540_v52, 4  ;;  %v8445_v43 = vld [vmem:[#allocation2 + $0xfc] sm:$0xff]  }
  0x48   :  { %183 = vst.msk [vmem:[#allocation2 + $0x44] sm:$0xf] %vm105_vm1, %v119_v58  ;;  %v690_v2 = vshrl.u32 %v8429_v55, 16  ;;  %v693_v3 = vshll.u32 %v8429_v55, 16  ;;  %v620_v4 = vrot.slane %v618_v61, 3  ;;  %v762_v8 = vshrl.u32 %v8445_v43, 16 }
  0x49   :  { %184 = vst.msk [vmem:[#allocation2 + $0x48] sm:$0xf] %vm105_vm1, %v120_v59  ;;  %v623_v5 = vrot.slane %v621_v62, 4  ;;  %v543_v6 = vor.u32 %v542_v1, %v539_v0  ;;  %v765_v60 = vshll.u32 %v8445_v43, 16  ;;  %v169_v12 = vld [vmem:[%s10631_s0 + $0xec] sm:$0xf] }
  0x4a   :  { %6667 = vmatmul.msk.bf16.gmra.mxu2 %vm788_vm6, %v679_v16  ;;  %v692_v10 = vrot.slane %v690_v2, 3  ;;  %v695_v11 = vrot.slane %v693_v3, 4  ;;  %233 = vst.msk [vmem:[#allocation2 + $0x10c] sm:$0xf] %vm105_vm1, %v169_v12  ;;  %v764_v15 = vrot.slane %v762_v8, 3  ;;  %v8397_v17 = vld [vmem:[#allocation2 + $0x3c] sm:$0xff]  }
  0x4b   :  { %v624_v13 = vor.u32 %v623_v5, %v620_v4  ;;  %v544_v14 = vsel %vm491_vm5, %v534_v30, %v543_v6  ;;  %v767_v16 = vrot.slane %v765_v60, 4  ;;  %v8415_v20 = vld [vmem:[#allocation2 + $0x84] sm:$0xff]   ;;  %v546_v21 = vshrl.u32 %v8397_v17, 16  ;;  %v7101_v3 = vld [vmem:[%s10630_s3 + $0x18] sm:$0xf] }
  0x4c   :  { %v696_v18 = vor.u32 %v695_v11, %v692_v10  ;;  %v8431_v24 = vld [vmem:[#allocation2 + $0xc4] sm:$0xff]   ;;  %v627_v25 = vshrl.u32 %v8415_v20, 16  ;;  %v630_v26 = vshll.u32 %v8415_v20, 16  ;;  %v4980_v4 = vsel %vm885_vm0, %v7101_v3, 0  ;;  %v6940_v8 = vld [vmem:[%s10630_s3 + $0x14] sm:$0xf] }
  0x4d   :  { %6675 = vmatmul.msk.bf16.gmra.mxu3 %vm788_vm6, %v751_v22  ;;  %v625_v19 = vsel %vm491_vm5, %v615_v35, %v624_v13  ;;  %v768_v9 = vor.u32 %v767_v16, %v764_v15  ;;  %v549_v22 = vshll.u32 %v8397_v17, 16  ;;  %v548_v28 = vrot.slane %v546_v21, 3  ;;  %4989 = vmatpush.bf16.msra.mxu2 %v4980_v4  ;;  %v8450_v16 = vld [vmem:[#allocation2 + $0x24] sm:$0xff]   ;;  %v7167_v20 = vld [vmem:[%s10630_s3 + $0x20] sm:$0xf] }
  0x4e   :  { %v697_v23 = vsel %vm491_vm5, %v687_v42, %v696_v18  ;;  %v8446_v30 = vld [vmem:[#allocation2 + $0x104] sm:$0xff]   ;;  %v699_v31 = vshrl.u32 %v8431_v24, 16  ;;  %v702_v32 = vshll.u32 %v8431_v24, 16  ;;  %v629_v33 = vrot.slane %v627_v25, 3 }
  0x4f   :  { %v769_v27 = vsel %vm491_vm5, %v759_v49, %v768_v9  ;;  %v551_v29 = vrot.slane %v549_v22, 4  ;;  %v632_v34 = vrot.slane %v630_v26, 4  ;;  %v774_v38 = vshll.u32 %v8446_v30, 16  ;;  %v7331_v3 = vld [vmem:[#allocation2 + $0x28] sm:$0xff] }
  0x50   :  { %v701_v39 = vrot.slane %v699_v31, 3  ;;  %v704_v40 = vrot.slane %v702_v32, 4  ;;  %v4122_v11 = vsel %vm885_vm0, %v6940_v8, 0  ;;  %v2550_v22 = vshrl.u32 %v8450_v16, 16 }
  0x51   :  { %v552_v35 = vor.u32 %v551_v29, %v548_v28  ;;  %v633_v41 = vor.u32 %v632_v34, %v629_v33  ;;  %v776_v45 = vrot.slane %v774_v38, 4  ;;  %v7839_v48 = vld [vmem:[#allocation2 + $0x108] sm:$0xff]   ;;  %4131 = vmatpush.bf16.msra.mxu1 %v4122_v11  ;;  %vm1718_vm7 = vsmask.f32 7424 }
  0x52   :  { %v705_v47 = vor.u32 %v704_v40, %v701_v39  ;;  %v2552_v31 = vrot.slane %v2550_v22, 3  ;;  %v8452_v40 = vld [vmem:[#allocation2 + $0x2c] sm:$0xff]   ;;  %v8456_v22 = vld [vmem:[#allocation2 + $0x3c] sm:$0xff]  }
  0x53   :  { %v553_v42 = vsel %vm491_vm5, %v543_v6, %v552_v35  ;;  %v634_v49 = vsel %vm491_vm5, %v624_v13, %v633_v41  ;;  %v643_v5 = vsel %vm491_vm5, %v633_v41, %v8713_v57  ;;  %v7134_v6 = vld [vmem:[%s10630_s3 + $0x1c] sm:$0xf]  ;;  %v7328_v13 = vld [vmem:[#allocation2 + $0x10] sm:$0xff]  ;;  %v8448_v57 = vld [vmem:[#allocation2 + $0x1c] sm:$0xf0]  }
  0x54   :  { %v706_v55 = vsel %vm491_vm5, %v696_v18, %v705_v47  ;;  %v5346_v10 = vsel %vm885_vm0, %v7134_v6, 0  ;;  %v715_v12 = vsel %vm491_vm5, %v705_v47, %v8734_v7  ;;  %v7329_v18 = vld [vmem:[#allocation2 + $0x18] sm:$0xff]  ;;  %v6168_v7 = vsel %vm885_vm0, %v7167_v20, 0 }
  0x55   :  { %6651 = vmatmul.msk.bf16.gmra.mxu0 %vm788_vm6, %v535_v36  ;;  %v771_v36 = vshrl.u32 %v8446_v30, 16  ;;  %5355 = vmatpush.bf16.msra.mxu3 %v5346_v10  ;;  %v1720_v24 = vshrl.u32 %v7328_v13, 16  ;;  %v1727_v26 = vshll.u32 %v7329_v18, 16  ;;  %v1731_v47 = vshrl.u32 %v7329_v18, 16 }
  0x56   :  { %6177 = vmatpush.bf16.msra.mxu0 %v6168_v7  ;;  %v1743_v10 = vshll.u32 %v7331_v3, 16 }
  0x57   :  { %6660 = vmatmul.msk.bf16.gmra.mxu1 %vm788_vm6, %v616_v46  ;;  %v773_v44 = vrot.slane %v771_v36, 3  ;;  %v8399_v46 = vld [vmem:[#allocation2 + $0x44] sm:$0xff]   ;;  %v1729_v34 = vrot.slane %v1727_v26, 1  ;;  %v2577_v26 = vshrl.u32 %v8456_v22, 16 }
  0x58   :  { %v555_v52 = vshrl.u32 %v8399_v46, 16  ;;  %v558_v53 = vshll.u32 %v8399_v46, 16  ;;  %v2562_v46 = vshll.u32 %v8452_v40, 16 }
  0x59   :  { %v777_v51 = vor.u32 %v776_v45, %v773_v44  ;;  %v2559_v45 = vshrl.u32 %v8452_v40, 16 }
  0x5a   :  { %6668 = vmatmul.msk.bf16.gmra.mxu2 %vm788_vm6, %v688_v54  ;;  %v7551_v54 = vunpack.c.h.b16 %v7839_v48  ;;  %v557_v58 = vrot.slane %v555_v52, 3  ;;  %v560_v59 = vrot.slane %v558_v53, 4  ;;  %v7840_v52 = vld [vmem:[#allocation2 + $0x20] sm:$0xff]  }
  0x5b   :  { %v778_v56 = vsel %vm491_vm5, %v768_v9, %v777_v51  ;;  %v2561_v53 = vrot.slane %v2559_v45, 3 }
  0x5c   :  { %v490_v61 = vpack.c.b16 %v7551_v54, %v7551_v54  ;;  %v561_v62 = vor.u32 %v560_v59, %v557_v58  ;;  %v2564_v54 = vrot.slane %v2562_v46, 4 }
  0x5d   :  { %6676 = vmatmul.msk.bf16.gmra.mxu3 %vm788_vm6, %v760_v63 }
  0x5e   :  { %v780_v63 = vshrl.u32 %v490_v61, 16  ;;  %v783_v0 = vshll.u32 %v490_v61, 16  ;;  %v562_v1 = vsel %vm491_vm5, %v552_v35, %v561_v62  ;;  %v7808_v35 = vld [vmem:[#allocation2 + $0x10] sm:$0xff]   ;;  %v7809_v61 = vld [vmem:[#allocation2 + $0x18] sm:$0xff]  }
  0x60   :  { %v782_v43 = vrot.slane %v780_v63, 3  ;;  %v785_v2 = vrot.slane %v783_v0, 4 }
  0x62   :  { %v786_v60 = vor.u32 %v785_v2, %v782_v43  ;;  %v8454_v2 = vld [vmem:[#allocation2 + $0x34] sm:$0xff]  }
  0x63   :  { %v2568_v6 = vshrl.u32 %v8454_v2, 16  ;;  %v2571_v8 = vshll.u32 %v8454_v2, 16  ;;  %v7843_v2 = vld [vmem:[#allocation2 + $0x38] sm:$0xff]  }
  0x64   :  { %v787_v15 = vsel %vm491_vm5, %v777_v51, %v786_v60 }
  0x65   :  { %6652 = vmatmul.msk.bf16.gmra.mxu0 %vm788_vm6, %v544_v14  ;;  %v8065_v14 = vld [vmem:[#allocation2 + $0x1c] sm:$0x8] }
  0x66   :  { %v8066_v17 = vor.u32 %v8448_v57, %v8065_v14  ;;  %v2570_v14 = vrot.slane %v2568_v6, 3  ;;  %v2573_v57 = vrot.slane %v2571_v8, 4 }
  0x67   :  { %6661 = vmatmul.msk.bf16.gmra.mxu1 %vm788_vm6, %v625_v19  ;;  %v1722_v19 = vshll.u32 %v7328_v13, 16  ;;  %v7841_v13 = vld [vmem:[#allocation2 + $0x28] sm:$0xff]  }
  0x68   :  { %v2542_v9 = vshrl.u32 %v8066_v17, 16  ;;  %v2545_v21 = vshll.u32 %v8066_v17, 16 }
  0x69   :  { %v1724_v25 = vrot.slane %v1722_v19, 1  ;;  %v2574_v19 = vor.u32 %v2573_v57, %v2570_v14 }
  0x6a   :  { %6669 = vmatmul.msk.bf16.gmra.mxu2 %vm788_vm6, %v697_v23  ;;  %v2553_v23 = vshll.u32 %v8450_v16, 16  ;;  %v2544_v29 = vrot.slane %v2542_v9, 3  ;;  %v2547_v30 = vrot.slane %v2545_v21, 4  ;;  %v1745_v16 = vrot.slane %v1743_v10, 1 }
  0x6b   :  { %v1725_v33 = vor.u32 %v1724_v25, %v1720_v24 }
  0x6c   :  { %v2555_v32 = vrot.slane %v2553_v23, 4  ;;  %v2548_v36 = vor.u32 %v2547_v30, %v2544_v29  ;;  %v7332_v23 = vld [vmem:[#allocation2 + $0x30] sm:$0xff]  ;;  %v1747_v29 = vshrl.u32 %v7331_v3, 16 }
  0x6d   :  { %6677 = vmatmul.msk.bf16.gmra.mxu3 %vm788_vm6, %v769_v27  ;;  %v571_v27 = vsel %vm491_vm5, %v561_v62, %v8692_v37  ;;  %v1730_v39 = vsel %vm1718_vm7, %v1725_v33, %v1729_v34  ;;  %v2565_v62 = vor.u32 %v2564_v54, %v2561_v53  ;;  %v1751_v30 = vshll.u32 %v7332_v23, 16  ;;  %v7842_v33 = vld [vmem:[#allocation2 + $0x30] sm:$0xff]  }
  0x6e   :  { %v2556_v38 = vor.u32 %v2555_v32, %v2552_v31 }
  0x6f   :  { %v2575_v21 = vsel %vm491_vm5, %v2565_v62, %v2574_v19 }
  0x70   :  { %v2557_v37 = vsel %vm491_vm5, %v2548_v36, %v2556_v38  ;;  %v2566_v43 = vsel %vm491_vm5, %v2556_v38, %v2565_v62  ;;  %v1749_v36 = vor.u32 %v1747_v29, %v1745_v16  ;;  %v1753_v38 = vrot.slane %v1751_v30, 1 }
  0x75   :  { %6653 = vmatmul.msk.bf16.gmra.mxu0 %vm788_vm6, %v553_v42  ;;  %v7330_v42 = vld [vmem:[#allocation2 + $0x20] sm:$0xff] }
  0x76   :  { %v1735_v48 = vshll.u32 %v7330_v42, 16  ;;  %v1739_v60 = vshrl.u32 %v7330_v42, 16  ;;  %v1754_v42 = vsel %vm1718_vm7, %v1749_v36, %v1753_v38 }
  0x77   :  { %6662 = vmatmul.msk.bf16.gmra.mxu1 %vm788_vm6, %v634_v49 }
  0x7a   :  { %6670 = vmatmul.msk.bf16.gmra.mxu2 %vm788_vm6, %v706_v55  ;;  %v1733_v55 = vor.u32 %v1731_v47, %v1729_v34  ;;  %v2579_v34 = vrot.slane %v2577_v26, 3 }
  0x7d   :  { %6678 = vmatmul.msk.bf16.gmra.mxu3 %vm788_vm6, %v778_v56  ;;  %v1737_v56 = vrot.slane %v1735_v48, 1  ;;  %v8458_v48 = vld [vmem:[#allocation2 + $0x44] sm:$0xff]  }
  0x7f   :  { %v1738_v63 = vsel %vm1718_vm7, %v1733_v55, %v1737_v56  ;;  %v2586_v55 = vshrl.u32 %v8458_v48, 16 }
  0x81   :  { %v2588_v3 = vrot.slane %v2586_v55, 3 }
  0x85   :  { %6654 = vmatmul.msk.bf16.gmra.mxu0 %vm788_vm6, %v562_v1 }
  0x87   :  { %6663 = vmatmul.msk.bf16.gmra.mxu1 %vm788_vm6, %v643_v5 }
  0x8a   :  { %6671 = vmatmul.msk.bf16.gmra.mxu2 %vm788_vm6, %v715_v12 }
  0x8d   :  { %6679 = vmatmul.msk.bf16.gmra.mxu3 %vm788_vm6, %v787_v15  ;;  %v1741_v15 = vor.u32 %v1739_v60, %v1737_v56  ;;  %v2589_v56 = vshll.u32 %v8458_v48, 16 }
  0x8f   :  { %v1746_v20 = vsel %vm1718_vm7, %v1741_v15, %v1745_v16  ;;  %v2591_v6 = vrot.slane %v2589_v56, 4 }
  0x91   :  { %v2592_v14 = vor.u32 %v2591_v6, %v2588_v3  ;;  %v8462_v3 = vld [vmem:[#allocation2 + $0x54] sm:$0xff]   ;;  %v7335_v6 = vld [vmem:[#allocation2 + $0x48] sm:$0xff] }
  0x92   :  { %v9026_v28 = vpop.f32.mrf.mxu1 }
  0x95   :  { %6655 = vmatmul.msk.bf16.gmra.mxu0 %vm788_vm6, %v571_v27  ;;  %v2580_v27 = vshll.u32 %v8456_v22, 16 }
  0x97   :  { %6681 = vmatmul.msk.bf16.vlgmr.msrb.gmra.mxu1 %vm788_vm6, %v7808_v35  ;;  %v2582_v35 = vrot.slane %v2580_v27, 4 }
  0x99   :  { %v2583_v40 = vor.u32 %v2582_v35, %v2579_v34  ;;  %v7844_v35 = vld [vmem:[#allocation2 + $0x40] sm:$0xff]  }
  0x9a   :  { %6842 = vmatmul.msk.bf16.vlgmr.msrb.gmra.mxu2 %vm788_vm6, %v1730_v39  ;;  %v9033_v41 = vpop.f32.mrf.mxu1 }
  0x9b   :  { %v2584_v47 = vsel %vm491_vm5, %v2574_v19, %v2583_v40  ;;  %v2593_v19 = vsel %vm491_vm5, %v2583_v40, %v2592_v14 }
  0x9c   :  { %v9035_v44 = vpop.f32.mrf.mxu2 }
  0x9d   :  { %6875 = vmatmul.msk.bf16.vlgmr.msrb.gmra.mxu3 %vm788_vm6, %v2557_v37 }
  0xa0   :  { %v9038_v49 = vpop.f32.mrf.mxu3 }
  0xa1   :  { %10640 = vst [vmem:[#allocation3_spill] sm:$0xff] %v9038_v49 }
  0xa2   :  { %v9040_v51 = vpop.f32.mrf.mxu0 }
  0xa4   :  { %v9042_v58 = vpop.f32.mrf.mxu2  ;;  %v9045_v59 = vpop.f32.mrf.mxu1 }
  0xa5   :  { %6908 = vmatmul.msk.bf16.vlgmr.msrb.gmra.mxu0 %vm788_vm6, %v7840_v52 }
  0xa7   :  { %6682 = vmatmul.msk.bf16.gmra.mxu1 %vm788_vm6, %v7809_v61  ;;  %v1755_v61 = vshrl.u32 %v7332_v23, 16 }
  0xa8   :  { %v9048_v0 = vpop.f32.mrf.mxu3 }
  0xa9   :  { %10641 = vst [vmem:[#allocation4_spill] sm:$0xff] %v9048_v0  ;;  %v1757_v8 = vor.u32 %v1755_v61, %v1753_v38 }
  0xaa   :  { %v9051_v1 = vpop.f32.mrf.mxu0  ;;  %6843 = vmatmul.msk.bf16.gmra.mxu2 %vm788_vm6, %v1738_v63 }
  0xac   :  { %v9058_v5 = vpop.f32.mrf.mxu1 }
  0xad   :  { %6876 = vmatmul.msk.bf16.gmra.mxu3 %vm788_vm6, %v2566_v43  ;;  %v9056_v4 = vpop.f32.mrf.mxu2 }
  0xb0   :  { %v9060_v11 = vpop.f32.mrf.mxu3 }
  0xb1   :  { %10642 = vst [vmem:[#allocation5_spill] sm:$0xff] %v9060_v11 }
  0xb2   :  { %v9062_v12 = vpop.f32.mrf.mxu0 }
  0xb4   :  { %v9067_v18 = vpop.f32.mrf.mxu1 }
  0xb5   :  { %6909 = vmatmul.msk.bf16.gmra.mxu0 %vm788_vm6, %v7841_v13  ;;  %v9065_v17 = vpop.f32.mrf.mxu2 }
  0xb7   :  { %6683 = vmatmul.msk.bf16.gmra.mxu1 %vm788_vm6, %v7840_v52  ;;  %v7333_v52 = vld [vmem:[#allocation2 + $0x38] sm:$0xff] }
  0xb8   :  { %v9070_v7 = vpop.f32.mrf.mxu3  ;;  %v1759_v62 = vshll.u32 %v7333_v52, 16  ;;  %v1763_v29 = vshrl.u32 %v7333_v52, 16 }
  0xb9   :  { %10643 = vst [vmem:[#allocation6_spill] sm:$0xff] %v9070_v7 }
  0xba   :  { %v9073_v9 = vpop.f32.mrf.mxu0  ;;  %6844 = vmatmul.msk.bf16.gmra.mxu2 %vm788_vm6, %v1746_v20  ;;  %v1761_v60 = vrot.slane %v1759_v62, 1  ;;  %v8460_v20 = vld [vmem:[#allocation2 + $0x4c] sm:$0xff]  }
  0xbb   :  { %v2595_v26 = vshrl.u32 %v8460_v20, 16  ;;  %v2598_v27 = vshll.u32 %v8460_v20, 16 }
  0xbc   :  { %v9080_v25 = vpop.f32.mrf.mxu1  ;;  %v1762_v57 = vsel %vm1718_vm7, %v1757_v8, %v1761_v60  ;;  %v1765_v40 = vor.u32 %v1763_v29, %v1761_v60  ;;  %v7845_v29 = vld [vmem:[#allocation2 + $0x48] sm:$0xff]  }
  0xbd   :  { %6877 = vmatmul.msk.bf16.gmra.mxu3 %vm788_vm6, %v2575_v21  ;;  %v9078_v24 = vpop.f32.mrf.mxu2  ;;  %v7334_v21 = vld [vmem:[#allocation2 + $0x40] sm:$0xff]  ;;  %v2597_v36 = vrot.slane %v2595_v26, 3  ;;  %v2600_v38 = vrot.slane %v2598_v27, 4  ;;  %v1775_v26 = vshll.u32 %v7335_v6, 16 }
  0xbe   :  { %v1767_v30 = vshll.u32 %v7334_v21, 16  ;;  %v1771_v20 = vshrl.u32 %v7334_v21, 16 }
  0xbf   :  { %v2601_v55 = vor.u32 %v2600_v38, %v2597_v36  ;;  %v1777_v38 = vrot.slane %v1775_v26, 1 }
  0xc0   :  { %v9082_v31 = vpop.f32.mrf.mxu3 }
  0xc1   :  { %10644 = vst [vmem:[#allocation7_spill] sm:$0xff] %v9082_v31  ;;  %v2602_v62 = vsel %vm491_vm5, %v2592_v14, %v2601_v55 }
  0xc2   :  { %v9084_v32 = vpop.f32.mrf.mxu0 }
  0xc4   :  { %v9089_v37 = vpop.f32.mrf.mxu1 }
  0xc5   :  { %6910 = vmatmul.msk.bf16.gmra.mxu0 %vm788_vm6, %v7842_v33  ;;  %v9087_v39 = vpop.f32.mrf.mxu2 }
  0xc7   :  { %6684 = vmatmul.msk.bf16.gmra.mxu1 %vm788_vm6, %v7841_v13 }
  0xc8   :  { %v9092_v45 = vpop.f32.mrf.mxu3 }
  0xc9   :  { %10645 = vst [vmem:[#allocation8_spill] sm:$0xff] %v9092_v45 }
  0xca   :  { %v9095_v46 = vpop.f32.mrf.mxu0  ;;  %6845 = vmatmul.msk.bf16.gmra.mxu2 %vm788_vm6, %v1754_v42  ;;  %v1769_v42 = vrot.slane %v1767_v30, 1 }
  0xcc   :  { %v9102_v54 = vpop.f32.mrf.mxu1  ;;  %v1770_v56 = vsel %vm1718_vm7, %v1765_v40, %v1769_v42  ;;  %v1773_v14 = vor.u32 %v1771_v20, %v1769_v42 }
  0xcd   :  { %6878 = vmatmul.msk.bf16.gmra.mxu3 %vm788_vm6, %v2584_v47  ;;  %v9100_v53 = vpop.f32.mrf.mxu2 }
  0xce   :  { %10646 = vst [vmem:[#allocation9_spill] sm:$0xff] %v9100_v53 }
  0xd0   :  { %v9104_v63 = vpop.f32.mrf.mxu3 }
  0xd1   :  { %10647 = vst [vmem:[#allocation10_spill] sm:$0xff] %v9104_v63 }
  0xd2   :  { %v9106_v43 = vpop.f32.mrf.mxu0 }
  0xd4   :  { %v9111_v13 = vpop.f32.mrf.mxu1 }
  0xd5   :  { %6911 = vmatmul.msk.bf16.gmra.mxu0 %vm788_vm6, %v7843_v2  ;;  %v9109_v10 = vpop.f32.mrf.mxu2 }
  0xd6   :  { %10648 = vst [vmem:[#allocation11_spill] sm:$0xff] %v9109_v10 }
  0xd7   :  { %6685 = vmatmul.msk.bf16.gmra.mxu1 %vm788_vm6, %v7842_v33 }
  0xd8   :  { %v9114_v15 = vpop.f32.mrf.mxu3 }
  0xd9   :  { %10649 = vst [vmem:[#allocation12_spill] sm:$0xff] %v9114_v15 }
  0xda   :  { %v9117_v16 = vpop.f32.mrf.mxu0  ;;  %6846 = vmatmul.msk.bf16.gmra.mxu2 %vm788_vm6, %v1762_v57  ;;  %v2604_v57 = vshrl.u32 %v8462_v3, 16 }
  0xdc   :  { %v9124_v23 = vpop.f32.mrf.mxu1  ;;  %v2606_v30 = vrot.slane %v2604_v57, 3  ;;  %v8464_v57 = vld [vmem:[#allocation2 + $0x5c] sm:$0xff]  }
  0xdd   :  { %6879 = vmatmul.msk.bf16.gmra.mxu3 %vm788_vm6, %v2593_v19  ;;  %v9122_v22 = vpop.f32.mrf.mxu2  ;;  %v2607_v19 = vshll.u32 %v8462_v3, 16  ;;  %v1778_v3 = vsel %vm1718_vm7, %v1773_v14, %v1777_v38  ;;  %v1779_v14 = vshrl.u32 %v7335_v6, 16 }
  0xde   :  { %10650 = vst [vmem:[#allocation13_spill] sm:$0xff] %v9122_v22 }
  0xdf   :  { %v2609_v36 = vrot.slane %v2607_v19, 4  ;;  %v7336_v19 = vld [vmem:[#allocation2 + $0x50] sm:$0xff] }
  0xe0   :  { %v9126_v34 = vpop.f32.mrf.mxu3 }
  0xe1   :  { %10651 = vst [vmem:[#allocation14_spill] sm:$0xff] %v9126_v34 }
  0xe2   :  { %v9128_v33 = vpop.f32.mrf.mxu0 }
  0xe4   :  { %v9133_v48 = vpop.f32.mrf.mxu1 }
  0xe5   :  { %6912 = vmatmul.msk.bf16.gmra.mxu0 %vm788_vm6, %v7844_v35  ;;  %v9131_v47 = vpop.f32.mrf.mxu2 }
  0xe6   :  { %10652 = vst [vmem:[#allocation15_spill] sm:$0xff] %v9131_v47 }
  0xe7   :  { %6686 = vmatmul.msk.bf16.gmra.mxu1 %vm788_vm6, %v7843_v2 }
  0xe8   :  { %v9136_v52 = vpop.f32.mrf.mxu3 }
  0xe9   :  { %10653 = vst [vmem:[#allocation16_spill] sm:$0xff] %v9136_v52  ;;  %v7846_v52 = vld [vmem:[#allocation2 + $0x50] sm:$0xff]  }
  0xea   :  { %v9139_v61 = vpop.f32.mrf.mxu0  ;;  %6847 = vmatmul.msk.bf16.gmra.mxu2 %vm788_vm6, %v1770_v56 }
  0xec   :  { %v9146_v60 = vpop.f32.mrf.mxu1 }
  0xed   :  { %6880 = vmatmul.msk.bf16.gmra.mxu3 %vm788_vm6, %v2602_v62  ;;  %v9144_v8 = vpop.f32.mrf.mxu2  ;;  %v2610_v62 = vor.u32 %v2609_v36, %v2606_v30  ;;  %v2613_v30 = vshrl.u32 %v8464_v57, 16  ;;  %v2616_v36 = vshll.u32 %v8464_v57, 16 }
  0xee   :  { %10654 = vst [vmem:[#allocation17_spill] sm:$0xff] %v9144_v8  ;;  %v7848_v8 = vld [vmem:[#allocation2 + $0x60] sm:$0xff]  }
  0xef   :  { %v2611_v42 = vsel %vm491_vm5, %v2601_v55, %v2610_v62  ;;  %v2618_v34 = vrot.slane %v2616_v36, 4  ;;  %v1781_v55 = vor.u32 %v1779_v14, %v1777_v38 }
  0xf0   :  { %v9148_v27 = vpop.f32.mrf.mxu3 }
  0xf1   :  { %10655 = vst [vmem:[#allocation18_spill] sm:$0xff] %v9148_v27 }
  0xf2   :  { %v9150_v2 = vpop.f32.mrf.mxu0 }
  0xf4   :  { %v9155_v56 = vpop.f32.mrf.mxu1 }
  0xf5   :  { %6913 = vmatmul.msk.bf16.gmra.mxu0 %vm788_vm6, %v7845_v29  ;;  %v9153_v40 = vpop.f32.mrf.mxu2 }
  0xf6   :  { %10656 = vst [vmem:[#allocation19_spill] sm:$0xff] %v9153_v40 }
  0xf7   :  { %6687 = vmatmul.msk.bf16.gmra.mxu1 %vm788_vm6, %v7844_v35 }
  0xf8   :  { %v9158_v21 = vpop.f32.mrf.mxu3 }
  0xf9   :  { %10657 = vst [vmem:[#allocation20_spill] sm:$0xff] %v9158_v21  ;;  %v1783_v21 = vshll.u32 %v7336_v19, 16 }
  0xfa   :  { %v9161_v50 = vpop.f32.mrf.mxu0  ;;  %6848 = vmatmul.msk.bf16.gmra.mxu2 %vm788_vm6, %v1778_v3  ;;  %v2615_v3 = vrot.slane %v2613_v30, 3  ;;  %v7337_v30 = vld [vmem:[#allocation2 + $0x58] sm:$0xff] }
  0xfb   :  { %v1785_v15 = vrot.slane %v1783_v21, 1  ;;  %v8466_v21 = vld [vmem:[#allocation2 + $0x64] sm:$0xff]  }
  0xfc   :  { %v9168_v26 = vpop.f32.mrf.mxu1  ;;  %v2619_v45 = vor.u32 %v2618_v34, %v2615_v3  ;;  %v2622_v34 = vshrl.u32 %v8466_v21, 16  ;;  %v2625_v3 = vshll.u32 %v8466_v21, 16 }
  0xfd   :  { %6881 = vmatmul.msk.bf16.gmra.mxu3 %vm788_vm6, %v2611_v42  ;;  %v9166_v20 = vpop.f32.mrf.mxu2  ;;  %v1786_v57 = vsel %vm1718_vm7, %v1781_v55, %v1785_v15  ;;  %v1787_v55 = vshrl.u32 %v7336_v19, 16 }
  0xfe   :  { %10658 = vst [vmem:[#allocation21_spill] sm:$0xff] %v9166_v20  ;;  %v2620_v38 = vsel %vm491_vm5, %v2610_v62, %v2619_v45  ;;  %v2624_v7 = vrot.slane %v2622_v34, 3 }
  0xff   :  { %v1789_v11 = vor.u32 %v1787_v55, %v1785_v15 }
 0x100   :  { %v9170_v27 = vpop.f32.mrf.mxu3 }
 0x101   :  { %10659 = vst [vmem:[#allocation22_spill] sm:$0xff] %v9170_v27 }
 0x102   :  { %v9172_v35 = vpop.f32.mrf.mxu0 }
 0x104   :  { %v9177_v63 = vpop.f32.mrf.mxu1 }
 0x105   :  { %6914 = vmatmul.msk.bf16.gmra.mxu0 %vm788_vm6, %v7846_v52  ;;  %v9175_v42 = vpop.f32.mrf.mxu2 }
 0x106   :  { %10660 = vst [vmem:[#allocation23_spill] sm:$0xff] %v9175_v42 }
 0x107   :  { %6688 = vmatmul.msk.bf16.gmra.mxu1 %vm788_vm6, %v7845_v29  ;;  %v9197_v29 = vld [vmem:[%s10633_s4] ss:$0 sm:$0xff] }
 0x108   :  { %v9180_v6 = vpop.f32.mrf.mxu3  ;;  %v1058_v49 = vadd.f32 %v9197_v29, %v9040_v51  ;;  %v8468_v51 = vld [vmem:[#allocation2 + $0x6c] sm:$0xff]  }
 0x109   :  { %10661 = vst [vmem:[#allocation24_spill] sm:$0xff] %v9180_v6  ;;  %v1791_v6 = vshll.u32 %v7337_v30, 16 }
 0x10a   :  { %v9183_v27 = vpop.f32.mrf.mxu0  ;;  %6849 = vmatmul.msk.bf16.gmra.mxu2 %vm788_vm6, %v1786_v57  ;;  %v7847_v57 = vld [vmem:[#allocation2 + $0x58] sm:$0xff]  }
 0x10b   :  { %v1793_v0 = vrot.slane %v1791_v6, 1  ;;  %v7338_v6 = vld [vmem:[#allocation2 + $0x60] sm:$0xff] }
 0x10c   :  { %v9190_v14 = vpop.f32.mrf.mxu1 }
 0x10d   :  { %6882 = vmatmul.msk.bf16.gmra.mxu3 %vm788_vm6, %v2620_v38  ;;  %v9188_v36 = vpop.f32.mrf.mxu2  ;;  %v2627_v38 = vrot.slane %v2625_v3, 4  ;;  %v1794_v42 = vsel %vm1718_vm7, %v1789_v11, %v1793_v0  ;;  %v1059_v3 = vadd.f32 %v9197_v29, %v9051_v1  ;;  %v1060_v1 = vadd.f32 %v9197_v29, %v9062_v12  ;;  %v7339_v12 = vld [vmem:[#allocation2 + $0x68] sm:$0xff] }
 0x10e   :  { %10662 = vst [vmem:[#allocation25_spill] sm:$0xff] %v9188_v36 }
 0x10f   :  { %v2628_v36 = vor.u32 %v2627_v38, %v2624_v7  ;;  %v2631_v38 = vshrl.u32 %v8468_v51, 16 }
 0x110   :  { %v9192_v31 = vpop.f32.mrf.mxu3 }
 0x111   :  { %10663 = vst [vmem:[#allocation26_spill] sm:$0xff] %v9192_v31  ;;  %v2629_v15 = vsel %vm491_vm5, %v2619_v45, %v2628_v36  ;;  %v2633_v45 = vrot.slane %v2631_v38, 3 }
 0x112   :  { %v9199_v62 = vpop.f32.mrf.mxu0 }
 0x114   :  { %v1264_v21 = vpop.f32.mrf.mxu1 }
 0x115   :  { %6915 = vmatmul.msk.bf16.gmra.mxu0 %vm788_vm6, %v7847_v57  ;;  %v9204_v19 = vpop.f32.mrf.mxu2  ;;  %v1424_v31 = vadd.f32 %v1264_v21, %v1058_v49  ;;  %v2634_v21 = vshll.u32 %v8468_v51, 16 }
 0x116   :  { %10664 = vst [vmem:[#allocation27_spill] sm:$0xff] %v9204_v19 }
 0x117   :  { %6689 = vmatmul.msk.bf16.gmra.mxu1 %vm788_vm6, %v7846_v52  ;;  %v1795_v52 = vshrl.u32 %v7337_v30, 16  ;;  %v2636_v47 = vrot.slane %v2634_v21, 4 }
 0x118   :  { %v9207_v20 = vpop.f32.mrf.mxu3 }
 0x119   :  { %10665 = vst [vmem:[#allocation28_spill] sm:$0xff] %v9207_v20  ;;  %v1799_v20 = vshll.u32 %v7338_v6, 16  ;;  %v1797_v22 = vor.u32 %v1795_v52, %v1793_v0 }
 0x11a   :  { %v9210_v34 = vpop.f32.mrf.mxu0  ;;  %6850 = vmatmul.msk.bf16.gmra.mxu2 %vm788_vm6, %v1794_v42 }
 0x11b   :  { %v1801_v10 = vrot.slane %v1799_v20, 1  ;;  %v8470_v20 = vld [vmem:[#allocation2 + $0x74] sm:$0xff]  }
 0x11c   :  { %v1266_v7 = vpop.f32.mrf.mxu1  ;;  %v2643_v52 = vshll.u32 %v8470_v20, 16 }
 0x11d   :  { %6883 = vmatmul.msk.bf16.gmra.mxu3 %vm788_vm6, %v2629_v15  ;;  %v2087_v49 = vpop.f32.mrf.mxu2  ;;  %v1425_v55 = vadd.f32 %v1266_v7, %v1059_v3  ;;  %v2637_v3 = vor.u32 %v2636_v47, %v2633_v45  ;;  %v1807_v45 = vshll.u32 %v7339_v12, 16 }
 0x11e   :  { %v2247_v11 = vadd.f32 %v2087_v49, %v1424_v31 }
 0x120   :  { %v2945_v19 = vpop.f32.mrf.mxu3 }
 0x121   :  { %v3105_v40 = vadd.f32 %v2945_v19, %v2247_v11  ;;  %v1802_v19 = vsel %vm1718_vm7, %v1797_v22, %v1801_v10 }
 0x122   :  { %v3311_v42 = vpop.f32.mrf.mxu0 }
 0x123   :  { %v9217_v53 = vadd.f32 %v3311_v42, %v3105_v40  ;;  %v2638_v40 = vsel %vm491_vm5, %v2628_v36, %v2637_v3  ;;  %v1803_v42 = vshrl.u32 %v7338_v6, 16 }
 0x124   :  { %v1269_v15 = vpop.f32.mrf.mxu1 }
 0x125   :  { %6916 = vmatmul.msk.bf16.gmra.mxu0 %vm788_vm6, %v7848_v8  ;;  %v2089_v31 = vpop.f32.mrf.mxu2  ;;  %v1426_v30 = vadd.f32 %v1269_v15, %v1060_v1  ;;  %v7849_v15 = vld [vmem:[#allocation2 + $0x68] sm:$0xff]  }
 0x126   :  { %v2248_v51 = vadd.f32 %v2089_v31, %v1425_v55  ;;  %v1061_v55 = vadd.f32 %v9197_v29, %v9073_v9  ;;  %v1062_v9 = vadd.f32 %v9197_v29, %v9084_v32  ;;  %v7340_v32 = vld [vmem:[#allocation2 + $0x70] sm:$0xff] }
 0x127   :  { %6690 = vmatmul.msk.bf16.gmra.mxu1 %vm788_vm6, %v7847_v57  ;;  %v2640_v57 = vshrl.u32 %v8470_v20, 16 }
 0x128   :  { %v2947_v49 = vpop.f32.mrf.mxu3 }
 0x129   :  { %v3106_v7 = vadd.f32 %v2947_v49, %v2248_v51  ;;  %v2642_v51 = vrot.slane %v2640_v57, 3  ;;  %v1805_v49 = vor.u32 %v1803_v42, %v1801_v10 }
 0x12a   :  { %v3313_v0 = vpop.f32.mrf.mxu0  ;;  %6851 = vmatmul.msk.bf16.gmra.mxu2 %vm788_vm6, %v1802_v19  ;;  %v2645_v19 = vrot.slane %v2643_v52, 4  ;;  %v8472_v52 = vld [vmem:[#allocation2 + $0x7c] sm:$0xff]  }
 0x12b   :  { %v9226_v11 = vadd.f32 %v3313_v0, %v3106_v7  ;;  %v1809_v7 = vrot.slane %v1807_v45, 1 }
 0x12c   :  { %v1271_v22 = vpop.f32.mrf.mxu1 }
 0x12d   :  { %6884 = vmatmul.msk.bf16.gmra.mxu3 %vm788_vm6, %v2638_v40  ;;  %v2092_v47 = vpop.f32.mrf.mxu2  ;;  %v1427_v21 = vadd.f32 %v1271_v22, %v1061_v55  ;;  %v2646_v55 = vor.u32 %v2645_v19, %v2642_v51  ;;  %v2652_v51 = vshll.u32 %v8472_v52, 16  ;;  %v1811_v19 = vshrl.u32 %v7339_v12, 16 }
 0x12e   :  { %v2249_v38 = vadd.f32 %v2092_v47, %v1426_v30  ;;  %v1810_v47 = vsel %vm1718_vm7, %v1805_v49, %v1809_v7  ;;  %v1815_v49 = vshll.u32 %v7340_v32, 16 }
 0x12f   :  { %v2647_v57 = vsel %vm491_vm5, %v2637_v3, %v2646_v55 }
 0x130   :  { %v2950_v1 = vpop.f32.mrf.mxu3 }
 0x131   :  { %v3107_v31 = vadd.f32 %v2950_v1, %v2249_v38 }
 0x132   :  { %v3316_v36 = vpop.f32.mrf.mxu0 }
 0x133   :  { %v9231_v0 = vadd.f32 %v3316_v36, %v3107_v31 }
 0x134   :  { %v1274_v40 = vpop.f32.mrf.mxu1 }
 0x135   :  { %6917 = vmatmul.msk.bf16.gmra.mxu0 %vm788_vm6, %v7849_v15  ;;  %v2094_v30 = vpop.f32.mrf.mxu2  ;;  %v1428_v6 = vadd.f32 %v1274_v40, %v1062_v9  ;;  %v7850_v40 = vld [vmem:[#allocation2 + $0x70] sm:$0xff]  }
 0x136   :  { %v2250_v20 = vadd.f32 %v2094_v30, %v1427_v21  ;;  %v1063_v21 = vadd.f32 %v9197_v29, %v9095_v46  ;;  %v1064_v46 = vadd.f32 %v9197_v29, %v9106_v43  ;;  %v7341_v43 = vld [vmem:[#allocation2 + $0x78] sm:$0xff] }
 0x137   :  { %6691 = vmatmul.msk.bf16.gmra.mxu1 %vm788_vm6, %v7848_v8  ;;  %v2649_v8 = vshrl.u32 %v8472_v52, 16 }
 0x138   :  { %v2952_v22 = vpop.f32.mrf.mxu3 }
 0x139   :  { %v3108_v38 = vadd.f32 %v2952_v22, %v2250_v20  ;;  %v2651_v20 = vrot.slane %v2649_v8, 3  ;;  %v1813_v22 = vor.u32 %v1811_v19, %v1809_v7 }
 0x13a   :  { %v3318_v10 = vpop.f32.mrf.mxu0  ;;  %6852 = vmatmul.msk.bf16.gmra.mxu2 %vm788_vm6, %v1810_v47  ;;  %v2654_v47 = vrot.slane %v2652_v51, 4  ;;  %v8474_v51 = vld [vmem:[#allocation2 + $0x84] sm:$0xff]  }
 0x13b   :  { %v9240_v42 = vadd.f32 %v3318_v10, %v3108_v38  ;;  %v1817_v38 = vrot.slane %v1815_v49, 1 }
 0x13c   :  { %v1276_v1 = vpop.f32.mrf.mxu1 }
 0x13d   :  { %6885 = vmatmul.msk.bf16.gmra.mxu3 %vm788_vm6, %v2647_v57  ;;  %v2097_v45 = vpop.f32.mrf.mxu2  ;;  %v1429_v36 = vadd.f32 %v1276_v1, %v1063_v21  ;;  %v2655_v21 = vor.u32 %v2654_v47, %v2651_v20  ;;  %v2661_v20 = vshll.u32 %v8474_v51, 16  ;;  %v1819_v47 = vshrl.u32 %v7340_v32, 16 }
 0x13e   :  { %v2251_v31 = vadd.f32 %v2097_v45, %v1428_v6  ;;  %v1818_v45 = vsel %vm1718_vm7, %v1813_v22, %v1817_v38  ;;  %v1823_v22 = vshll.u32 %v7341_v43, 16 }
 0x13f   :  { %v2656_v8 = vsel %vm491_vm5, %v2646_v55, %v2655_v21 }
 0x140   :  { %v2955_v9 = vpop.f32.mrf.mxu3 }
 0x141   :  { %v3109_v30 = vadd.f32 %v2955_v9, %v2251_v31 }
 0x142   :  { %v3321_v3 = vpop.f32.mrf.mxu0 }
 0x143   :  { %v9245_v10 = vadd.f32 %v3321_v3, %v3109_v30 }
 0x144   :  { %v1279_v57 = vpop.f32.mrf.mxu1 }
 0x145   :  { %6918 = vmatmul.msk.bf16.gmra.mxu0 %vm788_vm6, %v7850_v40  ;;  %v2099_v6 = vpop.f32.mrf.mxu2  ;;  %v1430_v12 = vadd.f32 %v1279_v57, %v1064_v46  ;;  %v7851_v57 = vld [vmem:[#allocation2 + $0x78] sm:$0xff]  }
 0x146   :  { %v2252_v52 = vadd.f32 %v2099_v6, %v1429_v36  ;;  %v1065_v36 = vadd.f32 %v9197_v29, %v9117_v16  ;;  %v1066_v16 = vadd.f32 %v9197_v29, %v9128_v33  ;;  %v7342_v33 = vld [vmem:[#allocation2 + $0x80] sm:$0xff] }
 0x147   :  { %6692 = vmatmul.msk.bf16.gmra.mxu1 %vm788_vm6, %v7849_v15  ;;  %v2658_v15 = vshrl.u32 %v8474_v51, 16 }
 0x148   :  { %v2957_v1 = vpop.f32.mrf.mxu3 }
 0x149   :  { %v3110_v31 = vadd.f32 %v2957_v1, %v2252_v52  ;;  %v2660_v52 = vrot.slane %v2658_v15, 3  ;;  %v1821_v1 = vor.u32 %v1819_v47, %v1817_v38 }
 0x14a   :  { %v3323_v7 = vpop.f32.mrf.mxu0  ;;  %6853 = vmatmul.msk.bf16.gmra.mxu2 %vm788_vm6, %v1818_v45  ;;  %v2663_v45 = vrot.slane %v2661_v20, 4  ;;  %v8476_v20 = vld [vmem:[#allocation2 + $0x8c] sm:$0xff]  }
 0x14b   :  { %v9254_v19 = vadd.f32 %v3323_v7, %v3110_v31  ;;  %v1825_v31 = vrot.slane %v1823_v22, 1 }
 0x14c   :  { %v1281_v9 = vpop.f32.mrf.mxu1 }
 0x14d   :  { %6886 = vmatmul.msk.bf16.gmra.mxu3 %vm788_vm6, %v2656_v8  ;;  %v2102_v49 = vpop.f32.mrf.mxu2  ;;  %v1431_v3 = vadd.f32 %v1281_v9, %v1065_v36  ;;  %v2664_v36 = vor.u32 %v2663_v45, %v2660_v52  ;;  %v2670_v52 = vshll.u32 %v8476_v20, 16  ;;  %v1827_v45 = vshrl.u32 %v7341_v43, 16 }
 0x14e   :  { %v2253_v30 = vadd.f32 %v2102_v49, %v1430_v12  ;;  %v1826_v49 = vsel %vm1718_vm7, %v1821_v1, %v1825_v31  ;;  %v1831_v1 = vshll.u32 %v7342_v33, 16 }
 0x14f   :  { %v2665_v15 = vsel %vm491_vm5, %v2655_v21, %v2664_v36 }
 0x150   :  { %v2960_v46 = vpop.f32.mrf.mxu3 }
 0x151   :  { %v3111_v6 = vadd.f32 %v2960_v46, %v2253_v30 }
 0x152   :  { %v3326_v55 = vpop.f32.mrf.mxu0 }
 0x153   :  { %v9259_v7 = vadd.f32 %v3326_v55, %v3111_v6 }
 0x154   :  { %v1284_v8 = vpop.f32.mrf.mxu1 }
 0x155   :  { %6919 = vmatmul.msk.bf16.gmra.mxu0 %vm788_vm6, %v7851_v57  ;;  %v2104_v12 = vpop.f32.mrf.mxu2  ;;  %v1432_v32 = vadd.f32 %v1284_v8, %v1066_v16  ;;  %v7852_v8 = vld [vmem:[#allocation2 + $0x80] sm:$0xff]  }
 0x156   :  { %v2254_v51 = vadd.f32 %v2104_v12, %v1431_v3  ;;  %v1067_v3 = vadd.f32 %v9197_v29, %v9139_v61  ;;  %v1068_v61 = vadd.f32 %v9197_v29, %v9150_v2  ;;  %v7343_v2 = vld [vmem:[#allocation2 + $0x88] sm:$0xff] }
 0x157   :  { %6693 = vmatmul.msk.bf16.gmra.mxu1 %vm788_vm6, %v7850_v40  ;;  %v2667_v40 = vshrl.u32 %v8476_v20, 16 }
 0x158   :  { %v2962_v9 = vpop.f32.mrf.mxu3 }
 0x159   :  { %v3112_v30 = vadd.f32 %v2962_v9, %v2254_v51  ;;  %v2669_v51 = vrot.slane %v2667_v40, 3  ;;  %v1829_v9 = vor.u32 %v1827_v45, %v1825_v31 }
 0x15a   :  { %v3328_v38 = vpop.f32.mrf.mxu0  ;;  %6854 = vmatmul.msk.bf16.gmra.mxu2 %vm788_vm6, %v1826_v49  ;;  %v2672_v49 = vrot.slane %v2670_v52, 4  ;;  %v8478_v52 = vld [vmem:[#allocation2 + $0x94] sm:$0xff]  }
 0x15b   :  { %v9268_v47 = vadd.f32 %v3328_v38, %v3112_v30  ;;  %v1833_v30 = vrot.slane %v1831_v1, 1 }
 0x15c   :  { %v1286_v46 = vpop.f32.mrf.mxu1 }
 0x15d   :  { %6887 = vmatmul.msk.bf16.gmra.mxu3 %vm788_vm6, %v2665_v15  ;;  %v2107_v22 = vpop.f32.mrf.mxu2  ;;  %v1433_v55 = vadd.f32 %v1286_v46, %v1067_v3  ;;  %v2673_v3 = vor.u32 %v2672_v49, %v2669_v51  ;;  %v2679_v51 = vshll.u32 %v8478_v52, 16  ;;  %v1835_v49 = vshrl.u32 %v7342_v33, 16 }
 0x15e   :  { %v2255_v6 = vadd.f32 %v2107_v22, %v1432_v32  ;;  %v1834_v22 = vsel %vm1718_vm7, %v1829_v9, %v1833_v30  ;;  %v1839_v9 = vshll.u32 %v7343_v2, 16 }
 0x15f   :  { %v2674_v40 = vsel %vm491_vm5, %v2664_v36, %v2673_v3 }
 0x160   :  { %v2965_v16 = vpop.f32.mrf.mxu3 }
 0x161   :  { %v3113_v12 = vadd.f32 %v2965_v16, %v2255_v6 }
 0x162   :  { %v3331_v21 = vpop.f32.mrf.mxu0 }
 0x163   :  { %v9273_v38 = vadd.f32 %v3331_v21, %v3113_v12 }
 0x164   :  { %v1289_v15 = vpop.f32.mrf.mxu1 }
 0x165   :  { %6920 = vmatmul.msk.bf16.gmra.mxu0 %vm788_vm6, %v7852_v8  ;;  %v2109_v32 = vpop.f32.mrf.mxu2  ;;  %v1434_v43 = vadd.f32 %v1289_v15, %v1068_v61  ;;  %v7853_v15 = vld [vmem:[#allocation2 + $0x88] sm:$0xff]  }
 0x166   :  { %v2256_v20 = vadd.f32 %v2109_v32, %v1433_v55  ;;  %v1069_v55 = vadd.f32 %v9197_v29, %v9161_v50  ;;  %v1070_v50 = vadd.f32 %v9197_v29, %v9172_v35  ;;  %v7344_v35 = vld [vmem:[#allocation2 + $0x90] sm:$0xff] }
 0x167   :  { %6694 = vmatmul.msk.bf16.gmra.mxu1 %vm788_vm6, %v7851_v57  ;;  %v2676_v57 = vshrl.u32 %v8478_v52, 16 }
 0x168   :  { %v2967_v46 = vpop.f32.mrf.mxu3 }
 0x169   :  { %v3114_v6 = vadd.f32 %v2967_v46, %v2256_v20  ;;  %v2678_v20 = vrot.slane %v2676_v57, 3  ;;  %v1837_v46 = vor.u32 %v1835_v49, %v1833_v30 }
 0x16a   :  { %v3333_v31 = vpop.f32.mrf.mxu0  ;;  %6855 = vmatmul.msk.bf16.gmra.mxu2 %vm788_vm6, %v1834_v22  ;;  %v2681_v22 = vrot.slane %v2679_v51, 4  ;;  %v8480_v51 = vld [vmem:[#allocation2 + $0x9c] sm:$0xff]  }
 0x16b   :  { %v9282_v45 = vadd.f32 %v3333_v31, %v3114_v6  ;;  %v1841_v6 = vrot.slane %v1839_v9, 1 }
 0x16c   :  { %v1291_v16 = vpop.f32.mrf.mxu1 }
 0x16d   :  { %6888 = vmatmul.msk.bf16.gmra.mxu3 %vm788_vm6, %v2674_v40  ;;  %v2112_v1 = vpop.f32.mrf.mxu2  ;;  %v1435_v21 = vadd.f32 %v1291_v16, %v1069_v55  ;;  %v2682_v55 = vor.u32 %v2681_v22, %v2678_v20  ;;  %v2688_v20 = vshll.u32 %v8480_v51, 16  ;;  %v1843_v22 = vshrl.u32 %v7343_v2, 16 }
 0x16e   :  { %v2257_v12 = vadd.f32 %v2112_v1, %v1434_v43  ;;  %v1842_v1 = vsel %vm1718_vm7, %v1837_v46, %v1841_v6  ;;  %v1847_v46 = vshll.u32 %v7344_v35, 16 }
 0x16f   :  { %v2683_v57 = vsel %vm491_vm5, %v2673_v3, %v2682_v55 }
 0x170   :  { %v2970_v61 = vpop.f32.mrf.mxu3 }
 0x171   :  { %v3115_v32 = vadd.f32 %v2970_v61, %v2257_v12 }
 0x172   :  { %v3336_v36 = vpop.f32.mrf.mxu0 }
 0x173   :  { %v9287_v31 = vadd.f32 %v3336_v36, %v3115_v32 }
 0x174   :  { %v1294_v40 = vpop.f32.mrf.mxu1 }
 0x175   :  { %6921 = vmatmul.msk.bf16.gmra.mxu0 %vm788_vm6, %v7853_v15  ;;  %v2114_v43 = vpop.f32.mrf.mxu2  ;;  %v1436_v33 = vadd.f32 %v1294_v40, %v1070_v50  ;;  %v7854_v40 = vld [vmem:[#allocation2 + $0x90] sm:$0xff]  }
 0x176   :  { %v2258_v52 = vadd.f32 %v2114_v43, %v1435_v21  ;;  %v1071_v21 = vadd.f32 %v9197_v29, %v9183_v27  ;;  %v1072_v27 = vadd.f32 %v9197_v29, %v9199_v62  ;;  %v7345_v62 = vld [vmem:[#allocation2 + $0x98] sm:$0xff] }
 0x177   :  { %6695 = vmatmul.msk.bf16.gmra.mxu1 %vm788_vm6, %v7852_v8  ;;  %v2685_v8 = vshrl.u32 %v8480_v51, 16 }
 0x178   :  { %v2972_v16 = vpop.f32.mrf.mxu3 }
 0x179   :  { %v3116_v12 = vadd.f32 %v2972_v16, %v2258_v52  ;;  %v2687_v52 = vrot.slane %v2685_v8, 3  ;;  %v1845_v16 = vor.u32 %v1843_v22, %v1841_v6 }
 0x17a   :  { %v3338_v30 = vpop.f32.mrf.mxu0  ;;  %6856 = vmatmul.msk.bf16.gmra.mxu2 %vm788_vm6, %v1842_v1  ;;  %v2690_v1 = vrot.slane %v2688_v20, 4  ;;  %v8482_v20 = vld [vmem:[#allocation2 + $0xa4] sm:$0xff]  }
 0x17b   :  { %v9296_v49 = vadd.f32 %v3338_v30, %v3116_v12  ;;  %v1849_v12 = vrot.slane %v1847_v46, 1 }
 0x17c   :  { %v1296_v61 = vpop.f32.mrf.mxu1 }
 0x17d   :  { %6889 = vmatmul.msk.bf16.gmra.mxu3 %vm788_vm6, %v2683_v57  ;;  %v2117_v9 = vpop.f32.mrf.mxu2  ;;  %v1437_v36 = vadd.f32 %v1296_v61, %v1071_v21  ;;  %v2691_v21 = vor.u32 %v2690_v1, %v2687_v52  ;;  %v2697_v52 = vshll.u32 %v8482_v20, 16  ;;  %v1851_v1 = vshrl.u32 %v7344_v35, 16 }
 0x17e   :  { %v2259_v32 = vadd.f32 %v2117_v9, %v1436_v33  ;;  %v1850_v9 = vsel %vm1718_vm7, %v1845_v16, %v1849_v12  ;;  %v1855_v16 = vshll.u32 %v7345_v62, 16 }
 0x17f   :  { %v2692_v8 = vsel %vm491_vm5, %v2682_v55, %v2691_v21 }
 0x180   :  { %v2975_v50 = vpop.f32.mrf.mxu3 }
 0x181   :  { %v3117_v43 = vadd.f32 %v2975_v50, %v2259_v32 }
 0x182   :  { %v3341_v3 = vpop.f32.mrf.mxu0 }
 0x183   :  { %v9301_v30 = vadd.f32 %v3341_v3, %v3117_v43 }
 0x184   :  { %v1299_v57 = vpop.f32.mrf.mxu1 }
 0x185   :  { %6922 = vmatmul.msk.bf16.gmra.mxu0 %vm788_vm6, %v7854_v40  ;;  %v2119_v33 = vpop.f32.mrf.mxu2  ;;  %v1438_v2 = vadd.f32 %v1299_v57, %v1072_v27  ;;  %v7855_v57 = vld [vmem:[#allocation2 + $0x98] sm:$0xff]  }
 0x186   :  { %v2260_v51 = vadd.f32 %v2119_v33, %v1437_v36  ;;  %v1073_v36 = vadd.f32 %v9197_v29, %v9210_v34  ;;  %v1074_v34 = vadd.f32 %v9197_v29, %v9026_v28  ;;  %v7346_v28 = vld [vmem:[#allocation2 + $0xa0] sm:$0xff] }
 0x187   :  { %6696 = vmatmul.msk.bf16.gmra.mxu1 %vm788_vm6, %v7853_v15  ;;  %v2694_v15 = vshrl.u32 %v8482_v20, 16 }
 0x188   :  { %v2977_v61 = vpop.f32.mrf.mxu3 }
 0x189   :  { %v3118_v32 = vadd.f32 %v2977_v61, %v2260_v51  ;;  %v2696_v51 = vrot.slane %v2694_v15, 3  ;;  %v1853_v61 = vor.u32 %v1851_v1, %v1849_v12 }
 0x18a   :  { %v3343_v6 = vpop.f32.mrf.mxu0  ;;  %6857 = vmatmul.msk.bf16.gmra.mxu2 %vm788_vm6, %v1850_v9  ;;  %v2699_v9 = vrot.slane %v2697_v52, 4  ;;  %v8484_v52 = vld [vmem:[#allocation2 + $0xac] sm:$0xff]  }
 0x18b   :  { %v9310_v22 = vadd.f32 %v3343_v6, %v3118_v32  ;;  %v1857_v32 = vrot.slane %v1855_v16, 1 }
 0x18c   :  { %v1301_v50 = vpop.f32.mrf.mxu1 }
 0x18d   :  { %6890 = vmatmul.msk.bf16.gmra.mxu3 %vm788_vm6, %v2692_v8  ;;  %v2122_v46 = vpop.f32.mrf.mxu2  ;;  %v1439_v3 = vadd.f32 %v1301_v50, %v1073_v36  ;;  %v2700_v36 = vor.u32 %v2699_v9, %v2696_v51  ;;  %v2706_v51 = vshll.u32 %v8484_v52, 16  ;;  %v1859_v9 = vshrl.u32 %v7345_v62, 16 }
 0x18e   :  { %v2261_v43 = vadd.f32 %v2122_v46, %v1438_v2  ;;  %v1858_v46 = vsel %vm1718_vm7, %v1853_v61, %v1857_v32  ;;  %v1863_v61 = vshll.u32 %v7346_v28, 16 }
 0x18f   :  { %v2701_v15 = vsel %vm491_vm5, %v2691_v21, %v2700_v36 }
 0x190   :  { %v2980_v27 = vpop.f32.mrf.mxu3 }
 0x191   :  { %v3119_v33 = vadd.f32 %v2980_v27, %v2261_v43 }
 0x192   :  { %v3346_v55 = vpop.f32.mrf.mxu0 }
 0x193   :  { %v9315_v6 = vadd.f32 %v3346_v55, %v3119_v33 }
 0x194   :  { %v1304_v8 = vpop.f32.mrf.mxu1 }
 0x195   :  { %6923 = vmatmul.msk.bf16.gmra.mxu0 %vm788_vm6, %v7855_v57  ;;  %v2124_v2 = vpop.f32.mrf.mxu2  ;;  %v1440_v35 = vadd.f32 %v1304_v8, %v1074_v34  ;;  %v7856_v8 = vld [vmem:[#allocation2 + $0xa0] sm:$0xff]  }
 0x196   :  { %v2262_v20 = vadd.f32 %v2124_v2, %v1439_v3  ;;  %v1075_v3 = vadd.f32 %v9197_v29, %v9033_v41  ;;  %v1076_v41 = vadd.f32 %v9197_v29, %v9045_v59  ;;  %v7347_v59 = vld [vmem:[#allocation2 + $0xa8] sm:$0xff] }
 0x197   :  { %6697 = vmatmul.msk.bf16.gmra.mxu1 %vm788_vm6, %v7854_v40  ;;  %v2703_v40 = vshrl.u32 %v8484_v52, 16 }
 0x198   :  { %v2982_v50 = vpop.f32.mrf.mxu3 }
 0x199   :  { %v3120_v43 = vadd.f32 %v2982_v50, %v2262_v20  ;;  %v2705_v20 = vrot.slane %v2703_v40, 3  ;;  %v1861_v50 = vor.u32 %v1859_v9, %v1857_v32 }
 0x19a   :  { %v3348_v12 = vpop.f32.mrf.mxu0  ;;  %6858 = vmatmul.msk.bf16.gmra.mxu2 %vm788_vm6, %v1858_v46  ;;  %v2708_v46 = vrot.slane %v2706_v51, 4  ;;  %v8486_v51 = vld [vmem:[#allocation2 + $0xb4] sm:$0xff]  }
 0x19b   :  { %v9324_v1 = vadd.f32 %v3348_v12, %v3120_v43  ;;  %v1865_v43 = vrot.slane %v1863_v61, 1 }
 0x19c   :  { %v1306_v27 = vpop.f32.mrf.mxu1 }
 0x19d   :  { %6891 = vmatmul.msk.bf16.gmra.mxu3 %vm788_vm6, %v2701_v15  ;;  %v2127_v16 = vpop.f32.mrf.mxu2  ;;  %v1441_v55 = vadd.f32 %v1306_v27, %v1075_v3  ;;  %v2709_v3 = vor.u32 %v2708_v46, %v2705_v20  ;;  %v2715_v20 = vshll.u32 %v8486_v51, 16  ;;  %v1867_v46 = vshrl.u32 %v7346_v28, 16 }
 0x19e   :  { %v2263_v33 = vadd.f32 %v2127_v16, %v1440_v35  ;;  %v1866_v16 = vsel %vm1718_vm7, %v1861_v50, %v1865_v43  ;;  %v1871_v50 = vshll.u32 %v7347_v59, 16 }
 0x19f   :  { %v2710_v40 = vsel %vm491_vm5, %v2700_v36, %v2709_v3 }
 0x1a0   :  { %v2985_v34 = vpop.f32.mrf.mxu3 }
 0x1a1   :  { %v3121_v2 = vadd.f32 %v2985_v34, %v2263_v33 }
 0x1a2   :  { %v3351_v21 = vpop.f32.mrf.mxu0 }
 0x1a3   :  { %v9329_v12 = vadd.f32 %v3351_v21, %v3121_v2 }
 0x1a4   :  { %v1309_v15 = vpop.f32.mrf.mxu1 }
 0x1a5   :  { %6924 = vmatmul.msk.bf16.gmra.mxu0 %vm788_vm6, %v7856_v8  ;;  %v2129_v35 = vpop.f32.mrf.mxu2  ;;  %v1442_v62 = vadd.f32 %v1309_v15, %v1076_v41  ;;  %v7857_v15 = vld [vmem:[#allocation2 + $0xa8] sm:$0xff]  }
 0x1a6   :  { %v2264_v52 = vadd.f32 %v2129_v35, %v1441_v55  ;;  %v1077_v55 = vadd.f32 %v9197_v29, %v9058_v5  ;;  %v1078_v5 = vadd.f32 %v9197_v29, %v9067_v18  ;;  %v7348_v18 = vld [vmem:[#allocation2 + $0xb0] sm:$0xff] }
 0x1a7   :  { %6698 = vmatmul.msk.bf16.gmra.mxu1 %vm788_vm6, %v7855_v57  ;;  %v2712_v57 = vshrl.u32 %v8486_v51, 16 }
 0x1a8   :  { %v2987_v27 = vpop.f32.mrf.mxu3 }
 0x1a9   :  { %v3122_v33 = vadd.f32 %v2987_v27, %v2264_v52  ;;  %v2714_v52 = vrot.slane %v2712_v57, 3  ;;  %v1869_v27 = vor.u32 %v1867_v46, %v1865_v43 }
 0x1aa   :  { %v3353_v32 = vpop.f32.mrf.mxu0  ;;  %6859 = vmatmul.msk.bf16.gmra.mxu2 %vm788_vm6, %v1866_v16  ;;  %v2717_v16 = vrot.slane %v2715_v20, 4  ;;  %v8488_v20 = vld [vmem:[#allocation2 + $0xbc] sm:$0xff]  }
 0x1ab   :  { %v9338_v9 = vadd.f32 %v3353_v32, %v3122_v33  ;;  %v1873_v33 = vrot.slane %v1871_v50, 1 }
 0x1ac   :  { %v1311_v34 = vpop.f32.mrf.mxu1 }
 0x1ad   :  { %6892 = vmatmul.msk.bf16.gmra.mxu3 %vm788_vm6, %v2710_v40  ;;  %v2132_v61 = vpop.f32.mrf.mxu2  ;;  %v1443_v21 = vadd.f32 %v1311_v34, %v1077_v55  ;;  %v2718_v55 = vor.u32 %v2717_v16, %v2714_v52  ;;  %v2724_v52 = vshll.u32 %v8488_v20, 16  ;;  %v1875_v16 = vshrl.u32 %v7347_v59, 16 }
 0x1ae   :  { %v2265_v2 = vadd.f32 %v2132_v61, %v1442_v62  ;;  %v1874_v61 = vsel %vm1718_vm7, %v1869_v27, %v1873_v33  ;;  %v1879_v27 = vshll.u32 %v7348_v18, 16 }
 0x1af   :  { %v2719_v57 = vsel %vm491_vm5, %v2709_v3, %v2718_v55 }
 0x1b0   :  { %v2990_v41 = vpop.f32.mrf.mxu3 }
 0x1b1   :  { %v3123_v35 = vadd.f32 %v2990_v41, %v2265_v2 }
 0x1b2   :  { %v3356_v36 = vpop.f32.mrf.mxu0 }
 0x1b3   :  { %v9343_v32 = vadd.f32 %v3356_v36, %v3123_v35 }
 0x1b4   :  { %v1314_v40 = vpop.f32.mrf.mxu1 }
 0x1b5   :  { %6925 = vmatmul.msk.bf16.gmra.mxu0 %vm788_vm6, %v7857_v15  ;;  %v2134_v62 = vpop.f32.mrf.mxu2  ;;  %v1444_v28 = vadd.f32 %v1314_v40, %v1078_v5  ;;  %v7858_v40 = vld [vmem:[#allocation2 + $0xb0] sm:$0xff]  }
 0x1b6   :  { %v2266_v51 = vadd.f32 %v2134_v62, %v1443_v21  ;;  %v1079_v21 = vadd.f32 %v9197_v29, %v9080_v25  ;;  %v1080_v25 = vadd.f32 %v9197_v29, %v9089_v37  ;;  %v7349_v37 = vld [vmem:[#allocation2 + $0xb8] sm:$0xff] }
 0x1b7   :  { %6699 = vmatmul.msk.bf16.gmra.mxu1 %vm788_vm6, %v7856_v8  ;;  %v2721_v8 = vshrl.u32 %v8488_v20, 16 }
 0x1b8   :  { %v2992_v34 = vpop.f32.mrf.mxu3 }
 0x1b9   :  { %v3124_v2 = vadd.f32 %v2992_v34, %v2266_v51  ;;  %v2723_v51 = vrot.slane %v2721_v8, 3  ;;  %v1877_v34 = vor.u32 %v1875_v16, %v1873_v33 }
 0x1ba   :  { %v3358_v43 = vpop.f32.mrf.mxu0  ;;  %6860 = vmatmul.msk.bf16.gmra.mxu2 %vm788_vm6, %v1874_v61  ;;  %v2726_v61 = vrot.slane %v2724_v52, 4  ;;  %v8490_v52 = vld [vmem:[#allocation2 + $0xc4] sm:$0xff]  }
 0x1bb   :  { %v9352_v46 = vadd.f32 %v3358_v43, %v3124_v2  ;;  %v1881_v2 = vrot.slane %v1879_v27, 1 }
 0x1bc   :  { %v1316_v41 = vpop.f32.mrf.mxu1 }
 0x1bd   :  { %6893 = vmatmul.msk.bf16.gmra.mxu3 %vm788_vm6, %v2719_v57  ;;  %v2137_v50 = vpop.f32.mrf.mxu2  ;;  %v1445_v36 = vadd.f32 %v1316_v41, %v1079_v21  ;;  %v2727_v21 = vor.u32 %v2726_v61, %v2723_v51  ;;  %v2733_v51 = vshll.u32 %v8490_v52, 16  ;;  %v1883_v61 = vshrl.u32 %v7348_v18, 16 }
 0x1be   :  { %v2267_v35 = vadd.f32 %v2137_v50, %v1444_v28  ;;  %v1882_v50 = vsel %vm1718_vm7, %v1877_v34, %v1881_v2  ;;  %v1887_v34 = vshll.u32 %v7349_v37, 16 }
 0x1bf   :  { %v2728_v8 = vsel %vm491_vm5, %v2718_v55, %v2727_v21 }
 0x1c0   :  { %v2995_v5 = vpop.f32.mrf.mxu3 }
 0x1c1   :  { %v3125_v62 = vadd.f32 %v2995_v5, %v2267_v35 }
 0x1c2   :  { %v3361_v3 = vpop.f32.mrf.mxu0 }
 0x1c3   :  { %v9357_v43 = vadd.f32 %v3361_v3, %v3125_v62 }
 0x1c4   :  { %v1319_v57 = vpop.f32.mrf.mxu1 }
 0x1c5   :  { %6926 = vmatmul.msk.bf16.gmra.mxu0 %vm788_vm6, %v7858_v40  ;;  %v2139_v28 = vpop.f32.mrf.mxu2  ;;  %v1446_v59 = vadd.f32 %v1319_v57, %v1080_v25  ;;  %v7859_v57 = vld [vmem:[#allocation2 + $0xb8] sm:$0xff]  }
 0x1c6   :  { %v2268_v20 = vadd.f32 %v2139_v28, %v1445_v36  ;;  %v1081_v36 = vadd.f32 %v9197_v29, %v9102_v54  ;;  %v1082_v54 = vadd.f32 %v9197_v29, %v9111_v13  ;;  %v7350_v13 = vld [vmem:[#allocation2 + $0xc0] sm:$0xff] }
 0x1c7   :  { %6700 = vmatmul.msk.bf16.gmra.mxu1 %vm788_vm6, %v7857_v15  ;;  %v2730_v15 = vshrl.u32 %v8490_v52, 16 }
 0x1c8   :  { %v2997_v41 = vpop.f32.mrf.mxu3 }
 0x1c9   :  { %v3126_v35 = vadd.f32 %v2997_v41, %v2268_v20  ;;  %v2732_v20 = vrot.slane %v2730_v15, 3  ;;  %v1885_v41 = vor.u32 %v1883_v61, %v1881_v2 }
 0x1ca   :  { %v3363_v33 = vpop.f32.mrf.mxu0  ;;  %6861 = vmatmul.msk.bf16.gmra.mxu2 %vm788_vm6, %v1882_v50  ;;  %v2735_v50 = vrot.slane %v2733_v51, 4  ;;  %v8492_v51 = vld [vmem:[#allocation2 + $0xcc] sm:$0xff]  }
 0x1cb   :  { %v9366_v16 = vadd.f32 %v3363_v33, %v3126_v35  ;;  %v1889_v35 = vrot.slane %v1887_v34, 1 }
 0x1cc   :  { %v1321_v5 = vpop.f32.mrf.mxu1 }
 0x1cd   :  { %6894 = vmatmul.msk.bf16.gmra.mxu3 %vm788_vm6, %v2728_v8  ;;  %v2142_v27 = vpop.f32.mrf.mxu2  ;;  %v1447_v3 = vadd.f32 %v1321_v5, %v1081_v36  ;;  %v2736_v36 = vor.u32 %v2735_v50, %v2732_v20  ;;  %v2742_v20 = vshll.u32 %v8492_v51, 16  ;;  %v1891_v50 = vshrl.u32 %v7349_v37, 16 }
 0x1ce   :  { %v2269_v62 = vadd.f32 %v2142_v27, %v1446_v59  ;;  %v1890_v27 = vsel %vm1718_vm7, %v1885_v41, %v1889_v35  ;;  %v1895_v41 = vshll.u32 %v7350_v13, 16 }
 0x1cf   :  { %v2737_v15 = vsel %vm491_vm5, %v2727_v21, %v2736_v36 }
 0x1d0   :  { %v3000_v25 = vpop.f32.mrf.mxu3 }
 0x1d1   :  { %v3127_v28 = vadd.f32 %v3000_v25, %v2269_v62 }
 0x1d2   :  { %v3366_v55 = vpop.f32.mrf.mxu0 }
 0x1d3   :  { %v9371_v33 = vadd.f32 %v3366_v55, %v3127_v28 }
 0x1d4   :  { %v1324_v8 = vpop.f32.mrf.mxu1 }
 0x1d5   :  { %6927 = vmatmul.msk.bf16.gmra.mxu0 %vm788_vm6, %v7859_v57  ;;  %v2144_v59 = vpop.f32.mrf.mxu2  ;;  %v1448_v18 = vadd.f32 %v1324_v8, %v1082_v54  ;;  %v7860_v8 = vld [vmem:[#allocation2 + $0xc0] sm:$0xff]  }
 0x1d6   :  { %v2270_v52 = vadd.f32 %v2144_v59, %v1447_v3  ;;  %v1083_v3 = vadd.f32 %v9197_v29, %v9124_v23  ;;  %v1084_v23 = vadd.f32 %v9197_v29, %v9133_v48  ;;  %v7351_v48 = vld [vmem:[#allocation2 + $0xc8] sm:$0xff] }
 0x1d7   :  { %6701 = vmatmul.msk.bf16.gmra.mxu1 %vm788_vm6, %v7858_v40  ;;  %v2739_v40 = vshrl.u32 %v8492_v51, 16 }
 0x1d8   :  { %v3002_v5 = vpop.f32.mrf.mxu3 }
 0x1d9   :  { %v3128_v62 = vadd.f32 %v3002_v5, %v2270_v52  ;;  %v2741_v52 = vrot.slane %v2739_v40, 3  ;;  %v1893_v5 = vor.u32 %v1891_v50, %v1889_v35 }
 0x1da   :  { %v3368_v2 = vpop.f32.mrf.mxu0  ;;  %6862 = vmatmul.msk.bf16.gmra.mxu2 %vm788_vm6, %v1890_v27  ;;  %v2744_v27 = vrot.slane %v2742_v20, 4  ;;  %v8494_v20 = vld [vmem:[#allocation2 + $0xd4] sm:$0xff]  }
 0x1db   :  { %v9380_v61 = vadd.f32 %v3368_v2, %v3128_v62  ;;  %v1897_v62 = vrot.slane %v1895_v41, 1 }
 0x1dc   :  { %v1326_v25 = vpop.f32.mrf.mxu1 }
 0x1dd   :  { %6895 = vmatmul.msk.bf16.gmra.mxu3 %vm788_vm6, %v2737_v15  ;;  %v2147_v34 = vpop.f32.mrf.mxu2  ;;  %v1449_v55 = vadd.f32 %v1326_v25, %v1083_v3  ;;  %v2745_v3 = vor.u32 %v2744_v27, %v2741_v52  ;;  %v2751_v52 = vshll.u32 %v8494_v20, 16  ;;  %v1899_v27 = vshrl.u32 %v7350_v13, 16 }
 0x1de   :  { %v2271_v28 = vadd.f32 %v2147_v34, %v1448_v18  ;;  %v1898_v34 = vsel %vm1718_vm7, %v1893_v5, %v1897_v62  ;;  %v1903_v5 = vshll.u32 %v7351_v48, 16 }
 0x1df   :  { %v2746_v40 = vsel %vm491_vm5, %v2736_v36, %v2745_v3 }
 0x1e0   :  { %v3005_v54 = vpop.f32.mrf.mxu3 }
 0x1e1   :  { %v3129_v59 = vadd.f32 %v3005_v54, %v2271_v28 }
 0x1e2   :  { %v3371_v21 = vpop.f32.mrf.mxu0 }
 0x1e3   :  { %v9385_v2 = vadd.f32 %v3371_v21, %v3129_v59 }
 0x1e4   :  { %v1329_v15 = vpop.f32.mrf.mxu1 }
 0x1e5   :  { %6928 = vmatmul.msk.bf16.gmra.mxu0 %vm788_vm6, %v7860_v8  ;;  %v2149_v18 = vpop.f32.mrf.mxu2  ;;  %v1450_v37 = vadd.f32 %v1329_v15, %v1084_v23  ;;  %v7861_v15 = vld [vmem:[#allocation2 + $0xc8] sm:$0xff]  }
 0x1e6   :  { %v2272_v51 = vadd.f32 %v2149_v18, %v1449_v55  ;;  %v1085_v55 = vadd.f32 %v9197_v29, %v9146_v60  ;;  %v1086_v60 = vadd.f32 %v9197_v29, %v9155_v56  ;;  %v7352_v56 = vld [vmem:[#allocation2 + $0xd0] sm:$0xff] }
 0x1e7   :  { %6702 = vmatmul.msk.bf16.gmra.mxu1 %vm788_vm6, %v7859_v57  ;;  %v2748_v57 = vshrl.u32 %v8494_v20, 16 }
 0x1e8   :  { %v3007_v25 = vpop.f32.mrf.mxu3 }
 0x1e9   :  { %v3130_v28 = vadd.f32 %v3007_v25, %v2272_v51  ;;  %v2750_v51 = vrot.slane %v2748_v57, 3  ;;  %v1901_v25 = vor.u32 %v1899_v27, %v1897_v62 }
 0x1ea   :  { %v3373_v35 = vpop.f32.mrf.mxu0  ;;  %6863 = vmatmul.msk.bf16.gmra.mxu2 %vm788_vm6, %v1898_v34  ;;  %v2753_v34 = vrot.slane %v2751_v52, 4  ;;  %v8496_v52 = vld [vmem:[#allocation2 + $0xdc] sm:$0xff]  }
 0x1eb   :  { %v9394_v50 = vadd.f32 %v3373_v35, %v3130_v28  ;;  %v1905_v28 = vrot.slane %v1903_v5, 1 }
 0x1ec   :  { %v1331_v54 = vpop.f32.mrf.mxu1 }
 0x1ed   :  { %6896 = vmatmul.msk.bf16.gmra.mxu3 %vm788_vm6, %v2746_v40  ;;  %v2152_v41 = vpop.f32.mrf.mxu2  ;;  %v1451_v21 = vadd.f32 %v1331_v54, %v1085_v55  ;;  %v2754_v55 = vor.u32 %v2753_v34, %v2750_v51  ;;  %v1907_v51 = vshrl.u32 %v7351_v48, 16  ;;  %v1911_v34 = vshll.u32 %v7352_v56, 16 }
 0x1ee   :  { %v2273_v59 = vadd.f32 %v2152_v41, %v1450_v37  ;;  %v1906_v41 = vsel %vm1718_vm7, %v1901_v25, %v1905_v28 }
 0x1ef   :  { %v2755_v57 = vsel %vm491_vm5, %v2745_v3, %v2754_v55  ;;  %v2760_v3 = vshll.u32 %v8496_v52, 16 }
 0x1f0   :  { %v3010_v23 = vpop.f32.mrf.mxu3 }
 0x1f1   :  { %v3131_v18 = vadd.f32 %v3010_v23, %v2273_v59 }
 0x1f2   :  { %v3376_v36 = vpop.f32.mrf.mxu0 }
 0x1f3   :  { %v9399_v35 = vadd.f32 %v3376_v36, %v3131_v18  ;;  %v2757_v36 = vshrl.u32 %v8496_v52, 16 }
 0x1f4   :  { %v1334_v40 = vpop.f32.mrf.mxu1 }
 0x1f5   :  { %6929 = vmatmul.msk.bf16.gmra.mxu0 %vm788_vm6, %v7861_v15  ;;  %v2154_v37 = vpop.f32.mrf.mxu2  ;;  %v1452_v13 = vadd.f32 %v1334_v40, %v1086_v60  ;;  %v7862_v40 = vld [vmem:[#allocation2 + $0xd0] sm:$0xff]  }
 0x1f6   :  { %v2274_v20 = vadd.f32 %v2154_v37, %v1451_v21  ;;  %v9413_v21 = vld [vmem:[%s10633_s4] ss:$0 sm:$0xff] }
 0x1f7   :  { %6703 = vmatmul.msk.bf16.gmra.mxu1 %vm788_vm6, %v7860_v8  ;;  %v1087_v27 = vadd.f32 %v9413_v21, %v9168_v26  ;;  %v1088_v26 = vadd.f32 %v9413_v21, %v9177_v63  ;;  %v7353_v63 = vld [vmem:[#allocation2 + $0xd8] sm:$0xff] }
 0x1f8   :  { %v3012_v54 = vpop.f32.mrf.mxu3 }
 0x1f9   :  { %v3132_v59 = vadd.f32 %v3012_v54, %v2274_v20  ;;  %v2759_v20 = vrot.slane %v2757_v36, 3  ;;  %v1909_v54 = vor.u32 %v1907_v51, %v1905_v28 }
 0x1fa   :  { %v3378_v62 = vpop.f32.mrf.mxu0  ;;  %6864 = vmatmul.msk.bf16.gmra.mxu2 %vm788_vm6, %v1906_v41  ;;  %v2762_v41 = vrot.slane %v2760_v3, 4  ;;  %v8498_v3 = vld [vmem:[#allocation2 + $0xe4] sm:$0xff]  }
 0x1fb   :  { %v9408_v29 = vadd.f32 %v3378_v62, %v3132_v59  ;;  %v1913_v59 = vrot.slane %v1911_v34, 1 }
 0x1fc   :  { %v1336_v5 = vpop.f32.mrf.mxu1 }
 0x1fd   :  { %6897 = vmatmul.msk.bf16.gmra.mxu3 %vm788_vm6, %v2755_v57  ;;  %v2157_v8 = vpop.f32.mrf.mxu2  ;;  %v1453_v18 = vadd.f32 %v1336_v5, %v1087_v27  ;;  %v2763_v27 = vor.u32 %v2762_v41, %v2759_v20  ;;  %v2769_v20 = vshll.u32 %v8498_v3, 16  ;;  %v1915_v41 = vshrl.u32 %v7352_v56, 16 }
 0x1fe   :  { %v2275_v23 = vadd.f32 %v2157_v8, %v1452_v13  ;;  %v1914_v8 = vsel %vm1718_vm7, %v1909_v54, %v1913_v59  ;;  %v1919_v54 = vshll.u32 %v7353_v63, 16 }
 0x1ff   :  { %v2764_v36 = vsel %vm491_vm5, %v2754_v55, %v2763_v27 }
 0x200   :  { %v3015_v25 = vpop.f32.mrf.mxu3 }
 0x201   :  { %v3133_v60 = vadd.f32 %v3015_v25, %v2275_v23 }
 0x202   :  { %v3381_v37 = vpop.f32.mrf.mxu0 }
 0x203   :  { %v9418_v62 = vadd.f32 %v3381_v37, %v3133_v60 }
 0x204   :  { %v1339_v57 = vpop.f32.mrf.mxu1 }
 0x205   :  { %6930 = vmatmul.msk.bf16.gmra.mxu0 %vm788_vm6, %v7862_v40  ;;  %v2159_v13 = vpop.f32.mrf.mxu2  ;;  %v1454_v48 = vadd.f32 %v1339_v57, %v1088_v26  ;;  %v7863_v57 = vld [vmem:[#allocation2 + $0xd8] sm:$0xff]  }
 0x206   :  { %v2276_v52 = vadd.f32 %v2159_v13, %v1453_v18  ;;  %v1089_v18 = vadd.f32 %v9413_v21, %v9190_v14  ;;  %v1090_v14 = vadd.f32 %v9413_v21, %v9035_v44  ;;  %v7354_v44 = vld [vmem:[#allocation2 + $0xe0] sm:$0xff] }
 0x207   :  { %6704 = vmatmul.msk.bf16.gmra.mxu1 %vm788_vm6, %v7861_v15  ;;  %v2766_v15 = vshrl.u32 %v8498_v3, 16 }
 0x208   :  { %v3017_v5 = vpop.f32.mrf.mxu3 }
 0x209   :  { %v3134_v23 = vadd.f32 %v3017_v5, %v2276_v52  ;;  %v2768_v52 = vrot.slane %v2766_v15, 3  ;;  %v1917_v5 = vor.u32 %v1915_v41, %v1913_v59 }
 0x20a   :  { %v3383_v28 = vpop.f32.mrf.mxu0  ;;  %6865 = vmatmul.msk.bf16.gmra.mxu2 %vm788_vm6, %v1914_v8  ;;  %v2771_v8 = vrot.slane %v2769_v20, 4  ;;  %v8500_v20 = vld [vmem:[#allocation2 + $0xec] sm:$0xff]  }
 0x20b   :  { %v9427_v51 = vadd.f32 %v3383_v28, %v3134_v23  ;;  %v1921_v23 = vrot.slane %v1919_v54, 1 }
 0x20c   :  { %v1341_v25 = vpop.f32.mrf.mxu1 }
 0x20d   :  { %6898 = vmatmul.msk.bf16.gmra.mxu3 %vm788_vm6, %v2764_v36  ;;  %v2162_v34 = vpop.f32.mrf.mxu2  ;;  %v1455_v37 = vadd.f32 %v1341_v25, %v1089_v18  ;;  %v2772_v18 = vor.u32 %v2771_v8, %v2768_v52  ;;  %v2778_v52 = vshll.u32 %v8500_v20, 16  ;;  %v1923_v8 = vshrl.u32 %v7353_v63, 16 }
 0x20e   :  { %v2277_v60 = vadd.f32 %v2162_v34, %v1454_v48  ;;  %v1922_v34 = vsel %vm1718_vm7, %v1917_v5, %v1921_v23  ;;  %v1927_v5 = vshll.u32 %v7354_v44, 16 }
 0x20f   :  { %v2773_v15 = vsel %vm491_vm5, %v2763_v27, %v2772_v18 }
 0x210   :  { %v3020_v26 = vpop.f32.mrf.mxu3 }
 0x211   :  { %v3135_v13 = vadd.f32 %v3020_v26, %v2277_v60 }
 0x212   :  { %v3386_v55 = vpop.f32.mrf.mxu0 }
 0x213   :  { %v9432_v28 = vadd.f32 %v3386_v55, %v3135_v13 }
 0x214   :  { %v1344_v36 = vpop.f32.mrf.mxu1 }
 0x215   :  { %6931 = vmatmul.msk.bf16.gmra.mxu0 %vm788_vm6, %v7863_v57  ;;  %v2164_v48 = vpop.f32.mrf.mxu2  ;;  %v1456_v56 = vadd.f32 %v1344_v36, %v1090_v14  ;;  %v7864_v36 = vld [vmem:[#allocation2 + $0xe0] sm:$0xff]  }
 0x216   :  { %v2278_v3 = vadd.f32 %v2164_v48, %v1455_v37  ;;  %v1091_v37 = vadd.f32 %v9413_v21, %v9042_v58  ;;  %v1092_v58 = vadd.f32 %v9413_v21, %v9056_v4  ;;  %v7355_v4 = vld [vmem:[#allocation2 + $0xe8] sm:$0xff] }
 0x217   :  { %6705 = vmatmul.msk.bf16.gmra.mxu1 %vm788_vm6, %v7862_v40  ;;  %v2775_v40 = vshrl.u32 %v8500_v20, 16 }
 0x218   :  { %v3022_v25 = vpop.f32.mrf.mxu3 }
 0x219   :  { %v3136_v60 = vadd.f32 %v3022_v25, %v2278_v3  ;;  %v2777_v3 = vrot.slane %v2775_v40, 3  ;;  %v1925_v25 = vor.u32 %v1923_v8, %v1921_v23 }
 0x21a   :  { %v3388_v59 = vpop.f32.mrf.mxu0  ;;  %6866 = vmatmul.msk.bf16.gmra.mxu2 %vm788_vm6, %v1922_v34  ;;  %v2780_v34 = vrot.slane %v2778_v52, 4  ;;  %v8502_v52 = vld [vmem:[#allocation2 + $0xf4] sm:$0xff]  }
 0x21b   :  { %v9441_v41 = vadd.f32 %v3388_v59, %v3136_v60  ;;  %v1929_v60 = vrot.slane %v1927_v5, 1 }
 0x21c   :  { %v1346_v26 = vpop.f32.mrf.mxu1 }
 0x21d   :  { %6899 = vmatmul.msk.bf16.gmra.mxu3 %vm788_vm6, %v2773_v15  ;;  %v2167_v54 = vpop.f32.mrf.mxu2  ;;  %v1457_v55 = vadd.f32 %v1346_v26, %v1091_v37  ;;  %v2781_v37 = vor.u32 %v2780_v34, %v2777_v3  ;;  %v2787_v3 = vshll.u32 %v8502_v52, 16  ;;  %v1931_v34 = vshrl.u32 %v7354_v44, 16 }
 0x21e   :  { %v2279_v13 = vadd.f32 %v2167_v54, %v1456_v56  ;;  %v1930_v54 = vsel %vm1718_vm7, %v1925_v25, %v1929_v60  ;;  %v1935_v25 = vshll.u32 %v7355_v4, 16 }
 0x21f   :  { %v2782_v40 = vsel %vm491_vm5, %v2772_v18, %v2781_v37 }
 0x220   :  { %v3025_v14 = vpop.f32.mrf.mxu3 }
 0x221   :  { %v3137_v48 = vadd.f32 %v3025_v14, %v2279_v13 }
 0x222   :  { %v3391_v27 = vpop.f32.mrf.mxu0 }
 0x223   :  { %v9446_v59 = vadd.f32 %v3391_v27, %v3137_v48 }
 0x224   :  { %v1349_v15 = vpop.f32.mrf.mxu1 }
 0x225   :  { %10666 = vst [vmem:[#allocation29_spill] sm:$0xff] %v9446_v59  ;;  %6932 = vmatmul.msk.bf16.gmra.mxu0 %vm788_vm6, %v7864_v36  ;;  %v2169_v56 = vpop.f32.mrf.mxu2  ;;  %v1458_v63 = vadd.f32 %v1349_v15, %v1092_v58  ;;  %v7865_v15 = vld [vmem:[#allocation2 + $0xe8] sm:$0xff]  }
 0x226   :  { %v2280_v20 = vadd.f32 %v2169_v56, %v1457_v55  ;;  %v1093_v55 = vadd.f32 %v9413_v21, %v9065_v17  ;;  %v1094_v17 = vadd.f32 %v9413_v21, %v9078_v24  ;;  %v7356_v24 = vld [vmem:[#allocation2 + $0xf0] sm:$0xff]  ;;  %v10695_v59 = vld [vmem:[#allocation5_spill] sm:$0xff] }
 0x227   :  { %6706 = vmatmul.msk.bf16.gmra.mxu1 %vm788_vm6, %v7863_v57  ;;  %v2784_v57 = vshrl.u32 %v8502_v52, 16 }
 0x228   :  { %v3027_v26 = vpop.f32.mrf.mxu3 }
 0x229   :  { %v3138_v13 = vadd.f32 %v3027_v26, %v2280_v20  ;;  %v2786_v20 = vrot.slane %v2784_v57, 3  ;;  %v1933_v26 = vor.u32 %v1931_v34, %v1929_v60 }
 0x22a   :  { %v3393_v23 = vpop.f32.mrf.mxu0  ;;  %6867 = vmatmul.msk.bf16.gmra.mxu2 %vm788_vm6, %v1930_v54  ;;  %v2789_v54 = vrot.slane %v2787_v3, 4  ;;  %v8504_v3 = vld [vmem:[#allocation2 + $0xfc] sm:$0xff]  }
 0x22b   :  { %v9455_v8 = vadd.f32 %v3393_v23, %v3138_v13  ;;  %v1937_v13 = vrot.slane %v1935_v25, 1 }
 0x22c   :  { %v1351_v14 = vpop.f32.mrf.mxu1 }
 0x22d   :  { %10667 = vst [vmem:[#allocation30_spill] sm:$0xff] %v9455_v8  ;;  %6900 = vmatmul.msk.bf16.gmra.mxu3 %vm788_vm6, %v2782_v40  ;;  %v2172_v5 = vpop.f32.mrf.mxu2  ;;  %v1459_v27 = vadd.f32 %v1351_v14, %v1093_v55  ;;  %v2790_v55 = vor.u32 %v2789_v54, %v2786_v20  ;;  %v2796_v20 = vshll.u32 %v8504_v3, 16  ;;  %v1939_v54 = vshrl.u32 %v7355_v4, 16 }
 0x22e   :  { %v2281_v48 = vadd.f32 %v2172_v5, %v1458_v63  ;;  %v1938_v5 = vsel %vm1718_vm7, %v1933_v26, %v1937_v13  ;;  %v1943_v26 = vshll.u32 %v7356_v24, 16 }
 0x22f   :  { %v2791_v57 = vsel %vm491_vm5, %v2781_v37, %v2790_v55 }
 0x230   :  { %v3030_v58 = vpop.f32.mrf.mxu3 }
 0x231   :  { %v3139_v56 = vadd.f32 %v3030_v58, %v2281_v48 }
 0x232   :  { %v3396_v18 = vpop.f32.mrf.mxu0 }
 0x233   :  { %v9460_v23 = vadd.f32 %v3396_v18, %v3139_v56 }
 0x234   :  { %v1354_v40 = vpop.f32.mrf.mxu1 }
 0x235   :  { %10668 = vst [vmem:[#allocation31_spill] sm:$0xff] %v9460_v23  ;;  %6933 = vmatmul.msk.bf16.gmra.mxu0 %vm788_vm6, %v7865_v15  ;;  %v2174_v63 = vpop.f32.mrf.mxu2  ;;  %v1460_v44 = vadd.f32 %v1354_v40, %v1094_v17  ;;  %v7866_v40 = vld [vmem:[#allocation2 + $0xf0] sm:$0xff]  }
 0x236   :  { %v2282_v52 = vadd.f32 %v2174_v63, %v1459_v27  ;;  %v1095_v27 = vadd.f32 %v9413_v21, %v9087_v39  ;;  %v170_v39 = vld [vmem:[%s10631_s0 + $0xf0] sm:$0xf] }
 0x237   :  { %6707 = vmatmul.msk.bf16.gmra.mxu1 %vm788_vm6, %v7864_v36  ;;  %v2793_v36 = vshrl.u32 %v8504_v3, 16  ;;  %234 = vst.msk [vmem:[#allocation2 + $0x110] sm:$0xf] %vm105_vm1, %v170_v39 }
 0x238   :  { %v3032_v14 = vpop.f32.mrf.mxu3 }
 0x239   :  { %v3140_v48 = vadd.f32 %v3032_v14, %v2282_v52  ;;  %v2795_v52 = vrot.slane %v2793_v36, 3  ;;  %v1941_v14 = vor.u32 %v1939_v54, %v1937_v13 }
 0x23a   :  { %v3398_v60 = vpop.f32.mrf.mxu0  ;;  %6868 = vmatmul.msk.bf16.gmra.mxu2 %vm788_vm6, %v1938_v5  ;;  %v2798_v5 = vrot.slane %v2796_v20, 4 }
 0x23b   :  { %v9469_v34 = vadd.f32 %v3398_v60, %v3140_v48  ;;  %v1945_v48 = vrot.slane %v1943_v26, 1  ;;  %v10671_v60 = vld [vmem:[#allocation9_spill] sm:$0xff] }
 0x23c   :  { %v1356_v58 = vpop.f32.mrf.mxu1  ;;  %v1096_v4 = vadd.f32 %v9413_v21, %v10671_v60  ;;  %v8506_v26 = vld [vmem:[#allocation2 + $0x104] sm:$0xff]  }
 0x23d   :  { %10669 = vst [vmem:[#allocation32_spill] sm:$0xff] %v9469_v34  ;;  %6901 = vmatmul.msk.bf16.gmra.mxu3 %vm788_vm6, %v2791_v57  ;;  %v2177_v25 = vpop.f32.mrf.mxu2  ;;  %v1461_v18 = vadd.f32 %v1356_v58, %v1095_v27  ;;  %v2799_v58 = vor.u32 %v2798_v5, %v2795_v52  ;;  %v2805_v60 = vshll.u32 %v8506_v26, 16 }
 0x23e   :  { %v2283_v56 = vadd.f32 %v2177_v25, %v1460_v44 }
 0x23f   :  { %v2800_v54 = vsel %vm491_vm5, %v2790_v55, %v2799_v58 }
 0x240   :  { %v3035_v17 = vpop.f32.mrf.mxu3 }
 0x241   :  { %v3141_v63 = vadd.f32 %v3035_v17, %v2283_v56  ;;  %v1946_v56 = vsel %vm1718_vm7, %v1941_v14, %v1945_v48  ;;  %v7357_v17 = vld [vmem:[#allocation2 + $0xf8] sm:$0xff] }
 0x242   :  { %v3401_v37 = vpop.f32.mrf.mxu0 }
 0x243   :  { %v9478_v44 = vadd.f32 %v3401_v37, %v3141_v63  ;;  %v10673_v37 = vld [vmem:[#allocation11_spill] sm:$0xff] }
 0x244   :  { %v1359_v3 = vpop.f32.mrf.mxu1 }
 0x245   :  { %10670 = vst [vmem:[#allocation33_spill] sm:$0xff] %v9478_v44  ;;  %6934 = vmatmul.msk.bf16.gmra.mxu0 %vm788_vm6, %v7866_v40  ;;  %v2179_v57 = vpop.f32.mrf.mxu2  ;;  %v1462_v25 = vadd.f32 %v1359_v3, %v1096_v4  ;;  %v1947_v4 = vshrl.u32 %v7356_v24, 16 }
 0x246   :  { %v2284_v27 = vadd.f32 %v2179_v57, %v1461_v18  ;;  %v1097_v18 = vadd.f32 %v9413_v21, %v10673_v37  ;;  %v1951_v57 = vshll.u32 %v7357_v17, 16 }
 0x247   :  { %6708 = vmatmul.msk.bf16.gmra.mxu1 %vm788_vm6, %v7865_v15  ;;  %v2802_v15 = vshrl.u32 %v8506_v26, 16  ;;  %v10675_v26 = vld [vmem:[#allocation13_spill] sm:$0xff] }
 0x248   :  { %v3037_v36 = vpop.f32.mrf.mxu3  ;;  %v1953_v37 = vrot.slane %v1951_v57, 1 }
 0x249   :  { %v3142_v13 = vadd.f32 %v3037_v36, %v2284_v27  ;;  %v7867_v27 = vld [vmem:[#allocation2 + $0xf8] sm:$0xff]   ;;  %v2804_v36 = vrot.slane %v2802_v15, 3 }
 0x24a   :  { %v3403_v20 = vpop.f32.mrf.mxu0  ;;  %6869 = vmatmul.msk.bf16.gmra.mxu2 %vm788_vm6, %v1946_v56 }
 0x24b   :  { %v9487_v63 = vadd.f32 %v3403_v20, %v3142_v13  ;;  %v2807_v13 = vrot.slane %v2805_v60, 4  ;;  %v171_v20 = vld [vmem:[%s10631_s0 + $0xf4] sm:$0xf] }
 0x24c   :  { %v1361_v5 = vpop.f32.mrf.mxu1  ;;  %235 = vst.msk [vmem:[#allocation2 + $0x114] sm:$0xf] %vm105_vm1, %v171_v20  ;;  %v7358_v20 = vld [vmem:[#allocation2 + $0x100] sm:$0xff] }
 0x24d   :  { %10672 = vst [vmem:[#allocation9_spill] sm:$0xff] %v9487_v63  ;;  %6902 = vmatmul.msk.bf16.gmra.mxu3 %vm788_vm6, %v2800_v54  ;;  %v2182_v52 = vpop.f32.mrf.mxu2  ;;  %v1463_v14 = vadd.f32 %v1361_v5, %v1097_v18  ;;  %v172_v54 = vld [vmem:[%s10631_s0 + $0xf8] sm:$0xf]  ;;  %v1098_v18 = vadd.f32 %v9413_v21, %v10675_v26  ;;  %v2808_v60 = vor.u32 %v2807_v13, %v2804_v36 }
 0x24e   :  { %v2285_v39 = vadd.f32 %v2182_v52, %v1462_v25  ;;  %v1949_v25 = vor.u32 %v1947_v4, %v1945_v48  ;;  %236 = vst.msk [vmem:[#allocation2 + $0x118] sm:$0xf] %vm105_vm1, %v172_v54  ;;  %v10677_v26 = vld [vmem:[#allocation15_spill] sm:$0xff] }
 0x250   :  { %v3040_v3 = vpop.f32.mrf.mxu3 }
 0x251   :  { %v3143_v55 = vadd.f32 %v3040_v3, %v2285_v39  ;;  %v1954_v3 = vsel %vm1718_vm7, %v1949_v25, %v1953_v37 }
 0x252   :  { %v3406_v56 = vpop.f32.mrf.mxu0 }
 0x253   :  { %v9499_v24 = vadd.f32 %v3406_v56, %v3143_v55  ;;  %v2809_v55 = vsel %vm491_vm5, %v2799_v58, %v2808_v60  ;;  %v8508_v56 = vld [vmem:[#allocation2 + $0x10c] sm:$0xff]   ;;  %v173_v58 = vld [vmem:[%s10631_s0 + $0xfc] sm:$0xf] }
 0x254   :  { %v1364_v5 = vpop.f32.mrf.mxu1  ;;  %237 = vst.msk [vmem:[#allocation2 + $0x11c] sm:$0xf] %vm105_vm1, %v173_v58 }
 0x255   :  { %10674 = vst [vmem:[#allocation11_spill] sm:$0xff] %v9499_v24  ;;  %6935 = vmatmul.msk.bf16.gmra.mxu0 %vm788_vm6, %v7867_v27  ;;  %v2184_v52 = vpop.f32.mrf.mxu2  ;;  %v1464_v15 = vadd.f32 %v1364_v5, %v1098_v18  ;;  %v1955_v5 = vshrl.u32 %v7357_v17, 16 }
 0x256   :  { %v2286_v39 = vadd.f32 %v2184_v52, %v1463_v14  ;;  %v1099_v14 = vadd.f32 %v9413_v21, %v10677_v26  ;;  %v2814_v52 = vshll.u32 %v8508_v56, 16 }
 0x257   :  { %6709 = vmatmul.msk.bf16.gmra.mxu1 %vm788_vm6, %v7866_v40  ;;  %v2811_v40 = vshrl.u32 %v8508_v56, 16 }
 0x258   :  { %v3042_v48 = vpop.f32.mrf.mxu3 }
 0x259   :  { %v3144_v4 = vadd.f32 %v3042_v48, %v2286_v39  ;;  %v1959_v39 = vshll.u32 %v7358_v20, 16  ;;  %v2813_v26 = vrot.slane %v2811_v40, 3 }
 0x25a   :  { %v3408_v57 = vpop.f32.mrf.mxu0  ;;  %6870 = vmatmul.msk.bf16.gmra.mxu2 %vm788_vm6, %v1954_v3 }
 0x25b   :  { %v9509_v54 = vadd.f32 %v3408_v57, %v3144_v4  ;;  %v7868_v57 = vld [vmem:[#allocation2 + $0x100] sm:$0xff]   ;;  %v1961_v24 = vrot.slane %v1959_v39, 1  ;;  %v7359_v39 = vld [vmem:[#allocation2 + $0x108] sm:$0xff] }
 0x25c   :  { %v1366_v13 = vpop.f32.mrf.mxu1 }
 0x25d   :  { %10676 = vst [vmem:[#allocation13_spill] sm:$0xff] %v9509_v54  ;;  %6903 = vmatmul.msk.bf16.gmra.mxu3 %vm788_vm6, %v2809_v55  ;;  %v2187_v36 = vpop.f32.mrf.mxu2  ;;  %v1465_v18 = vadd.f32 %v1366_v13, %v1099_v14  ;;  %v2816_v55 = vrot.slane %v2814_v52, 4  ;;  %v1957_v54 = vor.u32 %v1955_v5, %v1953_v37  ;;  %v10679_v14 = vld [vmem:[#allocation17_spill] sm:$0xff]  ;;  %v8509_v5 = vld [vmem:[#allocation2 + $0x114] sm:$0xff]  }
 0x25e   :  { %v2287_v25 = vadd.f32 %v2187_v36, %v1464_v15  ;;  %v1100_v17 = vadd.f32 %v9413_v21, %v10679_v14  ;;  %v2823_v14 = vshll.u32 %v8509_v5, 16 }
 0x25f   :  { %v2817_v44 = vor.u32 %v2816_v55, %v2813_v26 }
 0x260   :  { %v3045_v3 = vpop.f32.mrf.mxu3 }
 0x261   :  { %v3145_v48 = vadd.f32 %v3045_v3, %v2287_v25  ;;  %v1962_v25 = vsel %vm1718_vm7, %v1957_v54, %v1961_v24  ;;  %v2818_v52 = vsel %vm491_vm5, %v2808_v60, %v2817_v44 }
 0x262   :  { %v3411_v4 = vpop.f32.mrf.mxu0 }
 0x263   :  { %v9518_v15 = vadd.f32 %v3411_v4, %v3145_v48  ;;  %v10681_v48 = vld [vmem:[#allocation19_spill] sm:$0xff] }
 0x264   :  { %v1369_v36 = vpop.f32.mrf.mxu1 }
 0x265   :  { %10678 = vst [vmem:[#allocation15_spill] sm:$0xff] %v9518_v15  ;;  %6936 = vmatmul.msk.bf16.gmra.mxu0 %vm788_vm6, %v7868_v57  ;;  %v2189_v56 = vpop.f32.mrf.mxu2  ;;  %v1466_v63 = vadd.f32 %v1369_v36, %v1100_v17  ;;  %v1963_v17 = vshrl.u32 %v7358_v20, 16  ;;  %v9532_v15 = vld [vmem:[#allocation2 + $0x118] sm:$0xff]  }
 0x266   :  { %v2288_v13 = vadd.f32 %v2189_v56, %v1465_v18  ;;  %v1101_v18 = vadd.f32 %v9413_v21, %v10681_v48  ;;  %v1967_v56 = vshll.u32 %v7359_v39, 16 }
 0x267   :  { %6710 = vmatmul.msk.bf16.gmra.mxu1 %vm788_vm6, %v7867_v27  ;;  %v2820_v27 = vshrl.u32 %v8509_v5, 16 }
 0x268   :  { %v3047_v58 = vpop.f32.mrf.mxu3 }
 0x269   :  { %v3146_v40 = vadd.f32 %v3047_v58, %v2288_v13  ;;  %v2822_v58 = vrot.slane %v2820_v27, 3  ;;  %v7679_v27 = vunpack.c.h.b16 %v9532_v15 }
 0x26a   :  { %v3413_v37 = vpop.f32.mrf.mxu0  ;;  %6871 = vmatmul.msk.bf16.gmra.mxu2 %vm788_vm6, %v1962_v25  ;;  %v7869_v25 = vld [vmem:[#allocation2 + $0x108] sm:$0xff]  }
 0x26b   :  { %v9527_v3 = vadd.f32 %v3413_v37, %v3146_v40  ;;  %v2825_v40 = vrot.slane %v2823_v14, 4  ;;  %v1965_v37 = vor.u32 %v1963_v17, %v1961_v24 }
 0x26c   :  { %v1371_v54 = vpop.f32.mrf.mxu1 }
 0x26d   :  { %10680 = vst [vmem:[#allocation17_spill] sm:$0xff] %v9527_v3  ;;  %6904 = vmatmul.msk.bf16.gmra.mxu3 %vm788_vm6, %v2818_v52  ;;  %v2192_v4 = vpop.f32.mrf.mxu2  ;;  %v1467_v55 = vadd.f32 %v1371_v54, %v1101_v18  ;;  %v1969_v3 = vrot.slane %v1967_v56, 1  ;;  %v10683_v52 = vld [vmem:[#allocation21_spill] sm:$0xff]  ;;  %v1552_v18 = vld [vmem:[#allocation2 + $0x110] sm:$0x1] }
 0x26e   :  { %v2289_v26 = vadd.f32 %v2192_v4, %v1466_v63  ;;  %v1102_v63 = vadd.f32 %v9413_v21, %v10683_v52  ;;  %v1684_v14 = vunpack.c.l.b16 %v1552_v18 }
 0x26f   :  { %v1970_v24 = vsel %vm1718_vm7, %v1965_v37, %v1969_v3 }
 0x270   :  { %v3050_v36 = vpop.f32.mrf.mxu3 }
 0x271   :  { %v3147_v13 = vadd.f32 %v3050_v36, %v2289_v26  ;;  %v2826_v26 = vor.u32 %v2825_v40, %v2822_v58 }
 0x272   :  { %v3416_v60 = vpop.f32.mrf.mxu0 }
 0x273   :  { %v9534_v48 = vadd.f32 %v3416_v60, %v3147_v13  ;;  %v2827_v13 = vsel %vm491_vm5, %v2817_v44, %v2826_v26  ;;  %v2540_v60 = vpack.c.b16 %v7679_v27, %v7679_v27  ;;  %v7870_v27 = vld [vmem:[#allocation2 + $0x110] sm:$0xff]  }
 0x274   :  { %v1374_v5 = vpop.f32.mrf.mxu1 }
 0x275   :  { %10682 = vst [vmem:[#allocation19_spill] sm:$0xff] %v9534_v48  ;;  %6937 = vmatmul.msk.bf16.gmra.mxu0 %vm788_vm6, %v7869_v25  ;;  %v2194_v20 = vpop.f32.mrf.mxu2  ;;  %v1468_v54 = vadd.f32 %v1374_v5, %v1102_v63  ;;  %v1717_v25 = vpack.c.b16 %v1684_v14, %v1684_v14  ;;  %v1971_v5 = vshrl.u32 %v7359_v39, 16  ;;  %v8224_v48 = vld [vmem:[#allocation2 + $0x2c] sm:$0x8] }
 0x276   :  { %v2290_v4 = vadd.f32 %v2194_v20, %v1467_v55  ;;  %v10685_v55 = vld [vmem:[#allocation23_spill] sm:$0xff]  ;;  %v2832_v20 = vshll.u32 %v2540_v60, 16 }
 0x277   :  { %6711 = vmatmul.msk.bf16.gmra.mxu1 %vm788_vm6, %v7868_v57  ;;  %v1103_v58 = vadd.f32 %v9413_v21, %v10685_v55  ;;  %v2829_v57 = vshrl.u32 %v2540_v60, 16  ;;  %v8511_v55 = vld [vmem:[#allocation2 + $0x2c] sm:$0xf0]  }
 0x278   :  { %v3052_v17 = vpop.f32.mrf.mxu3 }
 0x279   :  { %v3148_v56 = vadd.f32 %v3052_v17, %v2290_v4  ;;  %v1975_v4 = vshll.u32 %v1717_v25, 16  ;;  %v2831_v14 = vrot.slane %v2829_v57, 3  ;;  %v7360_v25 = vld [vmem:[#allocation2 + $0x20] sm:$0xff] }
 0x27a   :  { %v3418_v36 = vpop.f32.mrf.mxu0  ;;  %6872 = vmatmul.msk.bf16.gmra.mxu2 %vm788_vm6, %v1970_v24 }
 0x27b   :  { %v9544_v52 = vadd.f32 %v3418_v36, %v3148_v56  ;;  %v2834_v56 = vrot.slane %v2832_v20, 4  ;;  %v1973_v36 = vor.u32 %v1971_v5, %v1969_v3  ;;  %v8513_v3 = vld [vmem:[#allocation2 + $0x34] sm:$0xff]   ;;  %v8576_v5 = vld [vmem:[#allocation2 + $0x108] sm:$0xff]  }
 0x27c   :  { %v1376_v37 = vpop.f32.mrf.mxu1 }
 0x27d   :  { %10684 = vst [vmem:[#allocation21_spill] sm:$0xff] %v9544_v52  ;;  %6905 = vmatmul.msk.bf16.gmra.mxu3 %vm788_vm6, %v2827_v13  ;;  %v2197_v40 = vpop.f32.mrf.mxu2  ;;  %v1469_v18 = vadd.f32 %v1376_v37, %v1103_v58  ;;  %v1977_v52 = vrot.slane %v1975_v4, 1  ;;  %v10687_v13 = vld [vmem:[#allocation25_spill] sm:$0xff]  ;;  %v2835_v37 = vor.u32 %v2834_v56, %v2831_v14  ;;  %v4596_v14 = vshrl.u32 %v8513_v3, 16 }
 0x27e   :  { %v2291_v63 = vadd.f32 %v2197_v40, %v1468_v54  ;;  %v1104_v54 = vadd.f32 %v9413_v21, %v10687_v13 }
 0x27f   :  { %v1978_v57 = vsel %vm1718_vm7, %v1973_v36, %v1977_v52  ;;  %v10689_v52 = vld [vmem:[#allocation27_spill] sm:$0xff] }
 0x280   :  { %v3055_v24 = vpop.f32.mrf.mxu3  ;;  %v1105_v36 = vadd.f32 %v9413_v21, %v10689_v52  ;;  %v7392_v52 = vld [vmem:[#allocation2 + $0x30] sm:$0xff] }
 0x281   :  { %v3149_v17 = vadd.f32 %v3055_v24, %v2291_v63  ;;  %v8225_v63 = vor.u32 %v8511_v55, %v8224_v48  ;;  %v9556_v24 = vld [vmem:[#allocation2 + $0x28] sm:$0xff]  ;;  %v4599_v48 = vshll.u32 %v8513_v3, 16 }
 0x282   :  { %v3421_v44 = vpop.f32.mrf.mxu0 }
 0x283   :  { %v9549_v34 = vadd.f32 %v3421_v44, %v3149_v17  ;;  %v3768_v17 = vshll.u32 %v7360_v25, 16  ;;  %v4591_v13 = vshll.u32 %v8225_v63, 16 }
 0x284   :  { %v1379_v39 = vpop.f32.mrf.mxu1 }
 0x285   :  { %10686 = vst [vmem:[#allocation23_spill] sm:$0xff] %v9549_v34  ;;  %6938 = vmatmul.msk.bf16.gmra.mxu0 %vm788_vm6, %v7870_v27  ;;  %v2199_v60 = vpop.f32.mrf.mxu2  ;;  %v1470_v40 = vadd.f32 %v1379_v39, %v1104_v54  ;;  %v2836_v27 = vsel %vm491_vm5, %v2826_v26, %v2835_v37  ;;  %v3770_v39 = vrot.slane %v3768_v17, 1  ;;  %v4593_v37 = vrot.slane %v4591_v13, 4 }
 0x286   :  { %v2292_v58 = vadd.f32 %v2199_v60, %v1469_v18  ;;  %v4588_v18 = vshrl.u32 %v8225_v63, 16  ;;  %v3766_v60 = vshrl.u32 %v7360_v25, 16  ;;  %v4598_v63 = vrot.slane %v4596_v14, 3  ;;  %v10691_v25 = vld [vmem:[#allocation3_spill] sm:$0xff] }
 0x287   :  { %6712 = vmatmul.msk.bf16.gmra.mxu1 %vm788_vm6, %v8576_v5  ;;  %v4601_v5 = vrot.slane %v4599_v48, 4  ;;  %v1106_v17 = vadd.f32 %v9413_v21, %v10691_v25 }
 0x288   :  { %v3057_v20 = vpop.f32.mrf.mxu3  ;;  %v4590_v26 = vrot.slane %v4588_v18, 3 }
 0x289   :  { %v3150_v4 = vadd.f32 %v3057_v20, %v2292_v58  ;;  %v3773_v58 = vshll.u32 %v9556_v24, 16 }
 0x28a   :  { %v3423_v44 = vpop.f32.mrf.mxu0  ;;  %6873 = vmatmul.msk.bf16.gmra.mxu2 %vm788_vm6, %v1978_v57  ;;  %v4594_v23 = vor.u32 %v4593_v37, %v4590_v26  ;;  %v5812_v26 = vshrl.u32 %v7392_v52, 16 }
 0x28b   :  { %v9560_v56 = vadd.f32 %v3423_v44, %v3150_v4  ;;  %v3771_v44 = vor.u32 %v3770_v39, %v3766_v60  ;;  %v8515_v60 = vld [vmem:[#allocation2 + $0x3c] sm:$0xff]  }
 0x28c   :  { %v1381_v54 = vpop.f32.mrf.mxu1 }
 0x28d   :  { %10688 = vst [vmem:[#allocation25_spill] sm:$0xff] %v9560_v56  ;;  %6906 = vmatmul.msk.bf16.gmra.mxu3 %vm788_vm6, %v2836_v27  ;;  %v2202_v55 = vpop.f32.mrf.mxu2  ;;  %v1471_v20 = vadd.f32 %v1381_v54, %v1105_v36  ;;  %v3775_v56 = vrot.slane %v3773_v58, 1  ;;  %v4602_v27 = vor.u32 %v4601_v5, %v4598_v63  ;;  %v9573_v36 = vld [vmem:[#allocation2 + $0x38] sm:$0xff]  ;;  %v9577_v58 = vld [vmem:[#allocation2 + $0x30] sm:$0xff]  ;;  %v4605_v63 = vshrl.u32 %v8515_v60, 16 }
 0x28e   :  { %v2293_v57 = vadd.f32 %v2202_v55, %v1470_v40  ;;  %v5814_v55 = vshll.u32 %v7392_v52, 16  ;;  %v4608_v5 = vshll.u32 %v8515_v60, 16 }
 0x28f   :  { %v3776_v13 = vsel %vm1718_vm7, %v3771_v44, %v3775_v56  ;;  %v4603_v54 = vsel %vm491_vm5, %v4594_v23, %v4602_v27  ;;  %v10693_v23 = vld [vmem:[#allocation4_spill] sm:$0xff] }
 0x290   :  { %v3060_v3 = vpop.f32.mrf.mxu3  ;;  %v5816_v37 = vrot.slane %v5814_v55, 1  ;;  %v4607_v55 = vrot.slane %v4605_v63, 3 }
 0x291   :  { %v3151_v4 = vadd.f32 %v3060_v3, %v2293_v57 }
 0x292   :  { %v3426_v34 = vpop.f32.mrf.mxu0 }
 0x293   :  { %v9566_v8 = vadd.f32 %v3426_v34, %v3151_v4  ;;  %v1107_v4 = vadd.f32 %v9413_v21, %v10693_v23 }
 0x294   :  { %v1384_v18 = vpop.f32.mrf.mxu1 }
 0x295   :  { %10690 = vst [vmem:[#allocation27_spill] sm:$0xff] %v9566_v8  ;;  %6939 = vmatmul.msk.bf16.gmra.mxu0 %vm788_vm6, %v9532_v15  ;;  %v2204_v40 = vpop.f32.mrf.mxu2  ;;  %v1472_v48 = vadd.f32 %v1384_v18, %v1106_v17  ;;  %v7872_v15 = vld [vmem:[#allocation2 + $0x30] sm:$0xff]   ;;  %v3777_v17 = vshrl.u32 %v9556_v24, 16  ;;  %v5817_v18 = vor.u32 %v5816_v37, %v5812_v26  ;;  %v1108_v24 = vadd.f32 %v9413_v21, %v10695_v59 }
 0x296   :  { %v2294_v14 = vadd.f32 %v2204_v40, %v1471_v20  ;;  %v5819_v20 = vshll.u32 %v9573_v36, 16  ;;  %v3781_v40 = vshll.u32 %v9577_v58, 16 }
 0x297   :  { %7069 = vmatmul.msk.bf16.vlgmr.msra.gmra.mxu1 %vm788_vm6, %v3776_v13 }
 0x298   :  { %v3062_v34 = vpop.f32.mrf.mxu3  ;;  %v5821_v52 = vrot.slane %v5819_v20, 1 }
 0x299   :  { %v3152_v39 = vadd.f32 %v3062_v34, %v2294_v14 }
 0x29a   :  { %v3428_v57 = vpop.f32.mrf.mxu0  ;;  %7102 = vmatmul.msk.bf16.vlgmr.msra.gmra.mxu2 %vm788_vm6, %v4603_v54  ;;  %v4610_v54 = vrot.slane %v4608_v5, 4  ;;  %v5822_v23 = vsel %vm1718_vm7, %v5817_v18, %v5821_v52  ;;  %v9595_v5 = vld [vmem:[#allocation2 + $0x40] sm:$0xff] }
 0x29b   :  { %v9581_v3 = vadd.f32 %v3428_v57, %v3152_v39  ;;  %v3779_v39 = vor.u32 %v3777_v17, %v3775_v56  ;;  %v3783_v57 = vrot.slane %v3781_v40, 1  ;;  %v7873_v17 = vld [vmem:[#allocation2 + $0x38] sm:$0xff]   ;;  %v5823_v40 = vshrl.u32 %v9573_v36, 16 }
 0x29c   :  { %v1386_v25 = vpop.f32.mrf.mxu1  ;;  %v5827_v18 = vshll.u32 %v9595_v5, 16 }
 0x29d   :  { %10692 = vst [vmem:[#allocation3_spill] sm:$0xff] %v9581_v3  ;;  %7135 = vmatmul.msk.bf16.vlgmr.msra.gmra.mxu3 %vm788_vm6, %v7872_v15  ;;  %v2207_v44 = vpop.f32.mrf.mxu2  ;;  %v1473_v14 = vadd.f32 %v1386_v25, %v1107_v4  ;;  %v4611_v15 = vor.u32 %v4610_v54, %v4607_v55  ;;  %v3784_v37 = vsel %vm1718_vm7, %v3779_v39, %v3783_v57  ;;  %v8517_v4 = vld [vmem:[#allocation2 + $0x44] sm:$0xff]   ;;  %v9599_v25 = vld [vmem:[#allocation2 + $0x38] sm:$0xff]  ;;  %v3785_v39 = vshrl.u32 %v9577_v58, 16 }
 0x29e   :  { %v2295_v13 = vadd.f32 %v2207_v44, %v1472_v48 }
 0x29f   :  { %v4612_v56 = vsel %vm491_vm5, %v4602_v27, %v4611_v15  ;;  %v10697_v27 = vld [vmem:[#allocation6_spill] sm:$0xff] }
 0x2a0   :  { %v3065_v60 = vpop.f32.mrf.mxu3  ;;  %v1109_v54 = vadd.f32 %v9413_v21, %v10697_v27 }
 0x2a1   :  { %v3153_v34 = vadd.f32 %v3065_v60, %v2295_v13  ;;  %v4614_v13 = vshrl.u32 %v8517_v4, 16 }
 0x2a2   :  { %v3431_v3 = vpop.f32.mrf.mxu0 }
 0x2a3   :  { %v9589_v8 = vadd.f32 %v3431_v3, %v3153_v34 }
 0x2a4   :  { %v1389_v48 = vpop.f32.mrf.mxu1 }
 0x2a5   :  { %10694 = vst [vmem:[#allocation4_spill] sm:$0xff] %v9589_v8  ;;  %7296 = vmatmul.msk.bf16.vlgmr.msra.gmra.mxu0 %vm788_vm6, %v5822_v23  ;;  %v2209_v26 = vpop.f32.mrf.mxu2  ;;  %v1474_v63 = vadd.f32 %v1389_v48, %v1108_v24  ;;  %v3789_v23 = vshll.u32 %v9599_v25, 16  ;;  %v5825_v24 = vor.u32 %v5823_v40, %v5821_v52  ;;  %v10699_v8 = vld [vmem:[#allocation7_spill] sm:$0xff] }
 0x2a6   :  { %v2296_v20 = vadd.f32 %v2209_v26, %v1473_v14  ;;  %v4617_v14 = vshll.u32 %v8517_v4, 16  ;;  %v5829_v26 = vrot.slane %v5827_v18, 1  ;;  %v1110_v58 = vadd.f32 %v9413_v21, %v10699_v8 }
 0x2a7   :  { %7070 = vmatmul.msk.bf16.gmra.mxu1 %vm788_vm6, %v3784_v37  ;;  %v4616_v37 = vrot.slane %v4614_v13, 3 }
 0x2a8   :  { %v3067_v44 = vpop.f32.mrf.mxu3  ;;  %v5830_v27 = vsel %vm1718_vm7, %v5825_v24, %v5829_v26  ;;  %v5831_v24 = vshrl.u32 %v9595_v5, 16 }
 0x2a9   :  { %v3154_v3 = vadd.f32 %v3067_v44, %v2296_v20  ;;  %v4619_v20 = vrot.slane %v4617_v14, 4  ;;  %v3787_v44 = vor.u32 %v3785_v39, %v3783_v57  ;;  %v9618_v14 = vld [vmem:[#allocation2 + $0x48] sm:$0xff]  ;;  %v9622_v39 = vld [vmem:[#allocation2 + $0x40] sm:$0xff] }
 0x2aa   :  { %v3433_v59 = vpop.f32.mrf.mxu0  ;;  %7103 = vmatmul.msk.bf16.gmra.mxu2 %vm788_vm6, %v4612_v56 }
 0x2ab   :  { %v9604_v55 = vadd.f32 %v3433_v59, %v3154_v3  ;;  %v3791_v3 = vrot.slane %v3789_v23, 1  ;;  %v7874_v23 = vld [vmem:[#allocation2 + $0x40] sm:$0xff]  }
 0x2ac   :  { %v1391_v34 = vpop.f32.mrf.mxu1 }
 0x2ad   :  { %10696 = vst [vmem:[#allocation5_spill] sm:$0xff] %v9604_v55  ;;  %7136 = vmatmul.msk.bf16.gmra.mxu3 %vm788_vm6, %v7873_v17  ;;  %v2212_v60 = vpop.f32.mrf.mxu2  ;;  %v1475_v48 = vadd.f32 %v1391_v34, %v1109_v54  ;;  %v4620_v17 = vor.u32 %v4619_v20, %v4616_v37  ;;  %v3792_v40 = vsel %vm1718_vm7, %v3787_v44, %v3791_v3  ;;  %v8519_v54 = vld [vmem:[#allocation2 + $0x4c] sm:$0xff]  }
 0x2ae   :  { %v2297_v36 = vadd.f32 %v2212_v60, %v1474_v63  ;;  %v4626_v37 = vshll.u32 %v8519_v54, 16 }
 0x2af   :  { %v4621_v57 = vsel %vm491_vm5, %v4611_v15, %v4620_v17  ;;  %v10701_v15 = vld [vmem:[#allocation8_spill] sm:$0xff] }
 0x2b0   :  { %v3070_v56 = vpop.f32.mrf.mxu3 }
 0x2b1   :  { %v3155_v4 = vadd.f32 %v3070_v56, %v2297_v36  ;;  %v5835_v36 = vshll.u32 %v9618_v14, 16  ;;  %v1111_v56 = vadd.f32 %v9413_v21, %v10701_v15 }
 0x2b2   :  { %v3436_v59 = vpop.f32.mrf.mxu0 }
 0x2b3   :  { %v9612_v55 = vadd.f32 %v3436_v59, %v3155_v4  ;;  %v3793_v59 = vshrl.u32 %v9599_v25, 16 }
 0x2b4   :  { %v1394_v63 = vpop.f32.mrf.mxu1 }
 0x2b5   :  { %10698 = vst [vmem:[#allocation6_spill] sm:$0xff] %v9612_v55  ;;  %7297 = vmatmul.msk.bf16.gmra.mxu0 %vm788_vm6, %v5830_v27  ;;  %v2214_v52 = vpop.f32.mrf.mxu2  ;;  %v1476_v13 = vadd.f32 %v1394_v63, %v1110_v58  ;;  %v3797_v27 = vshll.u32 %v9622_v39, 16  ;;  %v5833_v58 = vor.u32 %v5831_v24, %v5829_v26  ;;  %v10703_v55 = vld [vmem:[#allocation10_spill] sm:$0xff] }
 0x2b6   :  { %v2298_v18 = vadd.f32 %v2214_v52, %v1475_v48  ;;  %v4623_v48 = vshrl.u32 %v8519_v54, 16  ;;  %v5837_v52 = vrot.slane %v5835_v36, 1  ;;  %v1112_v25 = vadd.f32 %v9413_v21, %v10703_v55  ;;  %v7875_v55 = vld [vmem:[#allocation2 + $0x48] sm:$0xff]  }
 0x2b7   :  { %7071 = vmatmul.msk.bf16.gmra.mxu1 %vm788_vm6, %v3792_v40 }
 0x2b8   :  { %v3072_v60 = vpop.f32.mrf.mxu3  ;;  %v4625_v40 = vrot.slane %v4623_v48, 3  ;;  %v5838_v15 = vsel %vm1718_vm7, %v5833_v58, %v5837_v52 }
 0x2b9   :  { %v3156_v34 = vadd.f32 %v3072_v60, %v2298_v18  ;;  %v4628_v18 = vrot.slane %v4626_v37, 4  ;;  %v3795_v60 = vor.u32 %v3793_v59, %v3791_v3  ;;  %v9641_v37 = vld [vmem:[#allocation2 + $0x50] sm:$0xff]  ;;  %v9645_v59 = vld [vmem:[#allocation2 + $0x48] sm:$0xff] }
 0x2ba   :  { %v3438_v8 = vpop.f32.mrf.mxu0  ;;  %7104 = vmatmul.msk.bf16.gmra.mxu2 %vm788_vm6, %v4621_v57  ;;  %v5843_v58 = vshll.u32 %v9641_v37, 16 }
 0x2bb   :  { %v9627_v20 = vadd.f32 %v3438_v8, %v3156_v34  ;;  %v3799_v34 = vrot.slane %v3797_v27, 1  ;;  %v5839_v27 = vshrl.u32 %v9618_v14, 16  ;;  %v3801_v14 = vshrl.u32 %v9622_v39, 16 }
 0x2bc   :  { %v1396_v44 = vpop.f32.mrf.mxu1 }
 0x2bd   :  { %10700 = vst [vmem:[#allocation7_spill] sm:$0xff] %v9627_v20  ;;  %7137 = vmatmul.msk.bf16.gmra.mxu3 %vm788_vm6, %v7874_v23  ;;  %v2217_v4 = vpop.f32.mrf.mxu2  ;;  %v1477_v63 = vadd.f32 %v1396_v44, %v1111_v56  ;;  %v4629_v23 = vor.u32 %v4628_v18, %v4625_v40  ;;  %v3800_v24 = vsel %vm1718_vm7, %v3795_v60, %v3799_v34  ;;  %v8521_v56 = vld [vmem:[#allocation2 + $0x54] sm:$0xff]   ;;  %v10705_v18 = vld [vmem:[#allocation12_spill] sm:$0xff] }
 0x2be   :  { %v2299_v5 = vadd.f32 %v2217_v4, %v1476_v13 }
 0x2bf   :  { %v4630_v3 = vsel %vm491_vm5, %v4620_v17, %v4629_v23  ;;  %v9655_v17 = vld [vmem:[%s10633_s4] ss:$0 sm:$0xff] }
 0x2c0   :  { %v3075_v57 = vpop.f32.mrf.mxu3 }
 0x2c1   :  { %v3157_v54 = vadd.f32 %v3075_v57, %v2299_v5  ;;  %v4632_v5 = vshrl.u32 %v8521_v56, 16  ;;  %v1113_v57 = vadd.f32 %v9655_v17, %v10705_v18 }
 0x2c2   :  { %v3441_v8 = vpop.f32.mrf.mxu0 }
 0x2c3   :  { %v9635_v20 = vadd.f32 %v3441_v8, %v3157_v54  ;;  %v3805_v8 = vshll.u32 %v9645_v59, 16 }
 0x2c4   :  { %v1399_v13 = vpop.f32.mrf.mxu1 }
 0x2c5   :  { %10702 = vst [vmem:[#allocation8_spill] sm:$0xff] %v9635_v20  ;;  %7298 = vmatmul.msk.bf16.gmra.mxu0 %vm788_vm6, %v5838_v15  ;;  %v2219_v26 = vpop.f32.mrf.mxu2  ;;  %v1478_v48 = vadd.f32 %v1399_v13, %v1112_v25  ;;  %v5841_v15 = vor.u32 %v5839_v27, %v5837_v52  ;;  %v5845_v25 = vrot.slane %v5843_v58, 1  ;;  %v10707_v20 = vld [vmem:[#allocation14_spill] sm:$0xff] }
 0x2c6   :  { %v2300_v36 = vadd.f32 %v2219_v26, %v1477_v63  ;;  %v4635_v63 = vshll.u32 %v8521_v56, 16  ;;  %v1114_v39 = vadd.f32 %v9655_v17, %v10707_v20 }
 0x2c7   :  { %7072 = vmatmul.msk.bf16.gmra.mxu1 %vm788_vm6, %v3800_v24  ;;  %v4634_v24 = vrot.slane %v4632_v5, 3  ;;  %v5846_v18 = vsel %vm1718_vm7, %v5841_v15, %v5845_v25  ;;  %v5847_v15 = vshrl.u32 %v9641_v37, 16 }
 0x2c8   :  { %v3077_v4 = vpop.f32.mrf.mxu3 }
 0x2c9   :  { %v3158_v44 = vadd.f32 %v3077_v4, %v2300_v36  ;;  %v4637_v36 = vrot.slane %v4635_v63, 4  ;;  %v3803_v4 = vor.u32 %v3801_v14, %v3799_v34  ;;  %v9669_v63 = vld [vmem:[#allocation2 + $0x58] sm:$0xff]  ;;  %v9673_v14 = vld [vmem:[#allocation2 + $0x50] sm:$0xff] }
 0x2ca   :  { %v3443_v21 = vpop.f32.mrf.mxu0  ;;  %7105 = vmatmul.msk.bf16.gmra.mxu2 %vm788_vm6, %v4630_v3 }
 0x2cb   :  { %v9650_v40 = vadd.f32 %v3443_v21, %v3158_v44  ;;  %v3807_v44 = vrot.slane %v3805_v8, 1  ;;  %v7876_v8 = vld [vmem:[#allocation2 + $0x50] sm:$0xff]  }
 0x2cc   :  { %v1401_v60 = vpop.f32.mrf.mxu1 }
 0x2cd   :  { %10704 = vst [vmem:[#allocation10_spill] sm:$0xff] %v9650_v40  ;;  %7138 = vmatmul.msk.bf16.gmra.mxu3 %vm788_vm6, %v7875_v55  ;;  %v2222_v54 = vpop.f32.mrf.mxu2  ;;  %v1479_v13 = vadd.f32 %v1401_v60, %v1113_v57  ;;  %v4638_v55 = vor.u32 %v4637_v36, %v4634_v24  ;;  %v3808_v27 = vsel %vm1718_vm7, %v3803_v4, %v3807_v44  ;;  %v8523_v57 = vld [vmem:[#allocation2 + $0x5c] sm:$0xff]  }
 0x2ce   :  { %v2301_v26 = vadd.f32 %v2222_v54, %v1478_v48  ;;  %v4644_v24 = vshll.u32 %v8523_v57, 16 }
 0x2cf   :  { %v4639_v34 = vsel %vm491_vm5, %v4629_v23, %v4638_v55  ;;  %v10709_v23 = vld [vmem:[#allocation16_spill] sm:$0xff] }
 0x2d0   :  { %v3080_v3 = vpop.f32.mrf.mxu3 }
 0x2d1   :  { %v3159_v56 = vadd.f32 %v3080_v3, %v2301_v26  ;;  %v5851_v26 = vshll.u32 %v9669_v63, 16  ;;  %v1115_v3 = vadd.f32 %v9655_v17, %v10709_v23 }
 0x2d2   :  { %v3446_v21 = vpop.f32.mrf.mxu0 }
 0x2d3   :  { %v9663_v40 = vadd.f32 %v3446_v21, %v3159_v56  ;;  %v3809_v21 = vshrl.u32 %v9645_v59, 16 }
 0x2d4   :  { %v1404_v48 = vpop.f32.mrf.mxu1 }
 0x2d5   :  { %10706 = vst [vmem:[#allocation12_spill] sm:$0xff] %v9663_v40  ;;  %7299 = vmatmul.msk.bf16.gmra.mxu0 %vm788_vm6, %v5846_v18  ;;  %v2224_v52 = vpop.f32.mrf.mxu2  ;;  %v1480_v5 = vadd.f32 %v1404_v48, %v1114_v39  ;;  %v3813_v18 = vshll.u32 %v9673_v14, 16  ;;  %v5849_v39 = vor.u32 %v5847_v15, %v5845_v25  ;;  %v10711_v40 = vld [vmem:[#allocation18_spill] sm:$0xff] }
 0x2d6   :  { %v2302_v58 = vadd.f32 %v2224_v52, %v1479_v13  ;;  %v4641_v13 = vshrl.u32 %v8523_v57, 16  ;;  %v5853_v52 = vrot.slane %v5851_v26, 1  ;;  %v1116_v59 = vadd.f32 %v9655_v17, %v10711_v40 }
 0x2d7   :  { %7073 = vmatmul.msk.bf16.gmra.mxu1 %vm788_vm6, %v3808_v27 }
 0x2d8   :  { %v3082_v54 = vpop.f32.mrf.mxu3  ;;  %v4643_v27 = vrot.slane %v4641_v13, 3  ;;  %v5854_v23 = vsel %vm1718_vm7, %v5849_v39, %v5853_v52  ;;  %v5855_v39 = vshrl.u32 %v9669_v63, 16 }
 0x2d9   :  { %v3160_v60 = vadd.f32 %v3082_v54, %v2302_v58  ;;  %v4646_v58 = vrot.slane %v4644_v24, 4  ;;  %v3811_v54 = vor.u32 %v3809_v21, %v3807_v44  ;;  %v9692_v24 = vld [vmem:[#allocation2 + $0x60] sm:$0xff]  ;;  %v9696_v21 = vld [vmem:[#allocation2 + $0x58] sm:$0xff] }
 0x2da   :  { %v3448_v20 = vpop.f32.mrf.mxu0  ;;  %7106 = vmatmul.msk.bf16.gmra.mxu2 %vm788_vm6, %v4639_v34 }
 0x2db   :  { %v9678_v36 = vadd.f32 %v3448_v20, %v3160_v60  ;;  %v3815_v60 = vrot.slane %v3813_v18, 1  ;;  %v7877_v18 = vld [vmem:[#allocation2 + $0x58] sm:$0xff]  }
 0x2dc   :  { %v1406_v4 = vpop.f32.mrf.mxu1 }
 0x2dd   :  { %10708 = vst [vmem:[#allocation14_spill] sm:$0xff] %v9678_v36  ;;  %7139 = vmatmul.msk.bf16.gmra.mxu3 %vm788_vm6, %v7876_v8  ;;  %v2227_v56 = vpop.f32.mrf.mxu2  ;;  %v1481_v48 = vadd.f32 %v1406_v4, %v1115_v3  ;;  %v4647_v8 = vor.u32 %v4646_v58, %v4643_v27  ;;  %v3816_v15 = vsel %vm1718_vm7, %v3811_v54, %v3815_v60  ;;  %v8525_v3 = vld [vmem:[#allocation2 + $0x64] sm:$0xff]  }
 0x2de   :  { %v2303_v37 = vadd.f32 %v2227_v56, %v1480_v5  ;;  %v4653_v27 = vshll.u32 %v8525_v3, 16 }
 0x2df   :  { %v4648_v44 = vsel %vm491_vm5, %v4638_v55, %v4647_v8  ;;  %v10713_v55 = vld [vmem:[#allocation20_spill] sm:$0xff] }
 0x2e0   :  { %v3085_v34 = vpop.f32.mrf.mxu3 }
 0x2e1   :  { %v3161_v57 = vadd.f32 %v3085_v34, %v2303_v37  ;;  %v5859_v37 = vshll.u32 %v9692_v24, 16  ;;  %v1117_v34 = vadd.f32 %v9655_v17, %v10713_v55 }
 0x2e2   :  { %v3451_v20 = vpop.f32.mrf.mxu0 }
 0x2e3   :  { %v9686_v36 = vadd.f32 %v3451_v20, %v3161_v57  ;;  %v3817_v20 = vshrl.u32 %v9673_v14, 16 }
 0x2e4   :  { %v1409_v5 = vpop.f32.mrf.mxu1 }
 0x2e5   :  { %10710 = vst [vmem:[#allocation16_spill] sm:$0xff] %v9686_v36  ;;  %7300 = vmatmul.msk.bf16.gmra.mxu0 %vm788_vm6, %v5854_v23  ;;  %v2229_v25 = vpop.f32.mrf.mxu2  ;;  %v1482_v13 = vadd.f32 %v1409_v5, %v1116_v59  ;;  %v3821_v23 = vshll.u32 %v9696_v21, 16  ;;  %v5857_v59 = vor.u32 %v5855_v39, %v5853_v52  ;;  %v10715_v36 = vld [vmem:[#allocation22_spill] sm:$0xff] }
 0x2e6   :  { %v2304_v26 = vadd.f32 %v2229_v25, %v1481_v48  ;;  %v4650_v48 = vshrl.u32 %v8525_v3, 16  ;;  %v5861_v25 = vrot.slane %v5859_v37, 1  ;;  %v1118_v14 = vadd.f32 %v9655_v17, %v10715_v36 }
 0x2e7   :  { %7074 = vmatmul.msk.bf16.gmra.mxu1 %vm788_vm6, %v3816_v15 }
 0x2e8   :  { %v3087_v56 = vpop.f32.mrf.mxu3  ;;  %v4652_v15 = vrot.slane %v4650_v48, 3  ;;  %v5862_v55 = vsel %vm1718_vm7, %v5857_v59, %v5861_v25  ;;  %v5863_v59 = vshrl.u32 %v9692_v24, 16 }
 0x2e9   :  { %v3162_v4 = vadd.f32 %v3087_v56, %v2304_v26  ;;  %v4655_v26 = vrot.slane %v4653_v27, 4  ;;  %v3819_v56 = vor.u32 %v3817_v20, %v3815_v60  ;;  %v9715_v27 = vld [vmem:[#allocation2 + $0x68] sm:$0xff]  ;;  %v9719_v20 = vld [vmem:[#allocation2 + $0x60] sm:$0xff] }
 0x2ea   :  { %v3453_v40 = vpop.f32.mrf.mxu0  ;;  %7107 = vmatmul.msk.bf16.gmra.mxu2 %vm788_vm6, %v4648_v44 }
 0x2eb   :  { %v9701_v58 = vadd.f32 %v3453_v40, %v3162_v4  ;;  %v3823_v4 = vrot.slane %v3821_v23, 1  ;;  %v7878_v23 = vld [vmem:[#allocation2 + $0x60] sm:$0xff]  }
 0x2ec   :  { %v1411_v54 = vpop.f32.mrf.mxu1 }
 0x2ed   :  { %10712 = vst [vmem:[#allocation18_spill] sm:$0xff] %v9701_v58  ;;  %7140 = vmatmul.msk.bf16.gmra.mxu3 %vm788_vm6, %v7877_v18  ;;  %v2232_v57 = vpop.f32.mrf.mxu2  ;;  %v1483_v5 = vadd.f32 %v1411_v54, %v1117_v34  ;;  %v4656_v18 = vor.u32 %v4655_v26, %v4652_v15  ;;  %v3824_v39 = vsel %vm1718_vm7, %v3819_v56, %v3823_v4  ;;  %v8527_v34 = vld [vmem:[#allocation2 + $0x6c] sm:$0xff]  }
 0x2ee   :  { %v2305_v63 = vadd.f32 %v2232_v57, %v1482_v13  ;;  %v4662_v15 = vshll.u32 %v8527_v34, 16 }
 0x2ef   :  { %v4657_v60 = vsel %vm491_vm5, %v4647_v8, %v4656_v18  ;;  %v10717_v8 = vld [vmem:[#allocation24_spill] sm:$0xff] }
 0x2f0   :  { %v3090_v44 = vpop.f32.mrf.mxu3 }
 0x2f1   :  { %v3163_v3 = vadd.f32 %v3090_v44, %v2305_v63  ;;  %v5867_v63 = vshll.u32 %v9715_v27, 16  ;;  %v1119_v44 = vadd.f32 %v9655_v17, %v10717_v8 }
 0x2f2   :  { %v3456_v40 = vpop.f32.mrf.mxu0 }
 0x2f3   :  { %v9709_v58 = vadd.f32 %v3456_v40, %v3163_v3  ;;  %v3825_v40 = vshrl.u32 %v9696_v21, 16 }
 0x2f4   :  { %v1414_v13 = vpop.f32.mrf.mxu1 }
 0x2f5   :  { %10714 = vst [vmem:[#allocation20_spill] sm:$0xff] %v9709_v58  ;;  %7301 = vmatmul.msk.bf16.gmra.mxu0 %vm788_vm6, %v5862_v55  ;;  %v2234_v52 = vpop.f32.mrf.mxu2  ;;  %v1484_v48 = vadd.f32 %v1414_v13, %v1118_v14  ;;  %v3829_v55 = vshll.u32 %v9719_v20, 16  ;;  %v5865_v14 = vor.u32 %v5863_v59, %v5861_v25  ;;  %v10718_v58 = vld [vmem:[#allocation26_spill] sm:$0xff] }
 0x2f6   :  { %v2306_v37 = vadd.f32 %v2234_v52, %v1483_v5  ;;  %v4659_v5 = vshrl.u32 %v8527_v34, 16  ;;  %v5869_v52 = vrot.slane %v5867_v63, 1  ;;  %v1120_v21 = vadd.f32 %v9655_v17, %v10718_v58  ;;  %v7879_v58 = vld [vmem:[#allocation2 + $0x68] sm:$0xff]  }
 0x2f7   :  { %7075 = vmatmul.msk.bf16.gmra.mxu1 %vm788_vm6, %v3824_v39 }
 0x2f8   :  { %v3092_v57 = vpop.f32.mrf.mxu3  ;;  %v4661_v39 = vrot.slane %v4659_v5, 3  ;;  %v5870_v8 = vsel %vm1718_vm7, %v5865_v14, %v5869_v52  ;;  %v5871_v14 = vshrl.u32 %v9715_v27, 16 }
 0x2f9   :  { %v3164_v54 = vadd.f32 %v3092_v57, %v2306_v37  ;;  %v4664_v37 = vrot.slane %v4662_v15, 4  ;;  %v3827_v57 = vor.u32 %v3825_v40, %v3823_v4  ;;  %v7400_v15 = vld [vmem:[#allocation2 + $0x70] sm:$0xff]  ;;  %v9740_v40 = vld [vmem:[#allocation2 + $0x68] sm:$0xff] }
 0x2fa   :  { %v3458_v36 = vpop.f32.mrf.mxu0  ;;  %7108 = vmatmul.msk.bf16.gmra.mxu2 %vm788_vm6, %v4657_v60 }
 0x2fb   :  { %v9724_v26 = vadd.f32 %v3458_v36, %v3164_v54  ;;  %v3831_v54 = vrot.slane %v3829_v55, 1 }
 0x2fc   :  { %v1416_v56 = vpop.f32.mrf.mxu1 }
 0x2fd   :  { %10716 = vst [vmem:[#allocation22_spill] sm:$0xff] %v9724_v26  ;;  %7141 = vmatmul.msk.bf16.gmra.mxu3 %vm788_vm6, %v7878_v23  ;;  %v2237_v3 = vpop.f32.mrf.mxu2  ;;  %v1485_v13 = vadd.f32 %v1416_v56, %v1119_v44  ;;  %v4665_v23 = vor.u32 %v4664_v37, %v4661_v39  ;;  %v3832_v59 = vsel %vm1718_vm7, %v3827_v57, %v3831_v54  ;;  %v8529_v44 = vld [vmem:[#allocation2 + $0x74] sm:$0xff]  }
 0x2fe   :  { %v2307_v24 = vadd.f32 %v2237_v3, %v1484_v48  ;;  %v4668_v39 = vshrl.u32 %v8529_v44, 16 }
 0x2ff   :  { %v4666_v4 = vsel %vm491_vm5, %v4656_v18, %v4665_v23 }
 0x300   :  { %v3095_v60 = vpop.f32.mrf.mxu3 }
 0x301   :  { %v3165_v34 = vadd.f32 %v3095_v60, %v2307_v24  ;;  %v5875_v24 = vshll.u32 %v7400_v15, 16  ;;  %v10720_v60 = vld [vmem:[#allocation28_spill] sm:$0xff] }
 0x302   :  { %v3461_v36 = vpop.f32.mrf.mxu0  ;;  %v1121_v18 = vadd.f32 %v9655_v17, %v10720_v60 }
 0x303   :  { %v9732_v26 = vadd.f32 %v3461_v36, %v3165_v34  ;;  %v3833_v36 = vshrl.u32 %v9719_v20, 16 }
 0x304   :  { %v1419_v48 = vpop.f32.mrf.mxu1 }
 0x305   :  { %7302 = vmatmul.msk.bf16.gmra.mxu0 %vm788_vm6, %v5870_v8  ;;  %v2239_v25 = vpop.f32.mrf.mxu2  ;;  %v1486_v5 = vadd.f32 %v1419_v48, %v1120_v21  ;;  %v3837_v8 = vshll.u32 %v9740_v40, 16  ;;  %v5873_v21 = vor.u32 %v5871_v14, %v5869_v52  ;;  %v9756_v14 = vld [vmem:[#allocation2 + $0x78] sm:$0xff] }
 0x306   :  { %v2308_v63 = vadd.f32 %v2239_v25, %v1485_v13  ;;  %v4671_v13 = vshll.u32 %v8529_v44, 16  ;;  %v5877_v25 = vrot.slane %v5875_v24, 1 }
 0x307   :  { %7076 = vmatmul.msk.bf16.gmra.mxu1 %vm788_vm6, %v3832_v59  ;;  %v4670_v59 = vrot.slane %v4668_v39, 3  ;;  %v8531_v39 = vld [vmem:[#allocation2 + $0x7c] sm:$0xff]  }
 0x308   :  { %v3097_v3 = vpop.f32.mrf.mxu3  ;;  %v5878_v17 = vsel %vm1718_vm7, %v5873_v21, %v5877_v25  ;;  %v4677_v21 = vshrl.u32 %v8531_v39, 16 }
 0x309   :  { %v3166_v56 = vadd.f32 %v3097_v3, %v2308_v63  ;;  %v4673_v63 = vrot.slane %v4671_v13, 4  ;;  %v3835_v3 = vor.u32 %v3833_v36, %v3831_v54  ;;  %v5879_v36 = vshrl.u32 %v7400_v15, 16 }
 0x30a   :  { %v3463_v55 = vpop.f32.mrf.mxu0  ;;  %7109 = vmatmul.msk.bf16.gmra.mxu2 %vm788_vm6, %v4666_v4  ;;  %v4679_v15 = vrot.slane %v4677_v21, 3  ;;  %v9774_v21 = vld [vmem:[#allocation2 + $0x80] sm:$0xff] }
 0x30b   :  { %v9744_v37 = vadd.f32 %v3463_v55, %v3166_v56  ;;  %v3839_v56 = vrot.slane %v3837_v8, 1  ;;  %v5883_v8 = vshll.u32 %v9756_v14, 16 }
 0x30c   :  { %v1421_v57 = vpop.f32.mrf.mxu1 }
 0x30d   :  { %10719 = vst [vmem:[#allocation24_spill] sm:$0xff] %v9744_v37  ;;  %7142 = vmatmul.msk.bf16.gmra.mxu3 %vm788_vm6, %v7879_v58  ;;  %v2242_v34 = vpop.f32.mrf.mxu2  ;;  %v1487_v27 = vadd.f32 %v1421_v57, %v1121_v18  ;;  %v4674_v58 = vor.u32 %v4673_v63, %v4670_v59  ;;  %v3840_v52 = vsel %vm1718_vm7, %v3835_v3, %v3839_v56  ;;  %v9760_v18 = vld [vmem:[#allocation2 + $0x70] sm:$0xff] }
 0x30e   :  { %v2309_v48 = vadd.f32 %v2242_v34, %v1486_v5  ;;  %v7880_v57 = vld [vmem:[#allocation2 + $0x70] sm:$0xff]   ;;  %v5881_v3 = vor.u32 %v5879_v36, %v5877_v25 }
 0x30f   :  { %v4675_v24 = vsel %vm491_vm5, %v4665_v23, %v4674_v58 }
 0x310   :  { %v3100_v4 = vpop.f32.mrf.mxu3 }
 0x311   :  { %v3167_v44 = vadd.f32 %v3100_v4, %v2309_v48  ;;  %v4680_v48 = vshll.u32 %v8531_v39, 16  ;;  %v3841_v4 = vshrl.u32 %v9740_v40, 16 }
 0x312   :  { %v3466_v55 = vpop.f32.mrf.mxu0 }
 0x313   :  { %v9752_v60 = vadd.f32 %v3466_v55, %v3167_v44  ;;  %v3845_v44 = vshll.u32 %v9760_v18, 16  ;;  %v5885_v55 = vrot.slane %v5883_v8, 1 }
 0x314   :  { %v4133_v37 = vpop.f32.mrf.mxu1 }
 0x315   :  { %7303 = vmatmul.msk.bf16.gmra.mxu0 %vm788_vm6, %v5878_v17  ;;  %v2244_v20 = vpop.f32.mrf.mxu2  ;;  %v4293_v23 = vadd.f32 %v4133_v37, %v9217_v53  ;;  %v3847_v39 = vrot.slane %v3845_v44, 1  ;;  %v5886_v53 = vsel %vm1718_vm7, %v5881_v3, %v5885_v55  ;;  %v7881_v44 = vld [vmem:[#allocation2 + $0x78] sm:$0xff]   ;;  %v5887_v3 = vshrl.u32 %v9756_v14, 16 }
 0x316   :  { %v2310_v5 = vadd.f32 %v2244_v20, %v1487_v27  ;;  %v4682_v20 = vrot.slane %v4680_v48, 4 }
 0x317   :  { %7077 = vmatmul.msk.bf16.gmra.mxu1 %vm788_vm6, %v3840_v52 }
 0x318   :  { %v3102_v54 = vpop.f32.mrf.mxu3 }
 0x319   :  { %v3168_v13 = vadd.f32 %v3102_v54, %v2310_v5 }
 0x31a   :  { %v3468_v34 = vpop.f32.mrf.mxu0  ;;  %7110 = vmatmul.msk.bf16.gmra.mxu2 %vm788_vm6, %v4675_v24  ;;  %v3843_v24 = vor.u32 %v3841_v4, %v3839_v56 }
 0x31b   :  { %v9764_v27 = vadd.f32 %v3468_v34, %v3168_v13  ;;  %v4683_v13 = vor.u32 %v4682_v20, %v4679_v15 }
 0x31c   :  { %v4135_v63 = vpop.f32.mrf.mxu1  ;;  %v3848_v36 = vsel %vm1718_vm7, %v3843_v24, %v3847_v39 }
 0x31d   :  { %7143 = vmatmul.msk.bf16.gmra.mxu3 %vm788_vm6, %v7880_v57  ;;  %v4991_v59 = vpop.f32.mrf.mxu2  ;;  %v4294_v34 = vadd.f32 %v4135_v63, %v9226_v11  ;;  %v4684_v48 = vsel %vm491_vm5, %v4674_v58, %v4683_v13  ;;  %v9782_v63 = vld [vmem:[#allocation2 + $0x78] sm:$0xff]  ;;  %v5891_v58 = vshll.u32 %v9774_v21, 16 }
 0x31e   :  { %v5151_v17 = vadd.f32 %v4991_v59, %v4293_v23  ;;  %v8533_v23 = vld [vmem:[#allocation2 + $0x84] sm:$0xff]  }
 0x31f   :  { %v4686_v15 = vshrl.u32 %v8533_v23, 16  ;;  %v4689_v20 = vshll.u32 %v8533_v23, 16 }
 0x320   :  { %v5357_v52 = vpop.f32.mrf.mxu3 }
 0x321   :  { %v5517_v5 = vadd.f32 %v5357_v52, %v5151_v17 }
 0x322   :  { %v6179_v54 = vpop.f32.mrf.mxu0 }
 0x323   :  { %v6339_v37 = vadd.f32 %v6179_v54, %v5517_v5 }
 0x324   :  { %v4138_v25 = vpop.f32.mrf.mxu1 }
 0x325   :  { %7304 = vmatmul.msk.bf16.gmra.mxu0 %vm788_vm6, %v5886_v53  ;;  %v6403_v40 = vmax.f32 %v6339_v37, 0.0  ;;  %v4993_v57 = vpop.f32.mrf.mxu2  ;;  %v4295_v52 = vadd.f32 %v4138_v25, %v9231_v0  ;;  %v3849_v53 = vshrl.u32 %v9760_v18, 16  ;;  %v3853_v37 = vshll.u32 %v9782_v63, 16 }
 0x326   :  { %v5152_v8 = vadd.f32 %v4993_v57, %v4294_v34  ;;  %v5889_v34 = vor.u32 %v5887_v3, %v5885_v55 }
 0x327   :  { %v6467_v56 = vpack.c.bf16 %v6403_v40, %v6403_v40  ;;  %7078 = vmatmul.msk.bf16.gmra.mxu1 %vm788_vm6, %v3848_v36  ;;  %v5893_v40 = vrot.slane %v5891_v58, 1  ;;  %v4688_v36 = vrot.slane %v4686_v15, 3  ;;  %v3851_v25 = vor.u32 %v3849_v53, %v3847_v39  ;;  %v9799_v15 = vld [vmem:[#allocation2 + $0x88] sm:$0xff] }
 0x328   :  { %v5359_v59 = vpop.f32.mrf.mxu3 }
 0x329   :  { %6532 = vst.msk [vmem:[%s10634_s5] sm:$0xf] %vm6531_vm8, %v6467_v56  ;;  %v5518_v11 = vadd.f32 %v5359_v59, %v5152_v8  ;;  %v4691_v8 = vrot.slane %v4689_v20, 4  ;;  %v5894_v18 = vsel %vm1718_vm7, %v5889_v34, %v5893_v40  ;;  %v5899_v34 = vshll.u32 %v9799_v15, 16 }
 0x32a   :  { %v6181_v4 = vpop.f32.mrf.mxu0  ;;  %7111 = vmatmul.msk.bf16.gmra.mxu2 %vm788_vm6, %v4684_v48  ;;  %v3855_v48 = vrot.slane %v3853_v37, 1  ;;  %v5895_v37 = vshrl.u32 %v9774_v21, 16 }
 0x32b   :  { %v6340_v17 = vadd.f32 %v6181_v4, %v5518_v11  ;;  %v4692_v11 = vor.u32 %v4691_v8, %v4688_v36 }
 0x32c   :  { %v4140_v54 = vpop.f32.mrf.mxu1  ;;  %v3856_v58 = vsel %vm1718_vm7, %v3851_v25, %v3855_v48 }
 0x32d   :  { %v6404_v5 = vmax.f32 %v6340_v17, 0.0  ;;  %7144 = vmatmul.msk.bf16.gmra.mxu3 %vm788_vm6, %v7881_v44  ;;  %v4996_v24 = vpop.f32.mrf.mxu2  ;;  %v4296_v55 = vadd.f32 %v4140_v54, %v9240_v42  ;;  %v4693_v39 = vsel %vm491_vm5, %v4683_v13, %v4692_v11  ;;  %v10721_v54 = vmov 0   ;;  %v7882_v13 = vld [vmem:[#allocation2 + $0x80] sm:$0xff]  }
 0x32e   :  { %v5153_v57 = vadd.f32 %v4996_v24, %v4295_v52  ;;  %v8535_v52 = vld [vmem:[#allocation2 + $0x8c] sm:$0xff]   ;;  %v9807_v24 = vld [vmem:[#allocation2 + $0x80] sm:$0xff] }
 0x32f   :  { %v6468_v14 = vpack.c.bf16 %v6404_v5, %v6404_v5  ;;  %v4698_v36 = vshll.u32 %v8535_v52, 16 }
 0x330   :  { %v5362_v56 = vpop.f32.mrf.mxu3 }
 0x331   :  { %6533 = vst.msk [vmem:[%s10634_s5 + $0x4] sm:$0xf] %vm6531_vm8, %v6468_v14  ;;  %v5519_v0 = vadd.f32 %v5362_v56, %v5153_v57  ;;  %v4695_v14 = vshrl.u32 %v8535_v52, 16 }
 0x332   :  { %v6184_v23 = vpop.f32.mrf.mxu0 }
 0x333   :  { %v6341_v59 = vadd.f32 %v6184_v23, %v5519_v0  ;;  %v3857_v23 = vshrl.u32 %v9782_v63, 16 }
 0x334   :  { %v4143_v3 = vpop.f32.mrf.mxu1 }
 0x335   :  { %7305 = vmatmul.msk.bf16.gmra.mxu0 %vm788_vm6, %v5894_v18  ;;  %v6405_v4 = vmax.f32 %v6341_v59, 0.0  ;;  %v4998_v44 = vpop.f32.mrf.mxu2  ;;  %v4297_v8 = vadd.f32 %v4143_v3, %v9245_v10  ;;  %v3861_v18 = vshll.u32 %v9807_v24, 16  ;;  %v5897_v59 = vor.u32 %v5895_v37, %v5893_v40 }
 0x336   :  { %v5154_v17 = vadd.f32 %v4998_v44, %v4296_v55  ;;  %v5901_v55 = vrot.slane %v5899_v34, 1  ;;  %v4697_v44 = vrot.slane %v4695_v14, 3  ;;  %v3859_v3 = vor.u32 %v3857_v23, %v3855_v48  ;;  %v9834_v34 = vld [vmem:[#allocation2 + $0x90] sm:$0xff] }
 0x337   :  { %v6469_v20 = vpack.c.bf16 %v6405_v4, %v6405_v4  ;;  %7079 = vmatmul.msk.bf16.gmra.mxu1 %vm788_vm6, %v3856_v58  ;;  %v4700_v58 = vrot.slane %v4698_v36, 4  ;;  %v8537_v36 = vld [vmem:[#allocation2 + $0x94] sm:$0xff]   ;;  %v5903_v23 = vshrl.u32 %v9799_v15, 16 }
 0x338   :  { %v5364_v5 = vpop.f32.mrf.mxu3  ;;  %v5902_v40 = vsel %vm1718_vm7, %v5897_v59, %v5901_v55  ;;  %v4704_v59 = vshrl.u32 %v8537_v36, 16 }
 0x339   :  { %6534 = vst.msk [vmem:[%s10634_s5 + $0x8] sm:$0xf] %vm6531_vm8, %v6469_v20  ;;  %v5520_v42 = vadd.f32 %v5364_v5, %v5154_v17  ;;  %v3863_v20 = vrot.slane %v3861_v18, 1  ;;  %v4701_v52 = vor.u32 %v4700_v58, %v4697_v44 }
 0x33a   :  { %6596 = vst.msk [vmem:[%s10634_s5 + $0x8] sm:$0xf] %vm6531_vm8, %v10721_v54  ;;  %v6186_v53 = vpop.f32.mrf.mxu0  ;;  %7112 = vmatmul.msk.bf16.gmra.mxu2 %vm788_vm6, %v4693_v39 }
 0x33b   :  { %v6342_v57 = vadd.f32 %v6186_v53, %v5520_v42  ;;  %v3864_v48 = vsel %vm1718_vm7, %v3859_v3, %v3863_v20  ;;  %v4702_v14 = vsel %vm491_vm5, %v4692_v11, %v4701_v52  ;;  %v5907_v11 = vshll.u32 %v9834_v34, 16 }
 0x33c   :  { %v4145_v25 = vpop.f32.mrf.mxu1 }
 0x33d   :  { %v6406_v56 = vmax.f32 %v6342_v57, 0.0  ;;  %7145 = vmatmul.msk.bf16.gmra.mxu3 %vm788_vm6, %v7882_v13  ;;  %v5001_v0 = vpop.f32.mrf.mxu2  ;;  %v4298_v5 = vadd.f32 %v4145_v25, %v9254_v19  ;;  %v7883_v25 = vld [vmem:[#allocation2 + $0x88] sm:$0xff]  }
 0x33e   :  { %v5155_v4 = vadd.f32 %v5001_v0, %v4297_v8 }
 0x33f   :  { %v6470_v21 = vpack.c.bf16 %v6406_v56, %v6406_v56  ;;  %v9842_v56 = vld [vmem:[#allocation2 + $0x88] sm:$0xff] }
 0x340   :  { %v5367_v17 = vpop.f32.mrf.mxu3  ;;  %v3869_v3 = vshll.u32 %v9842_v56, 16 }
 0x341   :  { %6535 = vst.msk [vmem:[%s10634_s5 + $0xc] sm:$0xf] %vm6531_vm8, %v6470_v21  ;;  %v5521_v10 = vadd.f32 %v5367_v17, %v5155_v4  ;;  %v4707_v4 = vshll.u32 %v8537_v36, 16 }
 0x342   :  { %6597 = vst.msk [vmem:[%s10634_s5 + $0xc] sm:$0xf] %vm6531_vm8, %v10721_v54  ;;  %v6189_v63 = vpop.f32.mrf.mxu0 }
 0x343   :  { %v6343_v39 = vadd.f32 %v6189_v63, %v5521_v10  ;;  %v3865_v10 = vshrl.u32 %v9807_v24, 16  ;;  %v5905_v63 = vor.u32 %v5903_v23, %v5901_v55  ;;  %v9859_v23 = vld [vmem:[#allocation2 + $0x98] sm:$0xff] }
 0x344   :  { %v4148_v13 = vpop.f32.mrf.mxu1 }
 0x345   :  { %7306 = vmatmul.msk.bf16.gmra.mxu0 %vm788_vm6, %v5902_v40  ;;  %v6407_v42 = vmax.f32 %v6343_v39, 0.0  ;;  %v5003_v53 = vpop.f32.mrf.mxu2  ;;  %v4299_v21 = vadd.f32 %v4148_v13, %v9259_v7  ;;  %v5909_v40 = vrot.slane %v5907_v11, 1  ;;  %v3867_v13 = vor.u32 %v3865_v10, %v3863_v20 }
 0x346   :  { %v5156_v37 = vadd.f32 %v5003_v53, %v4298_v5  ;;  %v4706_v5 = vrot.slane %v4704_v59, 3 }
 0x347   :  { %v6471_v57 = vpack.c.bf16 %v6407_v42, %v6407_v42  ;;  %7080 = vmatmul.msk.bf16.gmra.mxu1 %vm788_vm6, %v3864_v48  ;;  %v4709_v42 = vrot.slane %v4707_v4, 4  ;;  %v3871_v48 = vrot.slane %v3869_v3, 1  ;;  %v5910_v24 = vsel %vm1718_vm7, %v5905_v63, %v5909_v40  ;;  %v9867_v4 = vld [vmem:[#allocation2 + $0x90] sm:$0xff] }
 0x348   :  { %v5369_v8 = vpop.f32.mrf.mxu3 }
 0x349   :  { %6536 = vst.msk [vmem:[%s10634_s5 + $0x10] sm:$0xf] %vm6531_vm8, %v6471_v57  ;;  %v5522_v19 = vadd.f32 %v5369_v8, %v5156_v37 }
 0x34a   :  { %v6191_v0 = vpop.f32.mrf.mxu0  ;;  %7113 = vmatmul.msk.bf16.gmra.mxu2 %vm788_vm6, %v4702_v14  ;;  %v4710_v14 = vor.u32 %v4709_v42, %v4706_v5  ;;  %v3873_v42 = vshrl.u32 %v9842_v56, 16 }
 0x34b   :  { %v6344_v18 = vadd.f32 %v6191_v0, %v5522_v19  ;;  %v3872_v0 = vsel %vm1718_vm7, %v3867_v13, %v3871_v48 }
 0x34c   :  { %v4150_v17 = vpop.f32.mrf.mxu1  ;;  %v4711_v20 = vsel %vm491_vm5, %v4701_v52, %v4710_v14  ;;  %v7884_v52 = vld [vmem:[#allocation2 + $0x90] sm:$0xff]  }
 0x34d   :  { %v6408_v44 = vmax.f32 %v6344_v18, 0.0  ;;  %7146 = vmatmul.msk.bf16.gmra.mxu3 %vm788_vm6, %v7883_v25  ;;  %v5006_v58 = vpop.f32.mrf.mxu2  ;;  %v4300_v55 = vadd.f32 %v4150_v17, %v9268_v47  ;;  %v8539_v18 = vld [vmem:[#allocation2 + $0x9c] sm:$0xff]  }
 0x34e   :  { %v5157_v39 = vadd.f32 %v5006_v58, %v4299_v21  ;;  %v5915_v58 = vshll.u32 %v9859_v23, 16  ;;  %v4713_v10 = vshrl.u32 %v8539_v18, 16  ;;  %v4716_v3 = vshll.u32 %v8539_v18, 16 }
 0x34f   :  { %v6472_v15 = vpack.c.bf16 %v6408_v44, %v6408_v44  ;;  %v5911_v44 = vshrl.u32 %v9834_v34, 16 }
 0x350   :  { %v5372_v53 = vpop.f32.mrf.mxu3  ;;  %v5917_v13 = vrot.slane %v5915_v58, 1 }
 0x351   :  { %6537 = vst.msk [vmem:[%s10634_s5 + $0x14] sm:$0xf] %vm6531_vm8, %v6472_v15  ;;  %v5523_v7 = vadd.f32 %v5372_v53, %v5157_v39  ;;  %v3877_v53 = vshll.u32 %v9867_v4, 16 }
 0x352   :  { %v6194_v37 = vpop.f32.mrf.mxu0 }
 0x353   :  { %v6345_v57 = vadd.f32 %v6194_v37, %v5523_v7  ;;  %v5913_v7 = vor.u32 %v5911_v44, %v5909_v40  ;;  %v8541_v44 = vld [vmem:[#allocation2 + $0xa4] sm:$0xff]  }
 0x354   :  { %v4153_v19 = vpop.f32.mrf.mxu1 }
 0x355   :  { %7307 = vmatmul.msk.bf16.gmra.mxu0 %vm788_vm6, %v5910_v24  ;;  %v6409_v36 = vmax.f32 %v6345_v57, 0.0  ;;  %v5008_v8 = vpop.f32.mrf.mxu2  ;;  %v4301_v63 = vadd.f32 %v4153_v19, %v9273_v38  ;;  %v4715_v24 = vrot.slane %v4713_v10, 3  ;;  %v4718_v57 = vrot.slane %v4716_v3, 4  ;;  %v7885_v3 = vld [vmem:[#allocation2 + $0x98] sm:$0xff]  }
 0x356   :  { %v5158_v25 = vadd.f32 %v5008_v8, %v4300_v55  ;;  %v3879_v8 = vrot.slane %v3877_v53, 1  ;;  %v5918_v40 = vsel %vm1718_vm7, %v5913_v7, %v5917_v13 }
 0x357   :  { %v6473_v11 = vpack.c.bf16 %v6409_v36, %v6409_v36  ;;  %7081 = vmatmul.msk.bf16.gmra.mxu1 %vm788_vm6, %v3872_v0  ;;  %v3875_v36 = vor.u32 %v3873_v42, %v3871_v48  ;;  %v4719_v0 = vor.u32 %v4718_v57, %v4715_v24 }
 0x358   :  { %v5374_v59 = vpop.f32.mrf.mxu3 }
 0x359   :  { %6538 = vst.msk [vmem:[%s10634_s5 + $0x18] sm:$0xf] %vm6531_vm8, %v6473_v11  ;;  %v5524_v47 = vadd.f32 %v5374_v59, %v5158_v25  ;;  %v3880_v48 = vsel %vm1718_vm7, %v3875_v36, %v3879_v8 }
 0x35a   :  { %6598 = vst.msk [vmem:[%s10634_s5 + $0x18] sm:$0xf] %vm6531_vm8, %v10721_v54  ;;  %v6196_v21 = vpop.f32.mrf.mxu0  ;;  %7114 = vmatmul.msk.bf16.gmra.mxu2 %vm788_vm6, %v4711_v20 }
 0x35b   :  { %v6346_v17 = vadd.f32 %v6196_v21, %v5524_v47  ;;  %v9894_v47 = vld [vmem:[#allocation2 + $0xa0] sm:$0xff] }
 0x35c   :  { %v4155_v5 = vpop.f32.mrf.mxu1 }
 0x35d   :  { %v6410_v39 = vmax.f32 %v6346_v17, 0.0  ;;  %7147 = vmatmul.msk.bf16.gmra.mxu3 %vm788_vm6, %v7884_v52  ;;  %v5011_v15 = vpop.f32.mrf.mxu2  ;;  %v4302_v25 = vadd.f32 %v4155_v5, %v9282_v45  ;;  %v4720_v52 = vsel %vm491_vm5, %v4710_v14, %v4719_v0  ;;  %v9902_v17 = vld [vmem:[#allocation2 + $0x98] sm:$0xff]  ;;  %v5923_v14 = vshll.u32 %v9894_v47, 16 }
 0x35e   :  { %v5159_v37 = vadd.f32 %v5011_v15, %v4301_v63  ;;  %v5919_v63 = vshrl.u32 %v9859_v23, 16  ;;  %v4722_v15 = vshrl.u32 %v8541_v44, 16  ;;  %v4725_v5 = vshll.u32 %v8541_v44, 16 }
 0x35f   :  { %v6474_v34 = vpack.c.bf16 %v6410_v39, %v6410_v39  ;;  %v3885_v24 = vshll.u32 %v9902_v17, 16 }
 0x360   :  { %v5377_v55 = vpop.f32.mrf.mxu3  ;;  %v5921_v57 = vor.u32 %v5919_v63, %v5917_v13  ;;  %v4724_v36 = vrot.slane %v4722_v15, 3  ;;  %v9927_v63 = vld [vmem:[#allocation2 + $0xa0] sm:$0xff] }
 0x361   :  { %6539 = vst.msk [vmem:[%s10634_s5 + $0x1c] sm:$0xf] %vm6531_vm8, %v6474_v34  ;;  %v5525_v38 = vadd.f32 %v5377_v55, %v5159_v37  ;;  %v3881_v34 = vshrl.u32 %v9867_v4, 16  ;;  %v5925_v55 = vrot.slane %v5923_v14, 1 }
 0x362   :  { %6599 = vst.msk [vmem:[%s10634_s5 + $0x1c] sm:$0xf] %vm6531_vm8, %v10721_v54  ;;  %v6199_v56 = vpop.f32.mrf.mxu0 }
 0x363   :  { %v6347_v19 = vadd.f32 %v6199_v56, %v5525_v38  ;;  %v4727_v56 = vrot.slane %v4725_v5, 4  ;;  %v5926_v4 = vsel %vm1718_vm7, %v5921_v57, %v5925_v55  ;;  %v3889_v57 = vshrl.u32 %v9902_v17, 16 }
 0x364   :  { %v4158_v18 = vpop.f32.mrf.mxu1 }
 0x365   :  { %7308 = vmatmul.msk.bf16.gmra.mxu0 %vm788_vm6, %v5918_v40  ;;  %v6411_v11 = vmax.f32 %v6347_v19, 0.0  ;;  %v5013_v20 = vpop.f32.mrf.mxu2  ;;  %v4303_v42 = vadd.f32 %v4158_v18, %v9287_v31  ;;  %v3883_v19 = vor.u32 %v3881_v34, %v3879_v8  ;;  %v4728_v18 = vor.u32 %v4727_v56, %v4724_v36 }
 0x366   :  { %v5160_v59 = vadd.f32 %v5013_v20, %v4302_v25  ;;  %v3887_v25 = vrot.slane %v3885_v24, 1 }
 0x367   :  { %v6475_v21 = vpack.c.bf16 %v6411_v11, %v6411_v11  ;;  %7082 = vmatmul.msk.bf16.gmra.mxu1 %vm788_vm6, %v3880_v48  ;;  %v4729_v8 = vsel %vm491_vm5, %v4719_v0, %v4728_v18  ;;  %v7886_v0 = vld [vmem:[#allocation2 + $0xa0] sm:$0xff]  }
 0x368   :  { %v5379_v58 = vpop.f32.mrf.mxu3 }
 0x369   :  { %6540 = vst.msk [vmem:[%s10634_s5 + $0x20] sm:$0xf] %vm6531_vm8, %v6475_v21  ;;  %v5526_v45 = vadd.f32 %v5379_v58, %v5160_v59  ;;  %v9919_v58 = vld [vmem:[#allocation2 + $0xa8] sm:$0xff] }
 0x36a   :  { %v6201_v10 = vpop.f32.mrf.mxu0  ;;  %7115 = vmatmul.msk.bf16.gmra.mxu2 %vm788_vm6, %v4720_v52  ;;  %v3888_v52 = vsel %vm1718_vm7, %v3883_v19, %v3887_v25  ;;  %v5931_v15 = vshll.u32 %v9919_v58, 16 }
 0x36b   :  { %v6348_v39 = vadd.f32 %v6201_v10, %v5526_v45  ;;  %v8543_v10 = vld [vmem:[#allocation2 + $0xac] sm:$0xff]  }
 0x36c   :  { %v4160_v37 = vpop.f32.mrf.mxu1  ;;  %v5933_v36 = vrot.slane %v5931_v15, 1  ;;  %v5935_v15 = vshrl.u32 %v9919_v58, 16 }
 0x36d   :  { %v6412_v53 = vmax.f32 %v6348_v39, 0.0  ;;  %7148 = vmatmul.msk.bf16.gmra.mxu3 %vm788_vm6, %v7885_v3  ;;  %v5016_v7 = vpop.f32.mrf.mxu2  ;;  %v4304_v13 = vadd.f32 %v4160_v37, %v9296_v49  ;;  %v5927_v39 = vshrl.u32 %v9894_v47, 16 }
 0x36e   :  { %v5161_v38 = vadd.f32 %v5016_v7, %v4303_v42  ;;  %v4731_v42 = vshrl.u32 %v8543_v10, 16 }
 0x36f   :  { %v6476_v23 = vpack.c.bf16 %v6412_v53, %v6412_v53  ;;  %v4734_v53 = vshll.u32 %v8543_v10, 16 }
 0x370   :  { %v5382_v40 = vpop.f32.mrf.mxu3 }
 0x371   :  { %6541 = vst.msk [vmem:[%s10634_s5 + $0x24] sm:$0xf] %vm6531_vm8, %v6476_v23  ;;  %v5527_v31 = vadd.f32 %v5382_v40, %v5161_v38  ;;  %v3893_v38 = vshll.u32 %v9927_v63, 16  ;;  %v5929_v23 = vor.u32 %v5927_v39, %v5925_v55  ;;  %v4733_v40 = vrot.slane %v4731_v42, 3  ;;  %v7887_v39 = vld [vmem:[#allocation2 + $0xa8] sm:$0xff]  }
 0x372   :  { %v6204_v11 = vpop.f32.mrf.mxu0 }
 0x373   :  { %v6349_v20 = vadd.f32 %v6204_v11, %v5527_v31  ;;  %v4736_v31 = vrot.slane %v4734_v53, 4  ;;  %v3891_v11 = vor.u32 %v3889_v57, %v3887_v25  ;;  %v5934_v55 = vsel %vm1718_vm7, %v5929_v23, %v5933_v36 }
 0x374   :  { %v4163_v21 = vpop.f32.mrf.mxu1  ;;  %v3897_v57 = vshrl.u32 %v9927_v63, 16  ;;  %v5937_v23 = vor.u32 %v5935_v15, %v5933_v36 }
 0x375   :  { %7309 = vmatmul.msk.bf16.gmra.mxu0 %vm788_vm6, %v5926_v4  ;;  %v6413_v48 = vmax.f32 %v6349_v20, 0.0  ;;  %v5018_v59 = vpop.f32.mrf.mxu2  ;;  %v4305_v7 = vadd.f32 %v4163_v21, %v9301_v30  ;;  %v3895_v4 = vrot.slane %v3893_v38, 1 }
 0x376   :  { %v5162_v44 = vadd.f32 %v5018_v59, %v4304_v13  ;;  %v4737_v13 = vor.u32 %v4736_v31, %v4733_v40 }
 0x377   :  { %v6477_v45 = vpack.c.bf16 %v6413_v48, %v6413_v48  ;;  %7083 = vmatmul.msk.bf16.gmra.mxu1 %vm788_vm6, %v3888_v52  ;;  %v3896_v25 = vsel %vm1718_vm7, %v3891_v11, %v3895_v4 }
 0x378   :  { %v5384_v3 = vpop.f32.mrf.mxu3  ;;  %v4738_v10 = vsel %vm491_vm5, %v4728_v18, %v4737_v13 }
 0x379   :  { %6542 = vst.msk [vmem:[%s10634_s5 + $0x28] sm:$0xf] %vm6531_vm8, %v6477_v45  ;;  %v5528_v49 = vadd.f32 %v5384_v3, %v5162_v44  ;;  %v9954_v45 = vld [vmem:[#allocation2 + $0xb0] sm:$0xff] }
 0x37a   :  { %6600 = vst.msk [vmem:[%s10634_s5 + $0x28] sm:$0xf] %vm6531_vm8, %v10721_v54  ;;  %v6206_v14 = vpop.f32.mrf.mxu0  ;;  %7116 = vmatmul.msk.bf16.gmra.mxu2 %vm788_vm6, %v4729_v8  ;;  %v8545_v3 = vld [vmem:[#allocation2 + $0xb4] sm:$0xff]   ;;  %v5939_v18 = vshll.u32 %v9954_v45, 16 }
 0x37b   :  { %v6350_v5 = vadd.f32 %v6206_v14, %v5528_v49  ;;  %v9962_v14 = vld [vmem:[#allocation2 + $0xa8] sm:$0xff]  ;;  %v4740_v42 = vshrl.u32 %v8545_v3, 16  ;;  %v4743_v53 = vshll.u32 %v8545_v3, 16 }
 0x37c   :  { %v4165_v24 = vpop.f32.mrf.mxu1  ;;  %v3901_v38 = vshll.u32 %v9962_v14, 16 }
 0x37d   :  { %v6414_v37 = vmax.f32 %v6350_v5, 0.0  ;;  %7149 = vmatmul.msk.bf16.gmra.mxu3 %vm788_vm6, %v7886_v0  ;;  %v5021_v34 = vpop.f32.mrf.mxu2  ;;  %v4306_v48 = vadd.f32 %v4165_v24, %v9310_v22  ;;  %v4742_v40 = vrot.slane %v4740_v42, 3  ;;  %v4745_v31 = vrot.slane %v4743_v53, 4 }
 0x37e   :  { %v5163_v56 = vadd.f32 %v5021_v34, %v4305_v7  ;;  %v3903_v11 = vrot.slane %v3901_v38, 1 }
 0x37f   :  { %v6478_v47 = vpack.c.bf16 %v6414_v37, %v6414_v37 }
 0x380   :  { %v5387_v19 = vpop.f32.mrf.mxu3 }
 0x381   :  { %6543 = vst.msk [vmem:[%s10634_s5 + $0x2c] sm:$0xf] %vm6531_vm8, %v6478_v47  ;;  %v5529_v30 = vadd.f32 %v5387_v19, %v5163_v56  ;;  %v5941_v56 = vrot.slane %v5939_v18, 1 }
 0x382   :  { %6601 = vst.msk [vmem:[%s10634_s5 + $0x2c] sm:$0xf] %vm6531_vm8, %v10721_v54  ;;  %v6209_v17 = vpop.f32.mrf.mxu0 }
 0x383   :  { %v6351_v20 = vadd.f32 %v6209_v17, %v5529_v30  ;;  %v3899_v30 = vor.u32 %v3897_v57, %v3895_v4  ;;  %v5942_v63 = vsel %vm1718_vm7, %v5937_v23, %v5941_v56 }
 0x384   :  { %v4168_v52 = vpop.f32.mrf.mxu1 }
 0x385   :  { %7310 = vmatmul.msk.bf16.gmra.mxu0 %vm788_vm6, %v5934_v55  ;;  %v6415_v59 = vmax.f32 %v6351_v20, 0.0  ;;  %v5023_v21 = vpop.f32.mrf.mxu2  ;;  %v4307_v7 = vadd.f32 %v4168_v52, %v9315_v6  ;;  %v4746_v20 = vor.u32 %v4745_v31, %v4742_v40  ;;  %v3904_v52 = vsel %vm1718_vm7, %v3899_v30, %v3903_v11 }
 0x386   :  { %v5164_v44 = vadd.f32 %v5023_v21, %v4306_v48 }
 0x387   :  { %v6479_v8 = vpack.c.bf16 %v6415_v59, %v6415_v59  ;;  %7084 = vmatmul.msk.bf16.gmra.mxu1 %vm788_vm6, %v3896_v25  ;;  %v4747_v4 = vsel %vm491_vm5, %v4737_v13, %v4746_v20  ;;  %v7888_v13 = vld [vmem:[#allocation2 + $0xb0] sm:$0xff]  }
 0x388   :  { %v5389_v49 = vpop.f32.mrf.mxu3 }
 0x389   :  { %6544 = vst.msk [vmem:[%s10634_s5 + $0x30] sm:$0xf] %vm6531_vm8, %v6479_v8  ;;  %v5530_v22 = vadd.f32 %v5389_v49, %v5164_v44  ;;  %v9979_v44 = vld [vmem:[#allocation2 + $0xb8] sm:$0xff]  ;;  %v9987_v49 = vld [vmem:[#allocation2 + $0xb0] sm:$0xff] }
 0x38a   :  { %v6211_v0 = vpop.f32.mrf.mxu0  ;;  %7117 = vmatmul.msk.bf16.gmra.mxu2 %vm788_vm6, %v4738_v10  ;;  %v8547_v10 = vld [vmem:[#allocation2 + $0xbc] sm:$0xff]  }
 0x38b   :  { %v6352_v5 = vadd.f32 %v6211_v0, %v5530_v22  ;;  %v5943_v0 = vshrl.u32 %v9954_v45, 16  ;;  %v4749_v18 = vshrl.u32 %v8547_v10, 16 }
 0x38c   :  { %v4170_v24 = vpop.f32.mrf.mxu1 }
 0x38d   :  { %v6416_v37 = vmax.f32 %v6352_v5, 0.0  ;;  %7150 = vmatmul.msk.bf16.gmra.mxu3 %vm788_vm6, %v7887_v39  ;;  %v5026_v34 = vpop.f32.mrf.mxu2  ;;  %v4308_v36 = vadd.f32 %v4170_v24, %v9324_v1  ;;  %v5947_v39 = vshll.u32 %v9979_v44, 16  ;;  %v4752_v5 = vshll.u32 %v8547_v10, 16 }
 0x38e   :  { %v5165_v47 = vadd.f32 %v5026_v34, %v4307_v7  ;;  %v3905_v34 = vshrl.u32 %v9962_v14, 16  ;;  %v3909_v24 = vshll.u32 %v9987_v49, 16  ;;  %v5945_v57 = vor.u32 %v5943_v0, %v5941_v56 }
 0x38f   :  { %v6480_v58 = vpack.c.bf16 %v6416_v37, %v6416_v37  ;;  %v5949_v38 = vrot.slane %v5947_v39, 1 }
 0x390   :  { %v5392_v19 = vpop.f32.mrf.mxu3  ;;  %v3907_v31 = vor.u32 %v3905_v34, %v3903_v11 }
 0x391   :  { %6545 = vst.msk [vmem:[%s10634_s5 + $0x34] sm:$0xf] %vm6531_vm8, %v6480_v58  ;;  %v5531_v6 = vadd.f32 %v5392_v19, %v5165_v47  ;;  %v4751_v47 = vrot.slane %v4749_v18, 3  ;;  %v4754_v58 = vrot.slane %v4752_v5, 4  ;;  %v3911_v19 = vrot.slane %v3909_v24, 1 }
 0x392   :  { %v6214_v17 = vpop.f32.mrf.mxu0  ;;  %v5950_v56 = vsel %vm1718_vm7, %v5945_v57, %v5949_v38 }
 0x393   :  { %v6353_v55 = vadd.f32 %v6214_v17, %v5531_v6  ;;  %v4755_v30 = vor.u32 %v4754_v58, %v4751_v47  ;;  %v3912_v11 = vsel %vm1718_vm7, %v3907_v31, %v3911_v19 }
 0x394   :  { %v4173_v21 = vpop.f32.mrf.mxu1 }
 0x395   :  { %7311 = vmatmul.msk.bf16.gmra.mxu0 %vm788_vm6, %v5942_v63  ;;  %v6417_v48 = vmax.f32 %v6353_v55, 0.0  ;;  %v5028_v59 = vpop.f32.mrf.mxu2  ;;  %v4309_v42 = vadd.f32 %v4173_v21, %v9329_v12 }
 0x396   :  { %v5166_v25 = vadd.f32 %v5028_v59, %v4308_v36  ;;  %v10014_v59 = vld [vmem:[#allocation2 + $0xc0] sm:$0xff] }
 0x397   :  { %v6481_v8 = vpack.c.bf16 %v6417_v48, %v6417_v48  ;;  %7085 = vmatmul.msk.bf16.gmra.mxu1 %vm788_vm6, %v3904_v52  ;;  %v4756_v52 = vsel %vm491_vm5, %v4746_v20, %v4755_v30  ;;  %v5955_v20 = vshll.u32 %v10014_v59, 16 }
 0x398   :  { %v5394_v3 = vpop.f32.mrf.mxu3 }
 0x399   :  { %6546 = vst.msk [vmem:[%s10634_s5 + $0x38] sm:$0xf] %vm6531_vm8, %v6481_v8  ;;  %v5532_v1 = vadd.f32 %v5394_v3, %v5166_v25  ;;  %v8549_v25 = vld [vmem:[#allocation2 + $0xc4] sm:$0xff]   ;;  %v7889_v3 = vld [vmem:[#allocation2 + $0xb8] sm:$0xff]  }
 0x39a   :  { %6602 = vst.msk [vmem:[%s10634_s5 + $0x38] sm:$0xf] %vm6531_vm8, %v10721_v54  ;;  %v6216_v22 = vpop.f32.mrf.mxu0  ;;  %7118 = vmatmul.msk.bf16.gmra.mxu2 %vm788_vm6, %v4747_v4  ;;  %v10022_v4 = vld [vmem:[#allocation2 + $0xb8] sm:$0xff]  ;;  %v4761_v0 = vshll.u32 %v8549_v25, 16 }
 0x39b   :  { %v6354_v15 = vadd.f32 %v6216_v22, %v5532_v1  ;;  %v5951_v1 = vshrl.u32 %v9979_v44, 16 }
 0x39c   :  { %v4175_v37 = vpop.f32.mrf.mxu1  ;;  %v4763_v57 = vrot.slane %v4761_v0, 4 }
 0x39d   :  { %v6418_v53 = vmax.f32 %v6354_v15, 0.0  ;;  %7151 = vmatmul.msk.bf16.gmra.mxu3 %vm788_vm6, %v7888_v13  ;;  %v5031_v7 = vpop.f32.mrf.mxu2  ;;  %v4310_v17 = vadd.f32 %v4175_v37, %v9338_v9  ;;  %v4758_v13 = vshrl.u32 %v8549_v25, 16  ;;  %v5957_v37 = vrot.slane %v5955_v20, 1 }
 0x39e   :  { %v5167_v23 = vadd.f32 %v5031_v7, %v4309_v42  ;;  %v3913_v42 = vshrl.u32 %v9987_v49, 16  ;;  %v5953_v7 = vor.u32 %v5951_v1, %v5949_v38 }
 0x39f   :  { %v6482_v45 = vpack.c.bf16 %v6418_v53, %v6418_v53  ;;  %v3917_v53 = vshll.u32 %v10022_v4, 16  ;;  %v4760_v24 = vrot.slane %v4758_v13, 3  ;;  %v3921_v13 = vshrl.u32 %v10022_v4, 16 }
 0x3a0   :  { %v5397_v40 = vpop.f32.mrf.mxu3  ;;  %v5958_v49 = vsel %vm1718_vm7, %v5953_v7, %v5957_v37 }
 0x3a1   :  { %6547 = vst.msk [vmem:[%s10634_s5 + $0x3c] sm:$0xf] %vm6531_vm8, %v6482_v45  ;;  %v5533_v12 = vadd.f32 %v5397_v40, %v5167_v23  ;;  %v3915_v45 = vor.u32 %v3913_v42, %v3911_v19  ;;  %v3919_v47 = vrot.slane %v3917_v53, 1 }
 0x3a2   :  { %6603 = vst.msk [vmem:[%s10634_s5 + $0x3c] sm:$0xf] %vm6531_vm8, %v10721_v54  ;;  %v6219_v14 = vpop.f32.mrf.mxu0 }
 0x3a3   :  { %v6355_v6 = vadd.f32 %v6219_v14, %v5533_v12  ;;  %v4764_v12 = vor.u32 %v4763_v57, %v4760_v24  ;;  %v3923_v7 = vor.u32 %v3921_v13, %v3919_v47 }
 0x3a4   :  { %v4178_v36 = vpop.f32.mrf.mxu1 }
 0x3a5   :  { %7312 = vmatmul.msk.bf16.gmra.mxu0 %vm788_vm6, %v5950_v56  ;;  %v6419_v63 = vmax.f32 %v6355_v6, 0.0  ;;  %v5033_v55 = vpop.f32.mrf.mxu2  ;;  %v4311_v39 = vadd.f32 %v4178_v36, %v9343_v32  ;;  %v3920_v6 = vsel %vm1718_vm7, %v3915_v45, %v3919_v47  ;;  %v4765_v19 = vsel %vm491_vm5, %v4755_v30, %v4764_v12  ;;  %v8551_v36 = vld [vmem:[#allocation2 + $0xcc] sm:$0xff]   ;;  %v7890_v30 = vld [vmem:[#allocation2 + $0xc0] sm:$0xff]  }
 0x3a6   :  { %v5168_v48 = vadd.f32 %v5033_v55, %v4310_v17 }
 0x3a7   :  { %v6483_v21 = vpack.c.bf16 %v6419_v63, %v6419_v63  ;;  %7086 = vmatmul.msk.bf16.gmra.mxu1 %vm788_vm6, %v3912_v11  ;;  %v10039_v63 = vld [vmem:[#allocation2 + $0xc8] sm:$0xff] }
 0x3a8   :  { %v5399_v8 = vpop.f32.mrf.mxu3  ;;  %v5963_v25 = vshll.u32 %v10039_v63, 16 }
 0x3a9   :  { %6548 = vst.msk [vmem:[%s10634_s5 + $0x40] sm:$0xf] %vm6531_vm8, %v6483_v21  ;;  %v5534_v9 = vadd.f32 %v5399_v8, %v5168_v48  ;;  %v10047_v48 = vld [vmem:[#allocation2 + $0xc0] sm:$0xff] }
 0x3aa   :  { %v6221_v10 = vpop.f32.mrf.mxu0  ;;  %7119 = vmatmul.msk.bf16.gmra.mxu2 %vm788_vm6, %v4756_v52  ;;  %v5959_v52 = vshrl.u32 %v10014_v59, 16  ;;  %v3925_v0 = vshll.u32 %v10047_v48, 16 }
 0x3ab   :  { %v6356_v22 = vadd.f32 %v6221_v10, %v5534_v9  ;;  %v4767_v9 = vshrl.u32 %v8551_v36, 16  ;;  %v4770_v10 = vshll.u32 %v8551_v36, 16 }
 0x3ac   :  { %v4180_v5 = vpop.f32.mrf.mxu1 }
 0x3ad   :  { %v6420_v15 = vmax.f32 %v6356_v22, 0.0  ;;  %7152 = vmatmul.msk.bf16.gmra.mxu3 %vm788_vm6, %v7889_v3  ;;  %v5036_v18 = vpop.f32.mrf.mxu2  ;;  %v4312_v38 = vadd.f32 %v4180_v5, %v9352_v46  ;;  %v4769_v5 = vrot.slane %v4767_v9, 3  ;;  %v4772_v42 = vrot.slane %v4770_v10, 4 }
 0x3ae   :  { %v5169_v34 = vadd.f32 %v5036_v18, %v4311_v39  ;;  %v5961_v39 = vor.u32 %v5959_v52, %v5957_v37 }
 0x3af   :  { %v6484_v44 = vpack.c.bf16 %v6420_v15, %v6420_v15  ;;  %v5965_v15 = vrot.slane %v5963_v25, 1  ;;  %v4773_v24 = vor.u32 %v4772_v42, %v4769_v5  ;;  %v3929_v25 = vshrl.u32 %v10047_v48, 16 }
 0x3b0   :  { %v5402_v23 = vpop.f32.mrf.mxu3 }
 0x3b1   :  { %6549 = vst.msk [vmem:[%s10634_s5 + $0x44] sm:$0xf] %vm6531_vm8, %v6484_v44  ;;  %v5535_v32 = vadd.f32 %v5402_v23, %v5169_v34  ;;  %v3927_v34 = vrot.slane %v3925_v0, 1  ;;  %v5966_v37 = vsel %vm1718_vm7, %v5961_v39, %v5965_v15 }
 0x3b2   :  { %v6224_v58 = vpop.f32.mrf.mxu0 }
 0x3b3   :  { %v6357_v40 = vadd.f32 %v6224_v58, %v5535_v32  ;;  %v3928_v47 = vsel %vm1718_vm7, %v3923_v7, %v3927_v34  ;;  %v3931_v13 = vor.u32 %v3929_v25, %v3927_v34 }
 0x3b4   :  { %v4183_v56 = vpop.f32.mrf.mxu1 }
 0x3b5   :  { %7313 = vmatmul.msk.bf16.gmra.mxu0 %vm788_vm6, %v5958_v49  ;;  %v6421_v31 = vmax.f32 %v6357_v40, 0.0  ;;  %v5038_v14 = vpop.f32.mrf.mxu2  ;;  %v4313_v3 = vadd.f32 %v4183_v56, %v9357_v43  ;;  %v10074_v49 = vld [vmem:[#allocation2 + $0xd0] sm:$0xff]  ;;  %v10082_v56 = vld [vmem:[#allocation2 + $0xc8] sm:$0xff] }
 0x3b6   :  { %v5170_v17 = vadd.f32 %v5038_v14, %v4312_v38  ;;  %v4774_v38 = vsel %vm491_vm5, %v4764_v12, %v4773_v24  ;;  %v5971_v12 = vshll.u32 %v10074_v49, 16 }
 0x3b7   :  { %v6485_v55 = vpack.c.bf16 %v6421_v31, %v6421_v31  ;;  %7087 = vmatmul.msk.bf16.gmra.mxu1 %vm788_vm6, %v3920_v6  ;;  %v8553_v31 = vld [vmem:[#allocation2 + $0xd4] sm:$0xff]  }
 0x3b8   :  { %v5404_v11 = vpop.f32.mrf.mxu3  ;;  %v4776_v36 = vshrl.u32 %v8553_v31, 16  ;;  %v5973_v10 = vrot.slane %v5971_v12, 1 }
 0x3b9   :  { %6550 = vst.msk [vmem:[%s10634_s5 + $0x48] sm:$0xf] %vm6531_vm8, %v6485_v55  ;;  %v5536_v46 = vadd.f32 %v5404_v11, %v5170_v17  ;;  %v7891_v17 = vld [vmem:[#allocation2 + $0xc8] sm:$0xff]   ;;  %v5967_v55 = vshrl.u32 %v10039_v63, 16  ;;  %v4779_v11 = vshll.u32 %v8553_v31, 16 }
 0x3ba   :  { %6604 = vst.msk [vmem:[%s10634_s5 + $0x48] sm:$0xf] %vm6531_vm8, %v10721_v54  ;;  %v6226_v21 = vpop.f32.mrf.mxu0  ;;  %7120 = vmatmul.msk.bf16.gmra.mxu2 %vm788_vm6, %v4765_v19 }
 0x3bb   :  { %v6358_v8 = vadd.f32 %v6226_v21, %v5536_v46  ;;  %v5969_v9 = vor.u32 %v5967_v55, %v5965_v15 }
 0x3bc   :  { %v4185_v22 = vpop.f32.mrf.mxu1 }
 0x3bd   :  { %v6422_v1 = vmax.f32 %v6358_v8, 0.0  ;;  %7153 = vmatmul.msk.bf16.gmra.mxu3 %vm788_vm6, %v7890_v30  ;;  %v5041_v20 = vpop.f32.mrf.mxu2  ;;  %v4314_v57 = vadd.f32 %v4185_v22, %v9366_v16  ;;  %v3933_v8 = vshll.u32 %v10082_v56, 16  ;;  %v5974_v48 = vsel %vm1718_vm7, %v5969_v9, %v5973_v10 }
 0x3be   :  { %v5171_v18 = vadd.f32 %v5041_v20, %v4313_v3  ;;  %v4781_v20 = vrot.slane %v4779_v11, 4 }
 0x3bf   :  { %v6486_v59 = vpack.c.bf16 %v6422_v1, %v6422_v1  ;;  %v4778_v1 = vrot.slane %v4776_v36, 3  ;;  %v3935_v0 = vrot.slane %v3933_v8, 1 }
 0x3c0   :  { %v5407_v53 = vpop.f32.mrf.mxu3 }
 0x3c1   :  { %6551 = vst.msk [vmem:[%s10634_s5 + $0x4c] sm:$0xf] %vm6531_vm8, %v6486_v59  ;;  %v5537_v43 = vadd.f32 %v5407_v53, %v5171_v18  ;;  %v4782_v59 = vor.u32 %v4781_v20, %v4778_v1 }
 0x3c2   :  { %6605 = vst.msk [vmem:[%s10634_s5 + $0x4c] sm:$0xf] %vm6531_vm8, %v10721_v54  ;;  %v6229_v4 = vpop.f32.mrf.mxu0 }
 0x3c3   :  { %v6359_v44 = vadd.f32 %v6229_v4, %v5537_v43  ;;  %v3936_v43 = vsel %vm1718_vm7, %v3931_v13, %v3935_v0  ;;  %v10099_v4 = vld [vmem:[#allocation2 + $0xd8] sm:$0xff]  ;;  %v4783_v34 = vsel %vm491_vm5, %v4773_v24, %v4782_v59  ;;  %v7892_v24 = vld [vmem:[#allocation2 + $0xd0] sm:$0xff]  }
 0x3c4   :  { %v4188_v45 = vpop.f32.mrf.mxu1 }
 0x3c5   :  { %7314 = vmatmul.msk.bf16.gmra.mxu0 %vm788_vm6, %v5966_v37  ;;  %v6423_v23 = vmax.f32 %v6359_v44, 0.0  ;;  %v5043_v32 = vpop.f32.mrf.mxu2  ;;  %v4315_v46 = vadd.f32 %v4188_v45, %v9371_v33  ;;  %v8555_v44 = vld [vmem:[#allocation2 + $0xdc] sm:$0xff]   ;;  %v5975_v45 = vshrl.u32 %v10074_v49, 16 }
 0x3c6   :  { %v5172_v58 = vadd.f32 %v5043_v32, %v4314_v57 }
 0x3c7   :  { %v6487_v40 = vpack.c.bf16 %v6423_v23, %v6423_v23  ;;  %7088 = vmatmul.msk.bf16.gmra.mxu1 %vm788_vm6, %v3928_v47  ;;  %v10107_v23 = vld [vmem:[#allocation2 + $0xd0] sm:$0xff]  ;;  %v5979_v47 = vshll.u32 %v10099_v4, 16  ;;  %v5977_v12 = vor.u32 %v5975_v45, %v5973_v10 }
 0x3c8   :  { %v5409_v14 = vpop.f32.mrf.mxu3  ;;  %v3941_v55 = vshll.u32 %v10107_v23, 16 }
 0x3c9   :  { %6552 = vst.msk [vmem:[%s10634_s5 + $0x50] sm:$0xf] %vm6531_vm8, %v6487_v40  ;;  %v5538_v16 = vadd.f32 %v5409_v14, %v5172_v58  ;;  %v4785_v40 = vshrl.u32 %v8555_v44, 16 }
 0x3ca   :  { %v6231_v6 = vpop.f32.mrf.mxu0  ;;  %7121 = vmatmul.msk.bf16.gmra.mxu2 %vm788_vm6, %v4774_v38  ;;  %v4788_v38 = vshll.u32 %v8555_v44, 16 }
 0x3cb   :  { %v6360_v19 = vadd.f32 %v6231_v6, %v5538_v16  ;;  %v4787_v11 = vrot.slane %v4785_v40, 3 }
 0x3cc   :  { %v4190_v52 = vpop.f32.mrf.mxu1 }
 0x3cd   :  { %v6424_v21 = vmax.f32 %v6360_v19, 0.0  ;;  %7154 = vmatmul.msk.bf16.gmra.mxu3 %vm788_vm6, %v7891_v17  ;;  %v5046_v30 = vpop.f32.mrf.mxu2  ;;  %v4316_v15 = vadd.f32 %v4190_v52, %v9380_v61  ;;  %v3937_v17 = vshrl.u32 %v10082_v56, 16  ;;  %v5981_v19 = vrot.slane %v5979_v47, 1 }
 0x3ce   :  { %v5173_v3 = vadd.f32 %v5046_v30, %v4315_v46  ;;  %v4790_v46 = vrot.slane %v4788_v38, 4  ;;  %v3943_v52 = vrot.slane %v3941_v55, 1 }
 0x3cf   :  { %v6488_v63 = vpack.c.bf16 %v6424_v21, %v6424_v21  ;;  %v3939_v30 = vor.u32 %v3937_v17, %v3935_v0  ;;  %v5982_v25 = vsel %vm1718_vm7, %v5977_v12, %v5981_v19 }
 0x3d0   :  { %v5412_v22 = vpop.f32.mrf.mxu3  ;;  %v4791_v9 = vor.u32 %v4790_v46, %v4787_v11  ;;  %v10159_v46 = vld [vmem:[#allocation2 + $0xe8] sm:$0xff] }
 0x3d1   :  { %6553 = vst.msk [vmem:[%s10634_s5 + $0x54] sm:$0xf] %vm6531_vm8, %v6488_v63  ;;  %v5539_v33 = vadd.f32 %v5412_v22, %v5173_v3  ;;  %v3944_v20 = vsel %vm1718_vm7, %v3939_v30, %v3943_v52  ;;  %v8559_v30 = vld [vmem:[#allocation2 + $0xec] sm:$0xff]  }
 0x3d2   :  { %v6234_v39 = vpop.f32.mrf.mxu0  ;;  %v4792_v0 = vsel %vm491_vm5, %v4782_v59, %v4791_v9 }
 0x3d3   :  { %v6361_v18 = vadd.f32 %v6234_v39, %v5539_v33  ;;  %v10134_v33 = vld [vmem:[#allocation2 + $0xe0] sm:$0xff] }
 0x3d4   :  { %v4193_v53 = vpop.f32.mrf.mxu1  ;;  %v8557_v39 = vld [vmem:[#allocation2 + $0xe4] sm:$0xff]   ;;  %v5987_v59 = vshll.u32 %v10134_v33, 16 }
 0x3d5   :  { %7315 = vmatmul.msk.bf16.gmra.mxu0 %vm788_vm6, %v5974_v48  ;;  %v6425_v5 = vmax.f32 %v6361_v18, 0.0  ;;  %v5048_v42 = vpop.f32.mrf.mxu2  ;;  %v4317_v31 = vadd.f32 %v4193_v53, %v9385_v2  ;;  %v10142_v18 = vld [vmem:[#allocation2 + $0xd8] sm:$0xff] }
 0x3d6   :  { %v5174_v7 = vadd.f32 %v5048_v42, %v4316_v15  ;;  %v5983_v42 = vshrl.u32 %v10099_v4, 16  ;;  %v5989_v45 = vrot.slane %v5987_v59, 1 }
 0x3d7   :  { %v6489_v37 = vpack.c.bf16 %v6425_v5, %v6425_v5  ;;  %7089 = vmatmul.msk.bf16.gmra.mxu1 %vm788_vm6, %v3936_v43  ;;  %v7893_v5 = vld [vmem:[#allocation2 + $0xd8] sm:$0xff]   ;;  %v4794_v43 = vshrl.u32 %v8557_v39, 16 }
 0x3d8   :  { %v5414_v57 = vpop.f32.mrf.mxu3 }
 0x3d9   :  { %6554 = vst.msk [vmem:[%s10634_s5 + $0x58] sm:$0xf] %vm6531_vm8, %v6489_v37  ;;  %v5540_v61 = vadd.f32 %v5414_v57, %v5174_v7  ;;  %v4797_v7 = vshll.u32 %v8557_v39, 16  ;;  %v3953_v39 = vshrl.u32 %v10142_v18, 16 }
 0x3da   :  { %6606 = vst.msk [vmem:[%s10634_s5 + $0x58] sm:$0xf] %vm6531_vm8, %v10721_v54  ;;  %v6236_v32 = vpop.f32.mrf.mxu0  ;;  %7122 = vmatmul.msk.bf16.gmra.mxu2 %vm788_vm6, %v4783_v34 }
 0x3db   :  { %v6362_v58 = vadd.f32 %v6236_v32, %v5540_v61  ;;  %v3945_v61 = vshrl.u32 %v10107_v23, 16  ;;  %v3949_v32 = vshll.u32 %v10142_v18, 16  ;;  %v4799_v40 = vrot.slane %v4797_v7, 4 }
 0x3dc   :  { %v4195_v6 = vpop.f32.mrf.mxu1 }
 0x3dd   :  { %v6426_v14 = vmax.f32 %v6362_v58, 0.0  ;;  %7155 = vmatmul.msk.bf16.gmra.mxu3 %vm788_vm6, %v7892_v24  ;;  %v5051_v16 = vpop.f32.mrf.mxu2  ;;  %v4318_v10 = vadd.f32 %v4195_v6, %v9394_v50  ;;  %v5985_v24 = vor.u32 %v5983_v42, %v5981_v19  ;;  %v4796_v58 = vrot.slane %v4794_v43, 3 }
 0x3de   :  { %v5175_v36 = vadd.f32 %v5051_v16, %v4317_v31  ;;  %v3947_v31 = vor.u32 %v3945_v61, %v3943_v52 }
 0x3df   :  { %v6490_v49 = vpack.c.bf16 %v6426_v14, %v6426_v14  ;;  %v3951_v14 = vrot.slane %v3949_v32, 1  ;;  %v5990_v23 = vsel %vm1718_vm7, %v5985_v24, %v5989_v45  ;;  %v4800_v17 = vor.u32 %v4799_v40, %v4796_v58 }
 0x3e0   :  { %v5417_v21 = vpop.f32.mrf.mxu3 }
 0x3e1   :  { %6555 = vst.msk [vmem:[%s10634_s5 + $0x5c] sm:$0xf] %vm6531_vm8, %v6490_v49  ;;  %v5541_v2 = vadd.f32 %v5417_v21, %v5175_v36  ;;  %v3952_v49 = vsel %vm1718_vm7, %v3947_v31, %v3951_v14  ;;  %v3955_v43 = vor.u32 %v3953_v39, %v3951_v14  ;;  %v10202_v31 = vld [vmem:[#allocation2 + $0xe8] sm:$0xff] }
 0x3e2   :  { %6607 = vst.msk [vmem:[%s10634_s5 + $0x5c] sm:$0xf] %vm6531_vm8, %v10721_v54  ;;  %v6239_v56 = vpop.f32.mrf.mxu0 }
 0x3e3   :  { %v6363_v8 = vadd.f32 %v6239_v56, %v5541_v2  ;;  %v4801_v2 = vsel %vm491_vm5, %v4791_v9, %v4800_v17  ;;  %v10167_v56 = vld [vmem:[#allocation2 + $0xe0] sm:$0xff]  ;;  %v5991_v9 = vshrl.u32 %v10134_v33, 16 }
 0x3e4   :  { %v4198_v1 = vpop.f32.mrf.mxu1 }
 0x3e5   :  { %7316 = vmatmul.msk.bf16.gmra.mxu0 %vm788_vm6, %v5982_v25  ;;  %v6427_v3 = vmax.f32 %v6363_v8, 0.0  ;;  %v5053_v63 = vpop.f32.mrf.mxu2  ;;  %v4319_v37 = vadd.f32 %v4198_v1, %v9399_v35  ;;  %v7894_v8 = vld [vmem:[#allocation2 + $0xe0] sm:$0xff]   ;;  %v4806_v1 = vshll.u32 %v8559_v30, 16 }
 0x3e6   :  { %v5176_v22 = vadd.f32 %v5053_v63, %v4318_v10  ;;  %v5995_v10 = vshll.u32 %v10159_v46, 16  ;;  %v4803_v63 = vshrl.u32 %v8559_v30, 16 }
 0x3e7   :  { %v6491_v13 = vpack.c.bf16 %v6427_v3, %v6427_v3  ;;  %7090 = vmatmul.msk.bf16.gmra.mxu1 %vm788_vm6, %v3944_v20  ;;  %v4808_v59 = vrot.slane %v4806_v1, 4 }
 0x3e8   :  { %v5419_v48 = vpop.f32.mrf.mxu3  ;;  %v4805_v42 = vrot.slane %v4803_v63, 3 }
 0x3e9   :  { %6556 = vst.msk [vmem:[%s10634_s5 + $0x60] sm:$0xf] %vm6531_vm8, %v6491_v13  ;;  %v5542_v50 = vadd.f32 %v5419_v48, %v5176_v22  ;;  %v3957_v48 = vshll.u32 %v10167_v56, 16 }
 0x3ea   :  { %v6241_v15 = vpop.f32.mrf.mxu0  ;;  %7123 = vmatmul.msk.bf16.gmra.mxu2 %vm788_vm6, %v4792_v0 }
 0x3eb   :  { %v6364_v53 = vadd.f32 %v6241_v15, %v5542_v50  ;;  %v5993_v50 = vor.u32 %v5991_v9, %v5989_v45  ;;  %v5997_v15 = vrot.slane %v5995_v10, 1  ;;  %v3959_v7 = vrot.slane %v3957_v48, 1 }
 0x3ec   :  { %v4200_v57 = vpop.f32.mrf.mxu1 }
 0x3ed   :  { %v6428_v34 = vmax.f32 %v6364_v53, 0.0  ;;  %7156 = vmatmul.msk.bf16.gmra.mxu3 %vm788_vm6, %v7893_v5  ;;  %v5056_v44 = vpop.f32.mrf.mxu2  ;;  %v4320_v55 = vadd.f32 %v4200_v57, %v9408_v29  ;;  %v3960_v45 = vsel %vm1718_vm7, %v3955_v43, %v3959_v7  ;;  %v7896_v43 = vld [vmem:[#allocation2 + $0xf0] sm:$0xff]  }
 0x3ee   :  { %v5177_v47 = vadd.f32 %v5056_v44, %v4319_v37  ;;  %v5998_v37 = vsel %vm1718_vm7, %v5993_v50, %v5997_v15  ;;  %v4809_v44 = vor.u32 %v4808_v59, %v4805_v42  ;;  %v8563_v42 = vld [vmem:[#allocation2 + $0xfc] sm:$0xff]  }
 0x3ef   :  { %v6492_v4 = vpack.c.bf16 %v6428_v34, %v6428_v34 }
 0x3f0   :  { %v5422_v38 = vpop.f32.mrf.mxu3  ;;  %v4810_v40 = vsel %vm491_vm5, %v4800_v17, %v4809_v44 }
 0x3f1   :  { %6557 = vst.msk [vmem:[%s10634_s5 + $0x64] sm:$0xf] %vm6531_vm8, %v6492_v4  ;;  %v5543_v35 = vadd.f32 %v5422_v38, %v5177_v47  ;;  %v10194_v4 = vld [vmem:[#allocation2 + $0xf0] sm:$0xff] }
 0x3f2   :  { %v6244_v16 = vpop.f32.mrf.mxu0  ;;  %v8561_v38 = vld [vmem:[#allocation2 + $0xf4] sm:$0xff]  }
 0x3f3   :  { %v6365_v6 = vadd.f32 %v6244_v16, %v5543_v35  ;;  %v7895_v16 = vld [vmem:[#allocation2 + $0xe8] sm:$0xff]  }
 0x3f4   :  { %v4203_v36 = vpop.f32.mrf.mxu1 }
 0x3f5   :  { %7317 = vmatmul.msk.bf16.gmra.mxu0 %vm788_vm6, %v5990_v23  ;;  %v6429_v12 = vmax.f32 %v6365_v6, 0.0  ;;  %v5058_v19 = vpop.f32.mrf.mxu2  ;;  %v4321_v20 = vadd.f32 %v4203_v36, %v9418_v62  ;;  %v5999_v23 = vshrl.u32 %v10159_v46, 16  ;;  %v6003_v6 = vshll.u32 %v10194_v4, 16 }
 0x3f6   :  { %v5178_v11 = vadd.f32 %v5058_v19, %v4320_v55  ;;  %v4812_v55 = vshrl.u32 %v8561_v38, 16 }
 0x3f7   :  { %v6493_v21 = vpack.c.bf16 %v6429_v12, %v6429_v12  ;;  %7091 = vmatmul.msk.bf16.gmra.mxu1 %vm788_vm6, %v3952_v49  ;;  %v4815_v12 = vshll.u32 %v8561_v38, 16  ;;  %v6001_v30 = vor.u32 %v5999_v23, %v5997_v15  ;;  %v10219_v15 = vld [vmem:[#allocation2 + $0xf8] sm:$0xff] }
 0x3f8   :  { %v5424_v52 = vpop.f32.mrf.mxu3 }
 0x3f9   :  { %6558 = vst.msk [vmem:[%s10634_s5 + $0x68] sm:$0xf] %vm6531_vm8, %v6493_v21  ;;  %v5544_v29 = vadd.f32 %v5424_v52, %v5178_v11  ;;  %v3961_v21 = vshrl.u32 %v10167_v56, 16  ;;  %v6005_v52 = vrot.slane %v6003_v6, 1 }
 0x3fa   :  { %6608 = vst.msk [vmem:[%s10634_s5 + $0x68] sm:$0xf] %vm6531_vm8, %v10721_v54  ;;  %v6246_v25 = vpop.f32.mrf.mxu0  ;;  %7124 = vmatmul.msk.bf16.gmra.mxu2 %vm788_vm6, %v4801_v2  ;;  %v3965_v2 = vshll.u32 %v10202_v31, 16 }
 0x3fb   :  { %v6366_v3 = vadd.f32 %v6246_v25, %v5544_v29  ;;  %v4814_v25 = vrot.slane %v4812_v55, 3  ;;  %v3963_v10 = vor.u32 %v3961_v21, %v3959_v7  ;;  %v6006_v56 = vsel %vm1718_vm7, %v6001_v30, %v6005_v52 }
 0x3fc   :  { %v4205_v0 = vpop.f32.mrf.mxu1  ;;  %v6007_v7 = vshrl.u32 %v10194_v4, 16 }
 0x3fd   :  { %v6430_v22 = vmax.f32 %v6366_v3, 0.0  ;;  %7157 = vmatmul.msk.bf16.gmra.mxu3 %vm788_vm6, %v7894_v8  ;;  %v5061_v13 = vpop.f32.mrf.mxu2  ;;  %v4322_v57 = vadd.f32 %v4205_v0, %v9427_v51  ;;  %v4817_v8 = vrot.slane %v4815_v12, 4  ;;  %v3967_v3 = vrot.slane %v3965_v2, 1 }
 0x3fe   :  { %v5179_v5 = vadd.f32 %v5061_v13, %v4321_v20 }
 0x3ff   :  { %v6494_v33 = vpack.c.bf16 %v6430_v22, %v6430_v22  ;;  %v4818_v20 = vor.u32 %v4817_v8, %v4814_v25  ;;  %v3968_v48 = vsel %vm1718_vm7, %v3963_v10, %v3967_v3  ;;  %v8565_v8 = vld [vmem:[#allocation2 + $0x104] sm:$0xff]   ;;  %v10262_v10 = vld [vmem:[#allocation2 + $0xf8] sm:$0xff] }
 0x400   :  { %v5427_v53 = vpop.f32.mrf.mxu3 }
 0x401   :  { %6559 = vst.msk [vmem:[%s10634_s5 + $0x6c] sm:$0xf] %vm6531_vm8, %v6494_v33  ;;  %v5545_v62 = vadd.f32 %v5427_v53, %v5179_v5  ;;  %v4819_v33 = vsel %vm491_vm5, %v4809_v44, %v4818_v20  ;;  %v10227_v53 = vld [vmem:[#allocation2 + $0xf0] sm:$0xff]  ;;  %v4824_v44 = vshll.u32 %v8563_v42, 16 }
 0x402   :  { %6609 = vst.msk [vmem:[%s10634_s5 + $0x6c] sm:$0xf] %vm6531_vm8, %v10721_v54  ;;  %v6249_v18 = vpop.f32.mrf.mxu0 }
 0x403   :  { %v6367_v34 = vadd.f32 %v6249_v18, %v5545_v62  ;;  %v6011_v18 = vshll.u32 %v10219_v15, 16 }
 0x404   :  { %v4208_v24 = vpop.f32.mrf.mxu1 }
 0x405   :  { %7318 = vmatmul.msk.bf16.gmra.mxu0 %vm788_vm6, %v5998_v37  ;;  %v6431_v61 = vmax.f32 %v6367_v34, 0.0  ;;  %v5063_v32 = vpop.f32.mrf.mxu2  ;;  %v4323_v19 = vadd.f32 %v4208_v24, %v9432_v28  ;;  %v4821_v34 = vshrl.u32 %v8563_v42, 16  ;;  %v6013_v38 = vrot.slane %v6011_v18, 1 }
 0x406   :  { %v5180_v47 = vadd.f32 %v5063_v32, %v4322_v57  ;;  %v10722_v57 = vld [vmem:[#allocation29_spill] sm:$0xff]  ;;  %v3981_v42 = vshll.u32 %v10262_v10, 16 }
 0x407   :  { %v6495_v58 = vpack.c.bf16 %v6431_v61, %v6431_v61  ;;  %7092 = vmatmul.msk.bf16.gmra.mxu1 %vm788_vm6, %v3960_v45 }
 0x408   :  { %v5429_v35 = vpop.f32.mrf.mxu3 }
 0x409   :  { %6560 = vst.msk [vmem:[%s10634_s5 + $0x70] sm:$0xf] %vm6531_vm8, %v6495_v58  ;;  %v5546_v51 = vadd.f32 %v5429_v35, %v5180_v47  ;;  %v3969_v47 = vshrl.u32 %v10202_v31, 16  ;;  %v3973_v58 = vshll.u32 %v10227_v53, 16 }
 0x40a   :  { %v6251_v14 = vpop.f32.mrf.mxu0  ;;  %7125 = vmatmul.msk.bf16.gmra.mxu2 %vm788_vm6, %v4810_v40  ;;  %v6009_v40 = vor.u32 %v6007_v7, %v6005_v52 }
 0x40b   :  { %v6368_v17 = vadd.f32 %v6251_v14, %v5546_v51  ;;  %v4823_v51 = vrot.slane %v4821_v34, 3  ;;  %v4826_v14 = vrot.slane %v4824_v44, 4  ;;  %v3971_v6 = vor.u32 %v3969_v47, %v3967_v3 }
 0x40c   :  { %v4210_v11 = vpop.f32.mrf.mxu1  ;;  %v6014_v55 = vsel %vm1718_vm7, %v6009_v40, %v6013_v38  ;;  %v3983_v44 = vrot.slane %v3981_v42, 1 }
 0x40d   :  { %v6432_v36 = vmax.f32 %v6368_v17, 0.0  ;;  %7158 = vmatmul.msk.bf16.gmra.mxu3 %vm788_vm6, %v7895_v16  ;;  %v5066_v49 = vpop.f32.mrf.mxu2  ;;  %v4324_v22 = vadd.f32 %v4210_v11, %v9441_v41  ;;  %v3975_v17 = vrot.slane %v3973_v58, 1 }
 0x40e   :  { %v5181_v29 = vadd.f32 %v5066_v49, %v4323_v19  ;;  %v4827_v19 = vor.u32 %v4826_v14, %v4823_v51 }
 0x40f   :  { %v6496_v46 = vpack.c.bf16 %v6432_v36, %v6432_v36  ;;  %v10723_v36 = vld [vmem:[#allocation30_spill] sm:$0xff]  ;;  %v3976_v30 = vsel %vm1718_vm7, %v3971_v6, %v3975_v17 }
 0x410   :  { %v5432_v9 = vpop.f32.mrf.mxu3  ;;  %v4828_v25 = vsel %vm491_vm5, %v4818_v20, %v4827_v19 }
 0x411   :  { %6561 = vst.msk [vmem:[%s10634_s5 + $0x74] sm:$0xf] %vm6531_vm8, %v6496_v46  ;;  %v5547_v28 = vadd.f32 %v5432_v9, %v5181_v29  ;;  %v10254_v29 = vld [vmem:[#allocation2 + $0x100] sm:$0xff] }
 0x412   :  { %v6254_v63 = vpop.f32.mrf.mxu0 }
 0x413   :  { %v6369_v1 = vadd.f32 %v6254_v63, %v5547_v28  ;;  %v7897_v63 = vld [vmem:[#allocation2 + $0xf8] sm:$0xff]  }
 0x414   :  { %v4213_v39 = vpop.f32.mrf.mxu1 }
 0x415   :  { %7319 = vmatmul.msk.bf16.gmra.mxu0 %vm788_vm6, %v6006_v56  ;;  %v6433_v13 = vmax.f32 %v6369_v1, 0.0  ;;  %v5068_v0 = vpop.f32.mrf.mxu2  ;;  %v4325_v61 = vadd.f32 %v4213_v39, %v10722_v57  ;;  %v6015_v56 = vshrl.u32 %v10219_v15, 16  ;;  %v6019_v1 = vshll.u32 %v10254_v29, 16 }
 0x416   :  { %v5182_v50 = vadd.f32 %v5068_v0, %v4324_v22  ;;  %v4830_v22 = vshrl.u32 %v8565_v8, 16  ;;  %v10724_v0 = vld [vmem:[#allocation31_spill] sm:$0xff] }
 0x417   :  { %v6497_v5 = vpack.c.bf16 %v6433_v13, %v6433_v13  ;;  %7093 = vmatmul.msk.bf16.gmra.mxu1 %vm788_vm6, %v3968_v48  ;;  %v4833_v13 = vshll.u32 %v8565_v8, 16 }
 0x418   :  { %v5434_v59 = vpop.f32.mrf.mxu3 }
 0x419   :  { %6562 = vst.msk [vmem:[%s10634_s5 + $0x78] sm:$0xf] %vm6531_vm8, %v6497_v5  ;;  %v5548_v41 = vadd.f32 %v5434_v59, %v5182_v50  ;;  %v6017_v59 = vor.u32 %v6015_v56, %v6013_v38  ;;  %v4835_v7 = vrot.slane %v4833_v13, 4 }
 0x41a   :  { %6610 = vst.msk [vmem:[%s10634_s5 + $0x78] sm:$0xf] %vm6531_vm8, %v10721_v54  ;;  %v6256_v62 = vpop.f32.mrf.mxu0  ;;  %7126 = vmatmul.msk.bf16.gmra.mxu2 %vm788_vm6, %v4819_v33  ;;  %v3977_v33 = vshrl.u32 %v10227_v53, 16 }
 0x41b   :  { %v6370_v37 = vadd.f32 %v6256_v62, %v5548_v41  ;;  %v6021_v41 = vrot.slane %v6019_v1, 1 }
 0x41c   :  { %v4215_v45 = vpop.f32.mrf.mxu1  ;;  %v3979_v34 = vor.u32 %v3977_v33, %v3975_v17  ;;  %v10290_v17 = vld [vmem:[#allocation2 + $0x100] sm:$0xff] }
 0x41d   :  { %v6434_v32 = vmax.f32 %v6370_v37, 0.0  ;;  %7159 = vmatmul.msk.bf16.gmra.mxu3 %vm788_vm6, %v7896_v43  ;;  %v5071_v24 = vpop.f32.mrf.mxu2  ;;  %v4326_v49 = vadd.f32 %v4215_v45, %v10723_v36  ;;  %v4832_v43 = vrot.slane %v4830_v22, 3  ;;  %v6022_v53 = vsel %vm1718_vm7, %v6017_v59, %v6021_v41 }
 0x41e   :  { %v5183_v35 = vadd.f32 %v5071_v24, %v4325_v61  ;;  %v10725_v24 = vld [vmem:[#allocation32_spill] sm:$0xff]  ;;  %v3984_v38 = vsel %vm1718_vm7, %v3979_v34, %v3983_v44  ;;  %v3989_v8 = vshll.u32 %v10290_v17, 16  ;;  %v8569_v34 = vld [vmem:[#allocation2 + $0x114] sm:$0xff]  }
 0x41f   :  { %v6498_v4 = vpack.c.bf16 %v6434_v32, %v6434_v32  ;;  %v10276_v32 = vor.u32 %v4835_v7, %v4832_v43  ;;  %v10328_v7 = vld [vmem:[#allocation2 + $0x110] sm:$0xff] }
 0x420   :  { %v5437_v16 = vpop.f32.mrf.mxu3  ;;  %v3991_v13 = vrot.slane %v3989_v8, 1  ;;  %v10729_v8 = vld [vmem:[#allocation13_spill] sm:$0xff] }
 0x421   :  { %6563 = vst.msk [vmem:[%s10634_s5 + $0x7c] sm:$0xf] %vm6531_vm8, %v6498_v4  ;;  %v5549_v23 = vadd.f32 %v5437_v16, %v5183_v35  ;;  %v10281_v4 = vld [vmem:[#allocation2 + $0x108] sm:$0xff]  ;;  %v4837_v14 = vsel %vm491_vm5, %v4827_v19, %v10276_v32 }
 0x422   :  { %6611 = vst.msk [vmem:[%s10634_s5 + $0x7c] sm:$0xf] %vm6531_vm8, %v10721_v54  ;;  %v6259_v31 = vpop.f32.mrf.mxu0  ;;  %v8567_v16 = vld [vmem:[#allocation2 + $0x10c] sm:$0xff]   ;;  %v6027_v19 = vshll.u32 %v10281_v4, 16 }
 0x423   :  { %v6371_v12 = vadd.f32 %v6259_v31, %v5549_v23 }
 0x424   :  { %v4218_v2 = vpop.f32.mrf.mxu1 }
 0x425   :  { %7320 = vmatmul.msk.bf16.gmra.mxu0 %vm788_vm6, %v6014_v55  ;;  %v6435_v11 = vmax.f32 %v6371_v12, 0.0  ;;  %v5073_v21 = vpop.f32.mrf.mxu2  ;;  %v4327_v39 = vadd.f32 %v4218_v2, %v10724_v0  ;;  %v7898_v55 = vld [vmem:[#allocation2 + $0x100] sm:$0xff]   ;;  %v6023_v12 = vshrl.u32 %v10254_v29, 16 }
 0x426   :  { %v5184_v52 = vadd.f32 %v5073_v21, %v4326_v49  ;;  %v4839_v49 = vshrl.u32 %v8567_v16, 16  ;;  %v10726_v21 = vld [vmem:[#allocation33_spill] sm:$0xff] }
 0x427   :  { %v6499_v46 = vpack.c.bf16 %v6435_v11, %v6435_v11  ;;  %7094 = vmatmul.msk.bf16.gmra.mxu1 %vm788_vm6, %v3976_v30  ;;  %v4842_v11 = vshll.u32 %v8567_v16, 16 }
 0x428   :  { %v5439_v9 = vpop.f32.mrf.mxu3 }
 0x429   :  { %6564 = vst.msk [vmem:[%s10634_s5 + $0x80] sm:$0xf] %vm6531_vm8, %v6499_v46  ;;  %v5550_v28 = vadd.f32 %v5439_v9, %v5184_v52  ;;  %v6025_v9 = vor.u32 %v6023_v12, %v6021_v41  ;;  %v4844_v56 = vrot.slane %v4842_v11, 4 }
 0x42a   :  { %v6261_v3 = vpop.f32.mrf.mxu0  ;;  %7127 = vmatmul.msk.bf16.gmra.mxu2 %vm788_vm6, %v4828_v25  ;;  %v3985_v25 = vshrl.u32 %v10262_v10, 16  ;;  %v6644_v10 = vld [vmem:[%s10635_s2 + $0xf0] sm:$0xf] }
 0x42b   :  { %v6372_v20 = vadd.f32 %v6261_v3, %v5550_v28  ;;  %v6029_v28 = vrot.slane %v6027_v19, 1  ;;  %242 = vst.msk [vmem:[#allocation2 + $0x120] sm:$0xf] %vm105_vm1, %v6644_v10 }
 0x42c   :  { %v4220_v5 = vpop.f32.mrf.mxu1  ;;  %v3987_v22 = vor.u32 %v3985_v25, %v3983_v44  ;;  %254 = vst.msk [vmem:[#allocation2 + $0x120] sm:$0xf] %vm105_vm1, %v10721_v54 }
 0x42d   :  { %v6436_v48 = vmax.f32 %v6372_v20, 0.0  ;;  %7160 = vmatmul.msk.bf16.gmra.mxu3 %vm788_vm6, %v7897_v63  ;;  %v5076_v50 = vpop.f32.mrf.mxu2  ;;  %v4328_v45 = vadd.f32 %v4220_v5, %v10725_v24  ;;  %v4841_v63 = vrot.slane %v4839_v49, 3  ;;  %v10727_v5 = vld [vmem:[#allocation9_spill] sm:$0xff] }
 0x42e   :  { %v5185_v62 = vadd.f32 %v5076_v50, %v4327_v39  ;;  %v6030_v39 = vsel %vm1718_vm7, %v6025_v9, %v6029_v28  ;;  %v7899_v24 = vld [vmem:[#allocation2 + $0x108] sm:$0xff]  }
 0x42f   :  { %v6500_v15 = vpack.c.bf16 %v6436_v48, %v6436_v48  ;;  %v10317_v50 = vor.u32 %v4844_v56, %v4841_v63  ;;  %v6647_v56 = vld [vmem:[%s10635_s2 + $0xfc] sm:$0xf] }
 0x430   :  { %v5442_v18 = vpop.f32.mrf.mxu3  ;;  %245 = vst.msk [vmem:[#allocation2 + $0x12c] sm:$0xf] %vm105_vm1, %v6647_v56 }
 0x431   :  { %6565 = vst.msk [vmem:[%s10634_s5 + $0x84] sm:$0xf] %vm6531_vm8, %v6500_v15  ;;  %v5551_v37 = vadd.f32 %v5442_v18, %v5185_v62  ;;  %v3992_v62 = vsel %vm1718_vm7, %v3987_v22, %v3991_v13  ;;  %v6645_v15 = vld [vmem:[%s10635_s2 + $0xf4] sm:$0xf] }
 0x432   :  { %v6264_v57 = vpop.f32.mrf.mxu0  ;;  %243 = vst.msk [vmem:[#allocation2 + $0x124] sm:$0xf] %vm105_vm1, %v6645_v15  ;;  %v10730_v15 = vld [vmem:[#allocation15_spill] sm:$0xff] }
 0x433   :  { %v6373_v61 = vadd.f32 %v6264_v57, %v5551_v37  ;;  %v4846_v37 = vsel %vm491_vm5, %v10276_v32, %v10317_v50  ;;  %255 = vst.msk [vmem:[#allocation2 + $0x124] sm:$0xf] %vm105_vm1, %v10721_v54  ;;  %v6031_v32 = vshrl.u32 %v10281_v4, 16  ;;  %v8571_v10 = vld [vmem:[#allocation2 + $0x11c] sm:$0xff]  }
 0x434   :  { %v4223_v40 = vpop.f32.mrf.mxu1  ;;  %257 = vst.msk [vmem:[#allocation2 + $0x12c] sm:$0xf] %vm105_vm1, %v10721_v54 }
 0x435   :  { %7321 = vmatmul.msk.bf16.gmra.mxu0 %vm788_vm6, %v6022_v53  ;;  %v6437_v47 = vmax.f32 %v6373_v61, 0.0  ;;  %v5078_v58 = vpop.f32.mrf.mxu2  ;;  %v4329_v2 = vadd.f32 %v4223_v40, %v10726_v21  ;;  %v10341_v53 = vld [vmem:[#allocation2 + $0x108] sm:$0xff]  ;;  %v4851_v40 = vshll.u32 %v8569_v34, 16 }
 0x436   :  { %v5186_v35 = vadd.f32 %v5078_v58, %v4328_v45  ;;  %v6035_v45 = vshll.u32 %v10328_v7, 16  ;;  %v4848_v58 = vshrl.u32 %v8569_v34, 16 }
 0x437   :  { %v6501_v51 = vpack.c.bf16 %v6437_v47, %v6437_v47  ;;  %7095 = vmatmul.msk.bf16.gmra.mxu1 %vm788_vm6, %v3984_v38  ;;  %v10728_v38 = vld [vmem:[#allocation11_spill] sm:$0xff] }
 0x438   :  { %v5444_v23 = vpop.f32.mrf.mxu3  ;;  %v4850_v19 = vrot.slane %v4848_v58, 3 }
 0x439   :  { %6566 = vst.msk [vmem:[%s10634_s5 + $0x88] sm:$0xf] %vm6531_vm8, %v6501_v51  ;;  %v5552_v6 = vadd.f32 %v5444_v23, %v5186_v35  ;;  %v3993_v23 = vshrl.u32 %v10290_v17, 16  ;;  %v6646_v17 = vld [vmem:[%s10635_s2 + $0xf8] sm:$0xf] }
 0x43a   :  { %6612 = vst.msk [vmem:[%s10634_s5 + $0x88] sm:$0xf] %vm6531_vm8, %v10721_v54  ;;  %v6266_v31 = vpop.f32.mrf.mxu0  ;;  %7128 = vmatmul.msk.bf16.gmra.mxu2 %vm788_vm6, %v4837_v14 }
 0x43b   :  { %v6374_v36 = vadd.f32 %v6266_v31, %v5552_v6  ;;  %v3997_v6 = vshll.u32 %v10341_v53, 16  ;;  %v6033_v31 = vor.u32 %v6031_v32, %v6029_v28  ;;  %v3995_v21 = vor.u32 %v3993_v23, %v3991_v13  ;;  %244 = vst.msk [vmem:[#allocation2 + $0x128] sm:$0xf] %vm105_vm1, %v6646_v17  ;;  %v10731_v23 = vld [vmem:[#allocation17_spill] sm:$0xff] }
 0x43c   :  { %v4225_v46 = vpop.f32.mrf.mxu1  ;;  %256 = vst.msk [vmem:[#allocation2 + $0x128] sm:$0xf] %vm105_vm1, %v10721_v54 }
 0x43d   :  { %v6438_v30 = vmax.f32 %v6374_v36, 0.0  ;;  %7161 = vmatmul.msk.bf16.gmra.mxu3 %vm788_vm6, %v7898_v55  ;;  %v5081_v52 = vpop.f32.mrf.mxu2  ;;  %v4330_v33 = vadd.f32 %v4225_v46, %v10727_v5  ;;  %v6037_v55 = vrot.slane %v6035_v45, 1  ;;  %v4853_v36 = vrot.slane %v4851_v40, 4  ;;  %v7900_v5 = vld [vmem:[#allocation2 + $0x110] sm:$0xff]  }
 0x43e   :  { %v5187_v3 = vadd.f32 %v5081_v52, %v4329_v2  ;;  %v3999_v2 = vrot.slane %v3997_v6, 1 }
 0x43f   :  { %v6502_v29 = vpack.c.bf16 %v6438_v30, %v6438_v30  ;;  %v6038_v52 = vsel %vm1718_vm7, %v6033_v31, %v6037_v55  ;;  %v10359_v25 = vor.u32 %v4853_v36, %v4850_v19  ;;  %v10409_v36 = vld [vmem:[#allocation2 + $0x120] sm:$0xff] }
 0x440   :  { %v5447_v1 = vpop.f32.mrf.mxu3  ;;  %v4000_v63 = vsel %vm1718_vm7, %v3995_v21, %v3999_v2 }
 0x441   :  { %6567 = vst.msk [vmem:[%s10634_s5 + $0x8c] sm:$0xf] %vm6531_vm8, %v6502_v29  ;;  %v5553_v20 = vadd.f32 %v5447_v1, %v5187_v3  ;;  %v4855_v13 = vsel %vm491_vm5, %v10317_v50, %v10359_v25 }
 0x442   :  { %6613 = vst.msk [vmem:[%s10634_s5 + $0x8c] sm:$0xf] %vm6531_vm8, %v10721_v54  ;;  %v6269_v0 = vpop.f32.mrf.mxu0 }
 0x443   :  { %v6375_v48 = vadd.f32 %v6269_v0, %v5553_v20  ;;  %v10369_v20 = vld [vmem:[#allocation2 + $0x118] sm:$0xff]  ;;  %v8572_v21 = vld [vmem:[#allocation2 + $0x124] sm:$0xff]  }
 0x444   :  { %v4228_v41 = vpop.f32.mrf.mxu1 }
 0x445   :  { %7322 = vmatmul.msk.bf16.gmra.mxu0 %vm788_vm6, %v6030_v39  ;;  %v6439_v42 = vmax.f32 %v6375_v48, 0.0  ;;  %v5083_v59 = vpop.f32.mrf.mxu2  ;;  %v4331_v35 = vadd.f32 %v4228_v41, %v10728_v38  ;;  %v10382_v48 = vld [vmem:[#allocation2 + $0x110] sm:$0xff]  ;;  %v4857_v41 = vshrl.u32 %v8571_v10, 16 }
 0x446   :  { %v5188_v43 = vadd.f32 %v5083_v59, %v4330_v33  ;;  %v6039_v33 = vshrl.u32 %v10328_v7, 16 }
 0x447   :  { %v6503_v18 = vpack.c.bf16 %v6439_v42, %v6439_v42  ;;  %7096 = vmatmul.msk.bf16.gmra.mxu1 %vm788_vm6, %v3992_v62  ;;  %v6043_v42 = vshll.u32 %v10369_v20, 16  ;;  %v4860_v62 = vshll.u32 %v8571_v10, 16  ;;  %v4859_v45 = vrot.slane %v4857_v41, 3 }
 0x448   :  { %v5449_v44 = vpop.f32.mrf.mxu3 }
 0x449   :  { %6568 = vst.msk [vmem:[%s10634_s5 + $0x90] sm:$0xf] %vm6531_vm8, %v6503_v18  ;;  %v5554_v57 = vadd.f32 %v5449_v44, %v5188_v43  ;;  %v4001_v44 = vshrl.u32 %v10341_v53, 16 }
 0x44a   :  { %v6271_v61 = vpop.f32.mrf.mxu0  ;;  %7129 = vmatmul.msk.bf16.gmra.mxu2 %vm788_vm6, %v4846_v37 }
 0x44b   :  { %v6376_v47 = vadd.f32 %v6271_v61, %v5554_v57  ;;  %v4005_v57 = vshll.u32 %v10382_v48, 16  ;;  %v6041_v61 = vor.u32 %v6039_v33, %v6037_v55  ;;  %v4003_v38 = vor.u32 %v4001_v44, %v3999_v2 }
 0x44c   :  { %v4230_v16 = vpop.f32.mrf.mxu1 }
 0x44d   :  { %v6440_v51 = vmax.f32 %v6376_v47, 0.0  ;;  %7162 = vmatmul.msk.bf16.gmra.mxu3 %vm788_vm6, %v7899_v24  ;;  %v5086_v14 = vpop.f32.mrf.mxu2  ;;  %v4332_v9 = vadd.f32 %v4230_v16, %v10729_v8  ;;  %v6045_v24 = vrot.slane %v6043_v42, 1  ;;  %v4862_v47 = vrot.slane %v4860_v62, 4 }
 0x44e   :  { %v5189_v12 = vadd.f32 %v5086_v14, %v4331_v35  ;;  %v4007_v35 = vrot.slane %v4005_v57, 1  ;;  %v6047_v8 = vshrl.u32 %v10369_v20, 16  ;;  %v10733_v57 = vld [vmem:[#allocation21_spill] sm:$0xff] }
 0x44f   :  { %v6504_v4 = vpack.c.bf16 %v6440_v51, %v6440_v51  ;;  %v6046_v51 = vsel %vm1718_vm7, %v6041_v61, %v6045_v24  ;;  %v4863_v16 = vor.u32 %v4862_v47, %v4859_v45 }
 0x450   :  { %v5452_v49 = vpop.f32.mrf.mxu3 }
 0x451   :  { %6569 = vst.msk [vmem:[%s10634_s5 + $0x94] sm:$0xf] %vm6531_vm8, %v6504_v4  ;;  %v5555_v11 = vadd.f32 %v5452_v49, %v5189_v12  ;;  %v4008_v4 = vsel %vm1718_vm7, %v4003_v38, %v4007_v35 }
 0x452   :  { %v6274_v30 = vpop.f32.mrf.mxu0 }
 0x453   :  { %v6377_v46 = vadd.f32 %v6274_v30, %v5555_v11  ;;  %v4864_v11 = vsel %vm491_vm5, %v10359_v25, %v4863_v16  ;;  %v10418_v30 = vld [vmem:[#allocation2 + $0x118] sm:$0xff]  ;;  %v6051_v25 = vshll.u32 %v10409_v36, 16 }
 0x454   :  { %v4233_v29 = vpop.f32.mrf.mxu1  ;;  %v4013_v10 = vshll.u32 %v10418_v30, 16 }
 0x455   :  { %7323 = vmatmul.msk.bf16.gmra.mxu0 %vm788_vm6, %v6038_v52  ;;  %v6441_v28 = vmax.f32 %v6377_v46, 0.0  ;;  %v5088_v3 = vpop.f32.mrf.mxu2  ;;  %v4333_v43 = vadd.f32 %v4233_v29, %v10730_v15  ;;  %v7901_v46 = vld [vmem:[#allocation2 + $0x118] sm:$0xff]  }
 0x456   :  { %v5190_v1 = vadd.f32 %v5088_v3, %v4332_v9  ;;  %v4869_v3 = vshll.u32 %v8572_v21, 16  ;;  %v10732_v29 = vld [vmem:[#allocation19_spill] sm:$0xff]  ;;  %v4015_v15 = vrot.slane %v4013_v10, 1 }
 0x457   :  { %v6505_v22 = vpack.c.bf16 %v6441_v28, %v6441_v28  ;;  %7097 = vmatmul.msk.bf16.gmra.mxu1 %vm788_vm6, %v4000_v63  ;;  %v4866_v28 = vshrl.u32 %v8572_v21, 16 }
 0x458   :  { %v5454_v0 = vpop.f32.mrf.mxu3  ;;  %v4871_v33 = vrot.slane %v4869_v3, 4 }
 0x459   :  { %6570 = vst.msk [vmem:[%s10634_s5 + $0x98] sm:$0xf] %vm6531_vm8, %v6505_v22  ;;  %v5556_v39 = vadd.f32 %v5454_v0, %v5190_v1  ;;  %v6049_v0 = vor.u32 %v6047_v8, %v6045_v24 }
 0x45a   :  { %6614 = vst.msk [vmem:[%s10634_s5 + $0x98] sm:$0xf] %vm6531_vm8, %v10721_v54  ;;  %v6276_v50 = vpop.f32.mrf.mxu0  ;;  %7130 = vmatmul.msk.bf16.gmra.mxu2 %vm788_vm6, %v4855_v13  ;;  %v4009_v13 = vshrl.u32 %v10382_v48, 16 }
 0x45b   :  { %v6378_v59 = vadd.f32 %v6276_v50, %v5556_v39  ;;  %v6053_v39 = vrot.slane %v6051_v25, 1 }
 0x45c   :  { %v4235_v34 = vpop.f32.mrf.mxu1  ;;  %v4011_v62 = vor.u32 %v4009_v13, %v4007_v35 }
 0x45d   :  { %v6442_v18 = vmax.f32 %v6378_v59, 0.0  ;;  %7163 = vmatmul.msk.bf16.gmra.mxu3 %vm788_vm6, %v7900_v5  ;;  %v5091_v37 = vpop.f32.mrf.mxu2  ;;  %v4334_v6 = vadd.f32 %v4235_v34, %v10731_v23  ;;  %v4868_v5 = vrot.slane %v4866_v28, 3  ;;  %v10427_v59 = vld [vmem:[#allocation2 + $0x128] sm:$0xff]  }
 0x45e   :  { %v5191_v32 = vadd.f32 %v5091_v37, %v4333_v43  ;;  %v6054_v43 = vsel %vm1718_vm7, %v6049_v0, %v6053_v39  ;;  %v7807_v44 = vunpack.c.h.b16 %v10427_v59  ;;  %v4016_v45 = vsel %vm1718_vm7, %v4011_v62, %v4015_v15 }
 0x45f   :  { %v6506_v7 = vpack.c.bf16 %v6442_v18, %v6442_v18  ;;  %v3599_v18 = vld [vmem:[#allocation2 + $0x120] sm:$0x1]  ;;  %v10434_v34 = vor.u32 %v4871_v33, %v4868_v5 }
 0x460   :  { %v5457_v58 = vpop.f32.mrf.mxu3  ;;  %v3731_v47 = vunpack.c.l.b16 %v3599_v18 }
 0x461   :  { %6571 = vst.msk [vmem:[%s10634_s5 + $0x9c] sm:$0xf] %vm6531_vm8, %v6506_v7  ;;  %v5557_v40 = vadd.f32 %v5457_v58, %v5191_v32  ;;  %v4873_v35 = vsel %vm491_vm5, %v4863_v16, %v10434_v34  ;;  %v7902_v16 = vld [vmem:[#allocation2 + $0x120] sm:$0xff]  }
 0x462   :  { %6615 = vst.msk [vmem:[%s10634_s5 + $0x9c] sm:$0xf] %vm6531_vm8, %v10721_v54  ;;  %v6279_v53 = vpop.f32.mrf.mxu0  ;;  %v3764_v23 = vpack.c.b16 %v3731_v47, %v3731_v47 }
 0x463   :  { %v6379_v14 = vadd.f32 %v6279_v53, %v5557_v40  ;;  %v10440_v40 = vld [vmem:[#allocation2 + $0x128] sm:$0xff]  ;;  %v4586_v53 = vpack.c.b16 %v7807_v44, %v7807_v44 }
 0x464   :  { %v4238_v12 = vpop.f32.mrf.mxu1 }
 0x465   :  { %7324 = vmatmul.msk.bf16.gmra.mxu0 %vm788_vm6, %v6046_v51  ;;  %v6443_v31 = vmax.f32 %v6379_v14, 0.0  ;;  %v5093_v55 = vpop.f32.mrf.mxu2  ;;  %v4335_v63 = vadd.f32 %v4238_v12, %v10732_v29  ;;  %v5645_v29 = vld [vmem:[#allocation2 + $0x130] sm:$0x1] }
 0x466   :  { %v5192_v19 = vadd.f32 %v5093_v55, %v4334_v6  ;;  %v6059_v55 = vshll.u32 %v10440_v40, 16  ;;  %v5777_v10 = vunpack.c.l.b16 %v5645_v29 }
 0x467   :  { %v6507_v49 = vpack.c.bf16 %v6443_v31, %v6443_v31  ;;  %7098 = vmatmul.msk.bf16.gmra.mxu1 %vm788_vm6, %v4008_v4  ;;  %v6055_v31 = vshrl.u32 %v10409_v36, 16  ;;  %v4875_v4 = vshrl.u32 %v4586_v53, 16 }
 0x468   :  { %v5459_v2 = vpop.f32.mrf.mxu3  ;;  %v6061_v25 = vrot.slane %v6059_v55, 1 }
 0x469   :  { %6572 = vst.msk [vmem:[%s10634_s5 + $0xa0] sm:$0xf] %vm6531_vm8, %v6507_v49  ;;  %v5558_v17 = vadd.f32 %v5459_v2, %v5192_v19  ;;  %v4878_v19 = vshll.u32 %v4586_v53, 16  ;;  %v10734_v49 = vld [vmem:[#allocation23_spill] sm:$0xff]  ;;  %v6057_v8 = vor.u32 %v6055_v31, %v6053_v39  ;;  %v4877_v36 = vrot.slane %v4875_v4, 3 }
 0x46a   :  { %v6281_v52 = vpop.f32.mrf.mxu0  ;;  %7131 = vmatmul.msk.bf16.gmra.mxu2 %vm788_vm6, %v4864_v11 }
 0x46b   :  { %v6380_v9 = vadd.f32 %v6281_v52, %v5558_v17  ;;  %v4017_v52 = vshrl.u32 %v10418_v30, 16  ;;  %v4880_v3 = vrot.slane %v4878_v19, 4  ;;  %v6062_v13 = vsel %vm1718_vm7, %v6057_v8, %v6061_v25 }
 0x46c   :  { %v4240_v22 = vpop.f32.mrf.mxu1 }
 0x46d   :  { %v6444_v56 = vmax.f32 %v6380_v9, 0.0  ;;  %7164 = vmatmul.msk.bf16.gmra.mxu3 %vm788_vm6, %v7901_v46  ;;  %v5096_v1 = vpop.f32.mrf.mxu2  ;;  %v4336_v61 = vadd.f32 %v4240_v22, %v10733_v57  ;;  %v4021_v46 = vshll.u32 %v3764_v23, 16  ;;  %v4881_v39 = vor.u32 %v4880_v3, %v4877_v36 }
 0x46e   :  { %v5193_v50 = vadd.f32 %v5096_v1, %v4335_v63  ;;  %v4019_v1 = vor.u32 %v4017_v52, %v4015_v15  ;;  %v5810_v15 = vpack.c.b16 %v5777_v10, %v5777_v10  ;;  %v6063_v57 = vshrl.u32 %v10440_v40, 16 }
 0x46f   :  { %v6508_v20 = vpack.c.bf16 %v6444_v56, %v6444_v56  ;;  %v4023_v22 = vrot.slane %v4021_v46, 1 }
 0x470   :  { %v5462_v42 = vpop.f32.mrf.mxu3 }
 0x471   :  { %6573 = vst.msk [vmem:[%s10634_s5 + $0xa4] sm:$0xf] %vm6531_vm8, %v6508_v20  ;;  %v5559_v41 = vadd.f32 %v5462_v42, %v5193_v50  ;;  %v10735_v50 = vld [vmem:[#allocation25_spill] sm:$0xff] }
 0x472   :  { %v6284_v48 = vpop.f32.mrf.mxu0 }
 0x473   :  { %v6381_v37 = vadd.f32 %v6284_v48, %v5559_v41  ;;  %v4024_v41 = vsel %vm1718_vm7, %v4019_v1, %v4023_v22 }
 0x474   :  { %v4243_v7 = vpop.f32.mrf.mxu1 }
 0x475   :  { %7325 = vmatmul.msk.bf16.gmra.mxu0 %vm788_vm6, %v6054_v43  ;;  %v6445_v24 = vmax.f32 %v6381_v37, 0.0  ;;  %v5098_v32 = vpop.f32.mrf.mxu2  ;;  %v4337_v11 = vadd.f32 %v4243_v7, %v10734_v49  ;;  %v4882_v43 = vsel %vm491_vm5, %v10434_v34, %v4881_v39 }
 0x476   :  { %v5194_v58 = vadd.f32 %v5098_v32, %v4336_v61  ;;  %v6067_v61 = vshll.u32 %v5810_v15, 16  ;;  %v10736_v32 = vld [vmem:[#allocation27_spill] sm:$0xff] }
 0x477   :  { %v6509_v38 = vpack.c.bf16 %v6445_v24, %v6445_v24  ;;  %7099 = vmatmul.msk.bf16.gmra.mxu1 %vm788_vm6, %v4016_v45 }
 0x478   :  { %v5464_v51 = vpop.f32.mrf.mxu3 }
 0x479   :  { %6574 = vst.msk [vmem:[%s10634_s5 + $0xa8] sm:$0xf] %vm6531_vm8, %v6509_v38  ;;  %v5560_v14 = vadd.f32 %v5464_v51, %v5194_v58  ;;  %v6065_v58 = vor.u32 %v6063_v57, %v6061_v25  ;;  %v6069_v38 = vrot.slane %v6067_v61, 1  ;;  %v10741_v61 = vld [vmem:[#allocation7_spill] sm:$0xff] }
 0x47a   :  { %6616 = vst.msk [vmem:[%s10634_s5 + $0xa8] sm:$0xf] %vm6531_vm8, %v10721_v54  ;;  %v6286_v6 = vpop.f32.mrf.mxu0  ;;  %7132 = vmatmul.msk.bf16.gmra.mxu2 %vm788_vm6, %v4873_v35 }
 0x47b   :  { %v6382_v12 = vadd.f32 %v6286_v6, %v5560_v14  ;;  %v6070_v23 = vsel %vm1718_vm7, %v6065_v58, %v6069_v38 }
 0x47c   :  { %v4245_v17 = vpop.f32.mrf.mxu1 }
 0x47d   :  { %v6446_v21 = vmax.f32 %v6382_v12, 0.0  ;;  %7165 = vmatmul.msk.bf16.gmra.mxu3 %vm788_vm6, %v7902_v16  ;;  %v5101_v2 = vpop.f32.mrf.mxu2  ;;  %v4338_v20 = vadd.f32 %v4245_v17, %v10735_v50  ;;  %v10737_v16 = vld [vmem:[#allocation3_spill] sm:$0xff]  ;;  %v10738_v17 = vld [vmem:[#allocation4_spill] sm:$0xff] }
 0x47e   :  { %v5195_v9 = vadd.f32 %v5101_v2, %v4337_v11 }
 0x47f   :  { %v6510_v28 = vpack.c.bf16 %v6446_v21, %v6446_v21 }
 0x480   :  { %v5467_v63 = vpop.f32.mrf.mxu3 }
 0x481   :  { %6575 = vst.msk [vmem:[%s10634_s5 + $0xac] sm:$0xf] %vm6531_vm8, %v6510_v28  ;;  %v5561_v56 = vadd.f32 %v5467_v63, %v5195_v9 }
 0x482   :  { %6617 = vst.msk [vmem:[%s10634_s5 + $0xac] sm:$0xf] %vm6531_vm8, %v10721_v54  ;;  %v6289_v30 = vpop.f32.mrf.mxu0 }
 0x483   :  { %v6383_v0 = vadd.f32 %v6289_v30, %v5561_v56  ;;  %v10739_v56 = vld [vmem:[#allocation5_spill] sm:$0xff] }
 0x484   :  { %v4248_v42 = vpop.f32.mrf.mxu1 }
 0x485   :  { %7326 = vmatmul.msk.bf16.gmra.mxu0 %vm788_vm6, %v6062_v13  ;;  %v6447_v5 = vmax.f32 %v6383_v0, 0.0  ;;  %v5103_v33 = vpop.f32.mrf.mxu2  ;;  %v4339_v7 = vadd.f32 %v4248_v42, %v10736_v32 }
 0x486   :  { %v5196_v62 = vadd.f32 %v5103_v33, %v4338_v20  ;;  %v10740_v33 = vld [vmem:[#allocation6_spill] sm:$0xff] }
 0x487   :  { %v6511_v48 = vpack.c.bf16 %v6447_v5, %v6447_v5  ;;  %7100 = vmatmul.msk.bf16.gmra.mxu1 %vm788_vm6, %v4024_v41 }
 0x488   :  { %v5469_v18 = vpop.f32.mrf.mxu3 }
 0x489   :  { %6576 = vst.msk [vmem:[%s10634_s5 + $0xb0] sm:$0xf] %vm6531_vm8, %v6511_v48  ;;  %v5562_v37 = vadd.f32 %v5469_v18, %v5196_v62 }
 0x48a   :  { %v6291_v44 = vpop.f32.mrf.mxu0  ;;  %7133 = vmatmul.msk.bf16.gmra.mxu2 %vm788_vm6, %v4882_v43 }
 0x48b   :  { %v6384_v24 = vadd.f32 %v6291_v44, %v5562_v37 }
 0x48c   :  { %v4250_v47 = vpop.f32.mrf.mxu1 }
 0x48d   :  { %v6448_v45 = vmax.f32 %v6384_v24, 0.0  ;;  %7166 = vmatmul.msk.bf16.gmra.mxu3 %vm788_vm6, %v10427_v59  ;;  %v5106_v34 = vpop.f32.mrf.mxu2  ;;  %v4340_v31 = vadd.f32 %v4250_v47, %v10737_v16 }
 0x48e   :  { %v5197_v35 = vadd.f32 %v5106_v34, %v4339_v7 }
 0x48f   :  { %v6512_v53 = vpack.c.bf16 %v6448_v45, %v6448_v45 }
 0x490   :  { %v5472_v51 = vpop.f32.mrf.mxu3 }
 0x491   :  { %6577 = vst.msk [vmem:[%s10634_s5 + $0xb4] sm:$0xf] %vm6531_vm8, %v6512_v53  ;;  %v5563_v40 = vadd.f32 %v5472_v51, %v5197_v35  ;;  %v10742_v51 = vld [vmem:[#allocation8_spill] sm:$0xff] }
 0x492   :  { %v6294_v14 = vpop.f32.mrf.mxu0 }
 0x493   :  { %v6385_v6 = vadd.f32 %v6294_v14, %v5563_v40 }
 0x494   :  { %v4253_v12 = vpop.f32.mrf.mxu1 }
 0x495   :  { %7327 = vmatmul.msk.bf16.gmra.mxu0 %vm788_vm6, %v6070_v23  ;;  %v6449_v59 = vmax.f32 %v6385_v6, 0.0  ;;  %v5108_v55 = vpop.f32.mrf.mxu2  ;;  %v4341_v52 = vadd.f32 %v4253_v12, %v10738_v17 }
 0x496   :  { %v5198_v4 = vadd.f32 %v5108_v55, %v4340_v31 }
 0x497   :  { %v6513_v19 = vpack.c.bf16 %v6449_v59, %v6449_v59 }
 0x498   :  { %v5474_v49 = vpop.f32.mrf.mxu3 }
 0x499   :  { %6578 = vst.msk [vmem:[%s10634_s5 + $0xb8] sm:$0xf] %vm6531_vm8, %v6513_v19  ;;  %v5564_v11 = vadd.f32 %v5474_v49, %v5198_v4  ;;  %v10743_v19 = vld [vmem:[#allocation10_spill] sm:$0xff] }
 0x49a   :  { %6618 = vst.msk [vmem:[%s10634_s5 + $0xb8] sm:$0xf] %vm6531_vm8, %v10721_v54  ;;  %v6296_v21 = vpop.f32.mrf.mxu0 }
 0x49b   :  { %v6386_v2 = vadd.f32 %v6296_v21, %v5564_v11 }
 0x49c   :  { %v4255_v25 = vpop.f32.mrf.mxu1 }
 0x49d   :  { %v6450_v46 = vmax.f32 %v6386_v2, 0.0  ;;  %v5111_v8 = vpop.f32.mrf.mxu2  ;;  %v4342_v1 = vadd.f32 %v4255_v25, %v10739_v56 }
 0x49e   :  { %v5199_v9 = vadd.f32 %v5111_v8, %v4341_v52 }
 0x49f   :  { %v6514_v28 = vpack.c.bf16 %v6450_v46, %v6450_v46 }
 0x4a0   :  { %v5477_v36 = vpop.f32.mrf.mxu3 }
 0x4a1   :  { %6579 = vst.msk [vmem:[%s10634_s5 + $0xbc] sm:$0xf] %vm6531_vm8, %v6514_v28  ;;  %v5565_v3 = vadd.f32 %v5477_v36, %v5199_v9  ;;  %v10744_v28 = vld [vmem:[#allocation12_spill] sm:$0xff] }
 0x4a2   :  { %6619 = vst.msk [vmem:[%s10634_s5 + $0xbc] sm:$0xf] %vm6531_vm8, %v10721_v54  ;;  %v6299_v29 = vpop.f32.mrf.mxu0 }
 0x4a3   :  { %v6387_v63 = vadd.f32 %v6299_v29, %v5565_v3 }
 0x4a4   :  { %v4258_v13 = vpop.f32.mrf.mxu1 }
 0x4a5   :  { %v6451_v22 = vmax.f32 %v6387_v63, 0.0  ;;  %v5113_v30 = vpop.f32.mrf.mxu2  ;;  %v4343_v42 = vadd.f32 %v4258_v13, %v10740_v33 }
 0x4a6   :  { %v5200_v10 = vadd.f32 %v5113_v30, %v4342_v1 }
 0x4a7   :  { %v6515_v0 = vpack.c.bf16 %v6451_v22, %v6451_v22 }
 0x4a8   :  { %v5479_v39 = vpop.f32.mrf.mxu3 }
 0x4a9   :  { %6580 = vst.msk [vmem:[%s10634_s5 + $0xc0] sm:$0xf] %vm6531_vm8, %v6515_v0  ;;  %v5566_v50 = vadd.f32 %v5479_v39, %v5200_v10  ;;  %v10745_v0 = vld [vmem:[#allocation14_spill] sm:$0xff] }
 0x4aa   :  { %v6301_v20 = vpop.f32.mrf.mxu0 }
 0x4ab   :  { %v6388_v5 = vadd.f32 %v6301_v20, %v5566_v50 }
 0x4ac   :  { %v4260_v15 = vpop.f32.mrf.mxu1 }
 0x4ad   :  { %v6452_v41 = vmax.f32 %v6388_v5, 0.0  ;;  %v5116_v62 = vpop.f32.mrf.mxu2  ;;  %v4344_v24 = vadd.f32 %v4260_v15, %v10741_v61 }
 0x4ae   :  { %v5201_v48 = vadd.f32 %v5116_v62, %v4343_v42 }
 0x4af   :  { %v6516_v43 = vpack.c.bf16 %v6452_v41, %v6452_v41 }
 0x4b0   :  { %v5482_v18 = vpop.f32.mrf.mxu3 }
 0x4b1   :  { %6581 = vst.msk [vmem:[%s10634_s5 + $0xc4] sm:$0xf] %vm6531_vm8, %v6516_v43  ;;  %v5567_v37 = vadd.f32 %v5482_v18, %v5201_v48  ;;  %v10746_v43 = vld [vmem:[#allocation16_spill] sm:$0xff] }
 0x4b2   :  { %v6304_v44 = vpop.f32.mrf.mxu0 }
 0x4b3   :  { %v6389_v57 = vadd.f32 %v6304_v44, %v5567_v37 }
 0x4b4   :  { %v4263_v45 = vpop.f32.mrf.mxu1 }
 0x4b5   :  { %v6453_v32 = vmax.f32 %v6389_v57, 0.0  ;;  %v5118_v7 = vpop.f32.mrf.mxu2  ;;  %v4345_v40 = vadd.f32 %v4263_v45, %v10742_v51 }
 0x4b6   :  { %v5202_v34 = vadd.f32 %v5118_v7, %v4344_v24 }
 0x4b7   :  { %v6517_v47 = vpack.c.bf16 %v6453_v32, %v6453_v32 }
 0x4b8   :  { %v5484_v58 = vpop.f32.mrf.mxu3 }
 0x4b9   :  { %6582 = vst.msk [vmem:[%s10634_s5 + $0xc8] sm:$0xf] %vm6531_vm8, %v6517_v47  ;;  %v5568_v38 = vadd.f32 %v5484_v58, %v5202_v34  ;;  %v10747_v47 = vld [vmem:[#allocation18_spill] sm:$0xff] }
 0x4ba   :  { %6620 = vst.msk [vmem:[%s10634_s5 + $0xc8] sm:$0xf] %vm6531_vm8, %v10721_v54  ;;  %v6306_v35 = vpop.f32.mrf.mxu0 }
 0x4bb   :  { %v6390_v53 = vadd.f32 %v6306_v35, %v5568_v38 }
 0x4bc   :  { %v4265_v6 = vpop.f32.mrf.mxu1 }
 0x4bd   :  { %v6454_v14 = vmax.f32 %v6390_v53, 0.0  ;;  %v5121_v23 = vpop.f32.mrf.mxu2  ;;  %v4346_v49 = vadd.f32 %v4265_v6, %v10743_v19 }
 0x4be   :  { %v5203_v16 = vadd.f32 %v5121_v23, %v4345_v40 }
 0x4bf   :  { %v6518_v31 = vpack.c.bf16 %v6454_v14, %v6454_v14 }
 0x4c0   :  { %v5487_v59 = vpop.f32.mrf.mxu3 }
 0x4c1   :  { %6583 = vst.msk [vmem:[%s10634_s5 + $0xcc] sm:$0xf] %vm6531_vm8, %v6518_v31  ;;  %v5569_v55 = vadd.f32 %v5487_v59, %v5203_v16  ;;  %v10748_v31 = vld [vmem:[#allocation20_spill] sm:$0xff] }
 0x4c2   :  { %6621 = vst.msk [vmem:[%s10634_s5 + $0xcc] sm:$0xf] %vm6531_vm8, %v10721_v54  ;;  %v6309_v12 = vpop.f32.mrf.mxu0 }
 0x4c3   :  { %v6391_v4 = vadd.f32 %v6309_v12, %v5569_v55 }
 0x4c4   :  { %v4268_v2 = vpop.f32.mrf.mxu1 }
 0x4c5   :  { %v6455_v11 = vmax.f32 %v6391_v4, 0.0  ;;  %v5123_v21 = vpop.f32.mrf.mxu2  ;;  %v4347_v36 = vadd.f32 %v4268_v2, %v10744_v28 }
 0x4c6   :  { %v5204_v17 = vadd.f32 %v5123_v21, %v4346_v49 }
 0x4c7   :  { %v6519_v52 = vpack.c.bf16 %v6455_v11, %v6455_v11 }
 0x4c8   :  { %v5489_v46 = vpop.f32.mrf.mxu3 }
 0x4c9   :  { %6584 = vst.msk [vmem:[%s10634_s5 + $0xd0] sm:$0xf] %vm6531_vm8, %v6519_v52  ;;  %v5570_v8 = vadd.f32 %v5489_v46, %v5204_v17  ;;  %v10749_v52 = vld [vmem:[#allocation22_spill] sm:$0xff] }
 0x4ca   :  { %v6311_v25 = vpop.f32.mrf.mxu0 }
 0x4cb   :  { %v6392_v9 = vadd.f32 %v6311_v25, %v5570_v8 }
 0x4cc   :  { %v4270_v63 = vpop.f32.mrf.mxu1 }
 0x4cd   :  { %v6456_v3 = vmax.f32 %v6392_v9, 0.0  ;;  %v5126_v29 = vpop.f32.mrf.mxu2  ;;  %v4348_v39 = vadd.f32 %v4270_v63, %v10745_v0 }
 0x4ce   :  { %v5205_v56 = vadd.f32 %v5126_v29, %v4347_v36 }
 0x4cf   :  { %v6520_v1 = vpack.c.bf16 %v6456_v3, %v6456_v3 }
 0x4d0   :  { %v5492_v22 = vpop.f32.mrf.mxu3 }
 0x4d1   :  { %6585 = vst.msk [vmem:[%s10634_s5 + $0xd4] sm:$0xf] %vm6531_vm8, %v6520_v1  ;;  %v5571_v30 = vadd.f32 %v5492_v22, %v5205_v56 }
 0x4d2   :  { %v6314_v13 = vpop.f32.mrf.mxu0 }
 0x4d3   :  { %v6393_v10 = vadd.f32 %v6314_v13, %v5571_v30 }
 0x4d4   :  { %v4273_v5 = vpop.f32.mrf.mxu1 }
 0x4d5   :  { %v6457_v50 = vmax.f32 %v6393_v10, 0.0  ;;  %v5128_v20 = vpop.f32.mrf.mxu2  ;;  %v4349_v18 = vadd.f32 %v4273_v5, %v10746_v43  ;;  %v10750_v5 = vld [vmem:[#allocation24_spill] sm:$0xff] }
 0x4d6   :  { %v5206_v33 = vadd.f32 %v5128_v20, %v4348_v39 }
 0x4d7   :  { %v6521_v42 = vpack.c.bf16 %v6457_v50, %v6457_v50 }
 0x4d8   :  { %v5494_v41 = vpop.f32.mrf.mxu3 }
 0x4d9   :  { %6586 = vst.msk [vmem:[%s10634_s5 + $0xd8] sm:$0xf] %vm6531_vm8, %v6521_v42  ;;  %v5572_v62 = vadd.f32 %v5494_v41, %v5206_v33 }
 0x4da   :  { %6622 = vst.msk [vmem:[%s10634_s5 + $0xd8] sm:$0xf] %vm6531_vm8, %v10721_v54  ;;  %v6316_v15 = vpop.f32.mrf.mxu0 }
 0x4db   :  { %v6394_v48 = vadd.f32 %v6316_v15, %v5572_v62 }
 0x4dc   :  { %v4275_v57 = vpop.f32.mrf.mxu1 }
 0x4dd   :  { %v6458_v37 = vmax.f32 %v6394_v48, 0.0  ;;  %v5131_v44 = vpop.f32.mrf.mxu2  ;;  %v4350_v58 = vadd.f32 %v4275_v57, %v10747_v47 }
 0x4de   :  { %v5207_v61 = vadd.f32 %v5131_v44, %v4349_v18 }
 0x4df   :  { %v6522_v24 = vpack.c.bf16 %v6458_v37, %v6458_v37 }
 0x4e0   :  { %v5497_v32 = vpop.f32.mrf.mxu3 }
 0x4e1   :  { %6587 = vst.msk [vmem:[%s10634_s5 + $0xdc] sm:$0xf] %vm6531_vm8, %v6522_v24  ;;  %v5573_v7 = vadd.f32 %v5497_v32, %v5207_v61 }
 0x4e2   :  { %6623 = vst.msk [vmem:[%s10634_s5 + $0xdc] sm:$0xf] %vm6531_vm8, %v10721_v54  ;;  %v6319_v45 = vpop.f32.mrf.mxu0 }
 0x4e3   :  { %v6395_v34 = vadd.f32 %v6319_v45, %v5573_v7 }
 0x4e4   :  { %v4278_v53 = vpop.f32.mrf.mxu1 }
 0x4e5   :  { %v6459_v38 = vmax.f32 %v6395_v34, 0.0  ;;  %v5133_v35 = vpop.f32.mrf.mxu2  ;;  %v4351_v59 = vadd.f32 %v4278_v53, %v10748_v31 }
 0x4e6   :  { %v5208_v51 = vadd.f32 %v5133_v35, %v4350_v58 }
 0x4e7   :  { %v6523_v40 = vpack.c.bf16 %v6459_v38, %v6459_v38 }
 0x4e8   :  { %v5499_v14 = vpop.f32.mrf.mxu3 }
 0x4e9   :  { %6588 = vst.msk [vmem:[%s10634_s5 + $0xe0] sm:$0xf] %vm6531_vm8, %v6523_v40  ;;  %v5574_v23 = vadd.f32 %v5499_v14, %v5208_v51 }
 0x4ea   :  { %v6321_v6 = vpop.f32.mrf.mxu0 }
 0x4eb   :  { %v6396_v16 = vadd.f32 %v6321_v6, %v5574_v23 }
 0x4ec   :  { %v4280_v4 = vpop.f32.mrf.mxu1 }
 0x4ed   :  { %v6460_v55 = vmax.f32 %v6396_v16, 0.0  ;;  %v5136_v12 = vpop.f32.mrf.mxu2  ;;  %v4352_v46 = vadd.f32 %v4280_v4, %v10749_v52 }
 0x4ee   :  { %v5209_v19 = vadd.f32 %v5136_v12, %v4351_v59 }
 0x4ef   :  { %v6524_v49 = vpack.c.bf16 %v6460_v55, %v6460_v55 }
 0x4f0   :  { %v5502_v11 = vpop.f32.mrf.mxu3 }
 0x4f1   :  { %6589 = vst.msk [vmem:[%s10634_s5 + $0xe4] sm:$0xf] %vm6531_vm8, %v6524_v49  ;;  %v5575_v21 = vadd.f32 %v5502_v11, %v5209_v19 }
 0x4f2   :  { %v6324_v2 = vpop.f32.mrf.mxu0 }
 0x4f3   :  { %v6397_v17 = vadd.f32 %v6324_v2, %v5575_v21 }
 0x4f4   :  { %v4283_v9 = vpop.f32.mrf.mxu1 }
 0x4f5   :  { %v6461_v8 = vmax.f32 %v6397_v17, 0.0  ;;  %v5138_v25 = vpop.f32.mrf.mxu2  ;;  %v4353_v1 = vadd.f32 %v4283_v9, %v9732_v26 }
 0x4f6   :  { %v5210_v28 = vadd.f32 %v5138_v25, %v4352_v46 }
 0x4f7   :  { %v6525_v36 = vpack.c.bf16 %v6461_v8, %v6461_v8 }
 0x4f8   :  { %v5504_v3 = vpop.f32.mrf.mxu3 }
 0x4f9   :  { %6590 = vst.msk [vmem:[%s10634_s5 + $0xe8] sm:$0xf] %vm6531_vm8, %v6525_v36  ;;  %v5576_v29 = vadd.f32 %v5504_v3, %v5210_v28 }
 0x4fa   :  { %6624 = vst.msk [vmem:[%s10634_s5 + $0xe8] sm:$0xf] %vm6531_vm8, %v10721_v54  ;;  %v6326_v63 = vpop.f32.mrf.mxu0 }
 0x4fb   :  { %v6398_v56 = vadd.f32 %v6326_v63, %v5576_v29 }
 0x4fc   :  { %v4285_v13 = vpop.f32.mrf.mxu1 }
 0x4fd   :  { %v6462_v22 = vmax.f32 %v6398_v56, 0.0  ;;  %v5141_v30 = vpop.f32.mrf.mxu2  ;;  %v4354_v33 = vadd.f32 %v4285_v13, %v10750_v5 }
 0x4fe   :  { %v5211_v10 = vadd.f32 %v5141_v30, %v4353_v1 }
 0x4ff   :  { %v6526_v0 = vpack.c.bf16 %v6462_v22, %v6462_v22 }
 0x500   :  { %v5507_v39 = vpop.f32.mrf.mxu3 }
 0x501   :  { %6591 = vst.msk [vmem:[%s10634_s5 + $0xec] sm:$0xf] %vm6531_vm8, %v6526_v0  ;;  %v5577_v50 = vadd.f32 %v5507_v39, %v5211_v10 }
 0x502   :  { %6625 = vst.msk [vmem:[%s10634_s5 + $0xec] sm:$0xf] %vm6531_vm8, %v10721_v54  ;;  %v6329_v20 = vpop.f32.mrf.mxu0 }
 0x503   :  { %v6399_v26 = vadd.f32 %v6329_v20, %v5577_v50 }
 0x504   :  { %v4288_v48 = vpop.f32.mrf.mxu1 }
 0x505   :  { %v6463_v42 = vmax.f32 %v6399_v26, 0.0  ;;  %v5143_v41 = vpop.f32.mrf.mxu2  ;;  %v4355_v57 = vadd.f32 %v4288_v48, %v9752_v60 }
 0x506   :  { %v5212_v62 = vadd.f32 %v5143_v41, %v4354_v33 }
 0x507   :  { %v6527_v15 = vpack.c.bf16 %v6463_v42, %v6463_v42 }
 0x508   :  { %v5509_v43 = vpop.f32.mrf.mxu3 }
 0x509   :  { %6592 = vst.msk [vmem:[%s10634_s5 + $0xf0] sm:$0xf] %vm6531_vm8, %v6527_v15  ;;  %v5578_v18 = vadd.f32 %v5509_v43, %v5212_v62 }
 0x50a   :  { %v6331_v37 = vpop.f32.mrf.mxu0 }
 0x50b   :  { %v6400_v44 = vadd.f32 %v6331_v37, %v5578_v18 }
 0x50c   :  { %v4290_v47 = vpop.f32.mrf.mxu1 }
 0x50d   :  { %v6464_v61 = vmax.f32 %v6400_v44, 0.0  ;;  %v5146_v24 = vpop.f32.mrf.mxu2  ;;  %v4356_v35 = vadd.f32 %v4290_v47, %v9764_v27 }
 0x50e   :  { %v5213_v32 = vadd.f32 %v5146_v24, %v4355_v57 }
 0x50f   :  { %v6528_v7 = vpack.c.bf16 %v6464_v61, %v6464_v61 }
 0x510   :  { %v5512_v45 = vpop.f32.mrf.mxu3 }
 0x511   :  { %6593 = vst.msk [vmem:[%s10634_s5 + $0xf4] sm:$0xf] %vm6531_vm8, %v6528_v7  ;;  %v5579_v34 = vadd.f32 %v5512_v45, %v5213_v32 }
 0x512   :  { %v6334_v58 = vpop.f32.mrf.mxu0 }
 0x513   :  { %v6401_v38 = vadd.f32 %v6334_v58, %v5579_v34 }
 0x515   :  { %v6465_v53 = vmax.f32 %v6401_v38, 0.0  ;;  %v5148_v51 = vpop.f32.mrf.mxu2 }
 0x516   :  { %v5214_v40 = vadd.f32 %v5148_v51, %v4356_v35 }
 0x517   :  { %v6529_v60 = vpack.c.bf16 %v6465_v53, %v6465_v53 }
 0x518   :  { %v5514_v14 = vpop.f32.mrf.mxu3 }
 0x519   :  { %6594 = vst.msk [vmem:[%s10634_s5 + $0xf8] sm:$0xf] %vm6531_vm8, %v6529_v60  ;;  %v5580_v23 = vadd.f32 %v5514_v14, %v5214_v40 }
 0x51a   :  { %6626 = vst.msk [vmem:[%s10634_s5 + $0xf8] sm:$0xf] %vm6531_vm8, %v10721_v54  ;;  %v6336_v6 = vpop.f32.mrf.mxu0 }
 0x51b   :  { %v6402_v16 = vadd.f32 %v6336_v6, %v5580_v23 }
 0x51d   :  { %v6466_v27 = vmax.f32 %v6402_v16, 0.0 }
 0x51f   :  { %v6530_v31 = vpack.c.bf16 %v6466_v27, %v6466_v27 }
 0x521   :  { %6595 = vst.msk [vmem:[%s10634_s5 + $0xfc] sm:$0xf] %vm6531_vm8, %v6530_v31 }
 0x522   :  { %6627 = vst.msk [vmem:[%s10634_s5 + $0xfc] sm:$0xf] %vm6531_vm8, %v10721_v54 }

</bundles_post_ra>
